<compile_context>
chip_gen: v6e
topology: v6e:2x2x1
jax: 0.10.0
libtpu: 0.0.40
codegen_flags: <defaults>
</compile_context>

<pallas_src>
import functools
import math

import numpy as np

import jax
import jax.numpy as jnp
from jax.experimental import pallas as pl
from jax.experimental.pallas import tpu as pltpu


def _round_up(v, m):
    return ((v + m - 1) // m) * m


# ---------------------------------------------------------------------------
# Pallas kernel: one grid step processes TN rows of the folded batch.
# ---------------------------------------------------------------------------
def _axial_attention_kernel(G, GC, GCH, TN, L,
                            x_ref,        # [P, C_in]        bf16
                            w_ref,        # [C_in, NCOL]     bf16 (qk spread | v)
                            b_ref,        # [1, NCOL]        f32
                            e_ref,        # [GCH, L, 2*G*L]  f32  (qe|ke per pos)
                            vearr_ref,    # [L, GC*L]        f32  ve[c,i,j] at (i,(c,j))
                            s2_ref,       # [L, GC*L]        bf16 0/1 spread matrix
                            m_ref,        # [G, GC*L, GC]    f32  segment-sum * s_ame
                            bout_ref,     # [1, C_out]       f32  summed output-BN shift
                            sqk_ref, sqe_ref, ske_ref, bsim_ref,   # SMEM (G,) f32
                            o_ref,        # [C_out, P]       f32
                            out_sc):      # VMEM scratch [P, C_out] f32
    C_out = G * GC
    QKW = 2 * G * L
    QK_COLS = GCH * QKW
    P = TN * L

    # (1) fused 1x1 conv (+ folded BN1 scale/shift): one bf16 MXU GEMM that
    #     emits spread q/k columns and the (am-BN-scaled) value columns.
    qkv = jnp.dot(x_ref[...], w_ref[...],
                  preferred_element_type=jnp.float32) + b_ref[...]    # [P, NCOL]

    # (2) position-dependent relative-embedding contraction, lane-dense:
    #     qkemb[n, m, (qk,g,i)] = sum_c q_or_k[n,(g,c),m] * emb[c,m,i]
    qkemb = None
    for c in range(GCH):                                              # GCH static
        sl = qkv[:, c * QKW:(c + 1) * QKW].reshape(TN, L, QKW)
        term = sl * e_ref[c][None, :, :]
        qkemb = term if qkemb is None else qkemb + term               # [TN, L, QKW]

    # value part of the projection (output-BN "attention map" scale folded in)
    v3 = qkv[:, QK_COLS:].reshape(TN, L, C_out).astype(jnp.bfloat16)  # [TN, L(j), C_out]

    # hoisted broadcasts / loads (JAX does not CSE broadcast_in_dim)
    vearr_b = jnp.broadcast_to(vearr_ref[...][None, :, :], (TN, L, GC * L))
    s2 = s2_ref[...]                                                  # [L, GC*L] bf16

    for g in range(G):                                                # static unroll
        q_emb = qkemb[:, :, g * L:(g + 1) * L]                        # [TN, L, L] f32
        k_emb = qkemb[:, :, G * L + g * L:G * L + (g + 1) * L]        # [TN, L, L] f32

        # query-key logits: batched (over TN rows) MXU contraction over position
        qk = jnp.einsum('nim,nmj->nij', jnp.swapaxes(q_emb, -1, -2), k_emb,
                        preferred_element_type=jnp.float32)           # [TN, L, L]

        # folded similarity BatchNorm2d (inference) + sum of the three terms
        sim = (sqk_ref[g] * qk + sqe_ref[g] * q_emb +
               ske_ref[g] * k_emb + bsim_ref[g])

        # softmax over the attention axis (EUP reciprocal, no divide)
        sim = sim - jnp.max(sim, axis=-1, keepdims=True)
        p = jnp.exp(sim)
        p = p * pl.reciprocal(jnp.sum(p, axis=-1, keepdims=True), approx=True)

        # attention over values: batched MXU matmul (am-BN scale already in v3)
        am = jnp.einsum('nij,njc->nic', p.astype(jnp.bfloat16),
                        v3[:, :, g * GC:(g + 1) * GC],
                        preferred_element_type=jnp.float32)           # [TN, L, GC]
        am = am.reshape(P, GC)

        # attention over value embeddings via 2D MXU matmuls (no lane reduce):
        #   spread p across GC lane segments, multiply by ve[c,i,j], then a
        #   segmented-sum matmul (with the ame-BN scale folded into m_ref).
        p2 = p.reshape(P, L).astype(jnp.bfloat16)
        spread = jnp.dot(p2, s2, preferred_element_type=jnp.float32)  # [P, GC*L]
        spread = spread.reshape(TN, L, GC * L) * vearr_b
        ame = jnp.dot(spread.reshape(P, GC * L), m_ref[g],
                      preferred_element_type=jnp.float32)             # [P, GC]

        out_sc[:, g * GC:(g + 1) * GC] = am + ame                     # bounded live range

    # single lane-dense store: last dim = TN*L (multiple of 128)
    o_ref[...] = (out_sc[...] + bout_ref[...]).T.astype(o_ref.dtype)


# ---------------------------------------------------------------------------
# Wrapper (layout, parameter folding, pallas_call)
# ---------------------------------------------------------------------------
def axial_attention_2d(x, params, *, dim, span, groups, out_channels,
                       tn_block=128):
    G, L = groups, span
    C_out = out_channels
    GC = out_channels // groups
    GCH = GC // 2
    assert GC % 2 == 0, "group channels must be even (q/k split)"
    QKW = 2 * G * L
    QK_COLS = GCH * QKW
    NCOL = QK_COLS + C_out

    if dim == 0:
        xp = jnp.transpose(x, (0, 3, 1, 2))            # [B, W, C_in, H]
    else:
        xp = jnp.transpose(x, (0, 2, 1, 3))            # [B, H, C_in, W]
    B, D1, C_in, L_in = xp.shape
    assert L_in == span, "attention axis length must equal span"
    N = B * D1

    # --- choose the row block TN (multiple of tn_unit so TN*L % 128 == 0) ---
    tn_unit = max(8, 128 // math.gcd(L, 128))
    TN = max(tn_unit, (int(tn_block) // tn_unit) * tn_unit)
    TN = min(TN, _round_up(N, tn_unit))
    if pl.cdiv(N, TN) == 1 and TN >= 2 * tn_unit:
        # give both TensorCores (v7x megacore) a grid step when possible
        TN = max(tn_unit, _round_up(pl.cdiv(N, 2), tn_unit))
    N_pad = _round_up(N, TN)
    P = TN * L

    # --- position-major input [N_pad*L, C_in] in bf16 ---
    xt = jnp.transpose(xp, (0, 1, 3, 2)).reshape(N * L, C_in).astype(jnp.bfloat16)
    if N_pad != N:
        xt = jnp.pad(xt, ((0, (N_pad - N) * L), (0, 0)))

    # --- fold BN1 scale into the conv weight ---
    w_s = params['w_qkv'] * params['bn1_scale'][:, None]    # [2*C_out, C_in]
    sh = params['bn1_shift']                                # [2*C_out]

    def ch_q(g, c): return g * 2 * GC + c
    def ch_k(g, c): return g * 2 * GC + GCH + c
    def ch_v(g, c): return g * 2 * GC + GC + c

    # q/k "spread" columns: col = c*QKW + qk*(G*L) + g*L + i  (value indep. of i)
    qk_channels = np.empty((GCH, 2, G), dtype=np.int32)
    for c in range(GCH):
        for g in range(G):
            qk_channels[c, 0, g] = ch_q(g, c)
            qk_channels[c, 1, g] = ch_k(g, c)
    qk_channels = qk_channels.reshape(-1)
    w_qk_spread = jnp.repeat(w_s[qk_channels], L, axis=0)             # [QK_COLS, C_in]
    b_qk_spread = jnp.repeat(sh[qk_channels], L, axis=0)              # [QK_COLS]

    # output BN: channel = 2*(g*GC + c) + k, k=0 -> attn map, k=1 -> embedded
    bn_os = params['bn_out_scale'].reshape(C_out, 2)
    bn_ob = params['bn_out_shift'].reshape(C_out, 2)
    s_am, s_ame = bn_os[:, 0], bn_os[:, 1]                            # [C_out]
    b_out = jnp.sum(bn_ob, axis=1)[None, :].astype(jnp.float32)       # [1, C_out]

    v_channels = np.array([ch_v(g, c) for g in range(G) for c in range(GC)],
                          dtype=np.int32)
    w_v = w_s[v_channels] * s_am[:, None]                 # fold am output-BN scale
    b_v = sh[v_channels] * s_am

    w_all = jnp.concatenate([w_qk_spread, w_v], axis=0).T.astype(jnp.bfloat16)
    b_all = jnp.concatenate([b_qk_spread, b_v], axis=0)[None, :].astype(jnp.float32)

    # --- relative embeddings (untiled constants) ---
    emb = params['rel_emb'][:, params['rel_idx']].reshape(2 * GC, L, L)
    qe, ke, ve = emb[:GCH], emb[GCH:2 * GCH], emb[2 * GCH:]
    e_q = jnp.tile(qe, (1, 1, G))                                     # [GCH, L, G*L]
    e_k = jnp.tile(ke, (1, 1, G))
    e_const = jnp.concatenate([e_q, e_k], axis=-1).astype(jnp.float32)  # [GCH, L, QKW]

    vearr = jnp.transpose(ve, (1, 0, 2)).reshape(L, GC * L).astype(jnp.float32)
    s2 = jnp.tile(jnp.eye(L, dtype=jnp.float32), (1, GC)).astype(jnp.bfloat16)
    m_base = jnp.repeat(jnp.eye(GC, dtype=jnp.float32), L, axis=0)    # [GC*L, GC]
    m_const = (m_base[None, :, :] *
               s_ame.reshape(G, GC)[:, None, :]).astype(jnp.float32)  # [G, GC*L, GC]

    # similarity BN (channels ordered [qk(G), q_emb(G), k_emb(G)]), per group
    s_sim, b_sim_full = params['bn_sim_scale'], params['bn_sim_shift']
    s_qk, s_qe, s_ke = s_sim[:G], s_sim[G:2 * G], s_sim[2 * G:]
    b_sim = b_sim_full[:G] + b_sim_full[G:2 * G] + b_sim_full[2 * G:]

    kernel = functools.partial(_axial_attention_kernel, G, GC, GCH, TN, L)

    def const_spec(shape):
        nd = len(shape)
        return pl.BlockSpec(shape, lambda nb, _n=nd: (0,) * _n)

    smem_spec = pl.BlockSpec(memory_space=pltpu.MemorySpace.SMEM)

    # VMEM budget: double-buffered x/out blocks + in-kernel intermediates.
    vmem_est = (2 * P * C_in * 2 + 2 * C_out * P * 4
                + P * NCOL * 4 + P * QKW * 4
                + P * (GC * L) * 4 * 2 + P * L * 4 * 8 + P * C_out * 4
                + (C_in * NCOL + GCH * L * QKW + 3 * GC * L * L) * 4
                + (1 << 20))
    vmem_limit = int(min(60 * 1024 * 1024, max(16 * 1024 * 1024, 2 * vmem_est)))

    out = pl.pallas_call(
        kernel,
        out_shape=jax.ShapeDtypeStruct((C_out, N_pad * L), jnp.float32),
        grid=(N_pad // TN,),
        in_specs=[
            pl.BlockSpec((P, C_in), lambda nb: (nb, 0)),     # x (position-major)
            const_spec((C_in, NCOL)),                        # fused projection weight
            const_spec((1, NCOL)),                           # fused projection bias
            const_spec((GCH, L, QKW)),                       # q/k relative embeddings
            const_spec((L, GC * L)),                         # ve arranged (i,(c,j))
            const_spec((L, GC * L)),                          # 0/1 spread matrix
            const_spec((G, GC * L, GC)),                     # segmented-sum * s_ame
            const_spec((1, C_out)),                          # out-BN shift (summed)
            smem_spec, smem_spec, smem_spec, smem_spec,      # sim-BN per-group scalars
        ],
        out_specs=pl.BlockSpec((C_out, P), lambda nb: (0, nb)),
        scratch_shapes=[pltpu.VMEM((P, C_out), jnp.float32)],
        compiler_params=pltpu.CompilerParams(
            dimension_semantics=("parallel",),
            vmem_limit_bytes=vmem_limit),
    )(xt, w_all, b_all, e_const, vearr, s2, m_const, b_out,
      s_qk, s_qe, s_ke, b_sim)

    out = out.reshape(C_out, N_pad, L)[:, :N].reshape(C_out, B, D1, L)
    if dim == 0:
        return jnp.transpose(out, (1, 0, 3, 2))              # [B, C_out, H, W]
    return jnp.transpose(out, (1, 0, 2, 3))                  # [B, C_out, H, W]


# ---------------------------------------------------------------------------
# Pure-JAX reference mirroring the PyTorch forward (for verification)
# ---------------------------------------------------------------------------
def ref_forward(x, p, *, dim, span, groups, out_channels):
    G = groups
    GC = out_channels // groups
    GCH = GC // 2
    if dim == 0:
        xp = jnp.transpose(x, (0, 3, 1, 2))
    else:
        xp = jnp.transpose(x, (0, 2, 1, 3))
    B, D1, C, L = xp.shape
    xr = xp.reshape(B * D1, C, L)
    qkv = jnp.einsum('oc,ncl->nol', p['w_qkv'], xr)
    qkv = qkv * p['bn1_scale'][None, :, None] + p['bn1_shift'][None, :, None]
    qkv = qkv.reshape(B * D1, G, 2 * GC, L)
    q, k, v = qkv[:, :, :GCH], qkv[:, :, GCH:2 * GCH], qkv[:, :, 2 * GCH:]
    emb = p['rel_emb'][:, p['rel_idx']].reshape(2 * GC, span, span)
    qe, ke, ve = emb[:GCH], emb[GCH:2 * GCH], emb[2 * GCH:]
    q_emb = jnp.einsum('ngci,cij->ngij', q, qe)
    k_emb = jnp.einsum('ngci,cij->ngij', k, ke)
    qk = jnp.einsum('ngci,ngcj->ngij', q_emb, k_emb)
    sim = jnp.concatenate([qk, q_emb, k_emb], axis=1)                 # [N, 3G, L, L]
    sim = (sim * p['bn_sim_scale'][None, :, None, None]
           + p['bn_sim_shift'][None, :, None, None])
    sim = sim.reshape(B * D1, 3, G, L, L).sum(axis=1)
    sim = jax.nn.softmax(sim, axis=3)
    am = jnp.einsum('ngij,ngcj->ngci', sim, v)
    ame = jnp.einsum('ngij,cij->ngci', sim, ve)
    out = jnp.concatenate([am, ame], axis=-1).reshape(B * D1, 2 * out_channels, L)
    out = out * p['bn_out_scale'][None, :, None] + p['bn_out_shift'][None, :, None]
    out = out.reshape(B, D1, out_channels, 2, L).sum(axis=-2)
    if dim == 0:
        return jnp.transpose(out, (0, 2, 3, 1))
    return jnp.transpose(out, (0, 2, 1, 3))


# ---------------------------------------------------------------------------
# Deterministic parameter init (eval-mode BN folded to scale/shift)
# ---------------------------------------------------------------------------
def init_params(key, in_channels, out_channels, groups, span):
    GC = out_channels // groups
    ks = jax.random.split(key, 5)

    def bn_fold(k, n, eps=1e-5):
        k1, k2, k3, k4 = jax.random.split(k, 4)
        gamma = 1.0 + 0.1 * jax.random.normal(k1, (n,))
        beta = 0.1 * jax.random.normal(k2, (n,))
        mean = 0.05 * jax.random.normal(k3, (n,))
        var = 1.0 + 0.1 * jnp.abs(jax.random.normal(k4, (n,)))
        scale = gamma / jnp.sqrt(var + eps)
        shift = beta - mean * scale
        return scale.astype(jnp.float32), shift.astype(jnp.float32)

    w_qkv = (0.1 * jax.random.normal(ks[0], (2 * out_channels, in_channels))
             ).astype(jnp.float32)
    bn1_s, bn1_b = bn_fold(ks[1], 2 * out_channels)
    bns_s, bns_b = bn_fold(ks[2], 3 * groups)
    bno_s, bno_b = bn_fold(ks[3], 2 * out_channels)
    rel_emb = jax.random.normal(ks[4], (2 * GC, 2 * span - 1)).astype(jnp.float32)
    rel_idx = (jnp.arange(span)[:, None] - jnp.arange(span)[None, :]
               + span - 1).reshape(-1)
    return dict(w_qkv=w_qkv, bn1_scale=bn1_s, bn1_shift=bn1_b,
                bn_sim_scale=bns_s, bn_sim_shift=bns_b,
                bn_out_scale=bno_s, bn_out_shift=bno_b,
                rel_emb=rel_emb, rel_idx=rel_idx)


if __name__ == "__main__":
    in_channels, out_channels, groups, span = 16, 16, 4, 16

    key = jax.random.PRNGKey(0)
    kx0, kx1, kx2, kp = jax.random.split(key, 4)
    params = init_params(kp, in_channels, out_channels, groups, span)

    def check(x, dim, **kw):
        out = jax.block_until_ready(
            axial_attention_2d(x, params, dim=dim, span=span, groups=groups,
                               out_channels=out_channels, **kw))
        ref = ref_forward(x, params, dim=dim, span=span, groups=groups,
                          out_channels=out_channels)
        assert out.shape == ref.shape, (out.shape, ref.shape)
        err = float(jnp.max(jnp.abs(out - ref)))
        # bf16 MXU inputs + approx reciprocal -> slightly relaxed tolerance
        assert jnp.allclose(out, ref, rtol=3e-2, atol=3e-2), err
        return err

    # dim = 1 (attention along width): x NCHW with W == span
    x = jax.random.normal(kx0, (2, in_channels, 4, span), dtype=jnp.float32)
    check(x, 1)

    # dim = 0 (attention along height): x NCHW with H == span
    x0 = jax.random.normal(kx1, (2, in_channels, span, 6), dtype=jnp.float32)
    check(x0, 0)

    # multi-step grid + row-padding path (small TN forces 3 grid steps)
    x2 = jax.random.normal(kx2, (2, in_channels, 10, span), dtype=jnp.float32)
    check(x2, 1, tn_block=8)

    print("KERNEL_OK")
</pallas_src>

<mosaic_0001>
module attributes {stable_mosaic.version = 11 : i64} {
  func.func @_axial_attention_kernel(%arg0: i32, %arg1: memref<128x16xbf16, #tpu.memory_space<vmem>>, %arg2: memref<16x272xbf16, #tpu.memory_space<vmem>>, %arg3: memref<1x272xf32, #tpu.memory_space<vmem>>, %arg4: memref<2x16x128xf32, #tpu.memory_space<vmem>>, %arg5: memref<16x64xf32, #tpu.memory_space<vmem>>, %arg6: memref<16x64xbf16, #tpu.memory_space<vmem>>, %arg7: memref<4x64x4xf32, #tpu.memory_space<vmem>>, %arg8: memref<1x16xf32, #tpu.memory_space<vmem>>, %arg9: memref<4xf32, #tpu.memory_space<smem>>, %arg10: memref<4xf32, #tpu.memory_space<smem>>, %arg11: memref<4xf32, #tpu.memory_space<smem>>, %arg12: memref<4xf32, #tpu.memory_space<smem>>, %arg13: memref<16x128xf32, #tpu.memory_space<vmem>>, %arg14: memref<128x16xf32, #tpu.memory_space<vmem>>) attributes {dimension_semantics = [#tpu.dimension_semantics<parallel>], iteration_bounds = array<i64: 1>, scalar_prefetch = 0 : i64, scratch_operands = 1 : i64, tpu.core_type = #tpu.core_type<tc>, window_params = [{transform_indices = @transform_0, window_bounds = array<i64: 128, 16>}, {pipeline_mode = #tpu.pipeline_mode<synchronous>, transform_indices = @transform_1, window_bounds = array<i64: 16, 272>}, {pipeline_mode = #tpu.pipeline_mode<synchronous>, transform_indices = @transform_2, window_bounds = array<i64: 1, 272>}, {pipeline_mode = #tpu.pipeline_mode<synchronous>, transform_indices = @transform_3, window_bounds = array<i64: 2, 16, 128>}, {pipeline_mode = #tpu.pipeline_mode<synchronous>, transform_indices = @transform_4, window_bounds = array<i64: 16, 64>}, {pipeline_mode = #tpu.pipeline_mode<synchronous>, transform_indices = @transform_5, window_bounds = array<i64: 16, 64>}, {pipeline_mode = #tpu.pipeline_mode<synchronous>, transform_indices = @transform_6, window_bounds = array<i64: 4, 64, 4>}, {pipeline_mode = #tpu.pipeline_mode<synchronous>, transform_indices = @transform_7, window_bounds = array<i64: 1, 16>}, {transform_indices = @transform_8, window_bounds = array<i64: 4>}, {transform_indices = @transform_9, window_bounds = array<i64: 4>}, {transform_indices = @transform_10, window_bounds = array<i64: 4>}, {transform_indices = @transform_11, window_bounds = array<i64: 4>}, {transform_indices = @transform_12, window_bounds = array<i64: 16, 128>}]} {
    %c0 = arith.constant 0 : index
    %c0_0 = arith.constant 0 : index
    %0 = vector.load %arg1[%c0, %c0_0] : memref<128x16xbf16, #tpu.memory_space<vmem>>, vector<128x16xbf16>
    %c0_1 = arith.constant 0 : index
    %c0_2 = arith.constant 0 : index
    %1 = vector.load %arg2[%c0_1, %c0_2] : memref<16x272xbf16, #tpu.memory_space<vmem>>, vector<16x272xbf16>
    %cst = arith.constant dense<0.000000e+00> : vector<128x272xf32>
    %2 = tpu.matmul %0, %1, %cst {dimension_numbers = #tpu.dot_dimension_numbers<[1], [0], [0], [1], [0, 0, 1, 1], [], []>} : vector<128x16xbf16>, vector<16x272xbf16>, vector<128x272xf32> -> vector<128x272xf32>
    %c0_3 = arith.constant 0 : index
    %c0_4 = arith.constant 0 : index
    %3 = vector.load %arg3[%c0_3, %c0_4] : memref<1x272xf32, #tpu.memory_space<vmem>>, vector<1x272xf32>
    %4 = vector.broadcast %3 : vector<1x272xf32> to vector<128x272xf32>
    %5 = arith.addf %2, %4 : vector<128x272xf32>
    %6 = vector.extract_strided_slice %5 {offsets = [0, 0], sizes = [128, 128], strides = [1, 1]} : vector<128x272xf32> to vector<128x128xf32>
    %7 = vector.shape_cast %6 : vector<128x128xf32> to vector<8x16x128xf32>
    %c0_5 = arith.constant 0 : index
    %c0_6 = arith.constant 0 : index
    %c0_7 = arith.constant 0 : index
    %8 = vector.load %arg4[%c0_5, %c0_6, %c0_7] : memref<2x16x128xf32, #tpu.memory_space<vmem>>, vector<1x16x128xf32>
    %9 = vector.shape_cast %8 : vector<1x16x128xf32> to vector<16x128xf32>
    %10 = vector.shape_cast %9 : vector<16x128xf32> to vector<1x16x128xf32>
    %11 = vector.broadcast %10 : vector<1x16x128xf32> to vector<8x16x128xf32>
    %12 = arith.mulf %7, %11 : vector<8x16x128xf32>
    %13 = vector.extract_strided_slice %5 {offsets = [0, 128], sizes = [128, 128], strides = [1, 1]} : vector<128x272xf32> to vector<128x128xf32>
    %14 = vector.shape_cast %13 : vector<128x128xf32> to vector<8x16x128xf32>
    %c1 = arith.constant 1 : index
    %c0_8 = arith.constant 0 : index
    %c0_9 = arith.constant 0 : index
    %15 = vector.load %arg4[%c1, %c0_8, %c0_9] : memref<2x16x128xf32, #tpu.memory_space<vmem>>, vector<1x16x128xf32>
    %16 = vector.shape_cast %15 : vector<1x16x128xf32> to vector<16x128xf32>
    %17 = vector.shape_cast %16 : vector<16x128xf32> to vector<1x16x128xf32>
    %18 = vector.broadcast %17 : vector<1x16x128xf32> to vector<8x16x128xf32>
    %19 = arith.mulf %14, %18 : vector<8x16x128xf32>
    %20 = arith.addf %12, %19 : vector<8x16x128xf32>
    %21 = vector.extract_strided_slice %5 {offsets = [0, 256], sizes = [128, 16], strides = [1, 1]} : vector<128x272xf32> to vector<128x16xf32>
    %22 = vector.shape_cast %21 : vector<128x16xf32> to vector<8x16x16xf32>
    %23 = arith.truncf %22 : vector<8x16x16xf32> to vector<8x16x16xbf16>
    %c0_10 = arith.constant 0 : index
    %c0_11 = arith.constant 0 : index
    %24 = vector.load %arg5[%c0_10, %c0_11] : memref<16x64xf32, #tpu.memory_space<vmem>>, vector<16x64xf32>
    %25 = vector.shape_cast %24 : vector<16x64xf32> to vector<1x16x64xf32>
    %26 = vector.shape_cast %25 : vector<1x16x64xf32> to vector<1x16x64xf32>
    %27 = vector.broadcast %26 : vector<1x16x64xf32> to vector<8x16x64xf32>
    %c0_12 = arith.constant 0 : index
    %c0_13 = arith.constant 0 : index
    %28 = vector.load %arg6[%c0_12, %c0_13] : memref<16x64xbf16, #tpu.memory_space<vmem>>, vector<16x64xbf16>
    %29 = vector.extract_strided_slice %20 {offsets = [0, 0, 0], sizes = [8, 16, 16], strides = [1, 1, 1]} : vector<8x16x128xf32> to vector<8x16x16xf32>
    %30 = vector.extract_strided_slice %20 {offsets = [0, 0, 64], sizes = [8, 16, 16], strides = [1, 1, 1]} : vector<8x16x128xf32> to vector<8x16x16xf32>
    %31 = tpu.transpose %29, [0, 2, 1] : vector<8x16x16xf32> -> vector<8x16x16xf32>
    "tpu.trace_start"() <{level = 10 : i32, message = "nim,nmj->nij"}> : () -> ()
    %cst_14 = arith.constant dense<0.000000e+00> : vector<8x16x16xf32>
    %32 = tpu.matmul %31, %30, %cst_14 {dimension_numbers = #tpu.dot_dimension_numbers<[2], [1], [1], [2], [0, 0, 0, 1, 1, 2], [0], [0]>} : vector<8x16x16xf32>, vector<8x16x16xf32>, vector<8x16x16xf32> -> vector<8x16x16xf32>
    "tpu.trace_stop"() : () -> ()
    %c0_15 = arith.constant 0 : index
    %33 = memref.load %arg9[%c0_15] : memref<4xf32, #tpu.memory_space<smem>>
    %34 = vector.broadcast %33 : f32 to vector<8x16x16xf32>
    %35 = arith.mulf %34, %32 : vector<8x16x16xf32>
    %c0_16 = arith.constant 0 : index
    %36 = memref.load %arg10[%c0_16] : memref<4xf32, #tpu.memory_space<smem>>
    %37 = vector.broadcast %36 : f32 to vector<8x16x16xf32>
    %38 = arith.mulf %37, %29 : vector<8x16x16xf32>
    %39 = arith.addf %35, %38 : vector<8x16x16xf32>
    %c0_17 = arith.constant 0 : index
    %40 = memref.load %arg11[%c0_17] : memref<4xf32, #tpu.memory_space<smem>>
    %41 = vector.broadcast %40 : f32 to vector<8x16x16xf32>
    %42 = arith.mulf %41, %30 : vector<8x16x16xf32>
    %43 = arith.addf %39, %42 : vector<8x16x16xf32>
    %c0_18 = arith.constant 0 : index
    %44 = memref.load %arg12[%c0_18] : memref<4xf32, #tpu.memory_space<smem>>
    %45 = vector.broadcast %44 : f32 to vector<8x16x16xf32>
    %46 = arith.addf %43, %45 : vector<8x16x16xf32>
    %cst_19 = arith.constant dense<0xFF800000> : vector<8x16xf32>
    %47 = vector.multi_reduction <maximumf>, %46, %cst_19 [2] : vector<8x16x16xf32> to vector<8x16xf32>
    %48 = vector.shape_cast %47 : vector<8x16xf32> to vector<8x16x1xf32>
    %49 = vector.broadcast %48 : vector<8x16x1xf32> to vector<8x16x16xf32>
    %50 = arith.subf %46, %49 : vector<8x16x16xf32>
    %51 = math.exp %50 : vector<8x16x16xf32>
    %cst_20 = arith.constant dense<0.000000e+00> : vector<8x16xf32>
    %52 = vector.multi_reduction <add>, %51, %cst_20 [2] : vector<8x16x16xf32> to vector<8x16xf32>
    %53 = vector.shape_cast %52 : vector<8x16xf32> to vector<8x16x1xf32>
    %54 = tpu.reciprocal %53 {approx = true} : vector<8x16x1xf32> -> vector<8x16x1xf32>
    %55 = vector.broadcast %54 : vector<8x16x1xf32> to vector<8x16x16xf32>
    %56 = arith.mulf %51, %55 : vector<8x16x16xf32>
    %57 = arith.truncf %56 : vector<8x16x16xf32> to vector<8x16x16xbf16>
    %58 = vector.extract_strided_slice %23 {offsets = [0, 0, 0], sizes = [8, 16, 4], strides = [1, 1, 1]} : vector<8x16x16xbf16> to vector<8x16x4xbf16>
    "tpu.trace_start"() <{level = 10 : i32, message = "nij,njc->nic"}> : () -> ()
    %cst_21 = arith.constant dense<0.000000e+00> : vector<8x16x4xf32>
    %59 = tpu.matmul %57, %58, %cst_21 {dimension_numbers = #tpu.dot_dimension_numbers<[2], [1], [1], [2], [0, 0, 0, 1, 1, 2], [0], [0]>} : vector<8x16x16xbf16>, vector<8x16x4xbf16>, vector<8x16x4xf32> -> vector<8x16x4xf32>
    "tpu.trace_stop"() : () -> ()
    %60 = vector.shape_cast %59 : vector<8x16x4xf32> to vector<128x4xf32>
    %61 = vector.shape_cast %56 : vector<8x16x16xf32> to vector<128x16xf32>
    %62 = arith.truncf %61 : vector<128x16xf32> to vector<128x16xbf16>
    %cst_22 = arith.constant dense<0.000000e+00> : vector<128x64xf32>
    %63 = tpu.matmul %62, %28, %cst_22 {dimension_numbers = #tpu.dot_dimension_numbers<[1], [0], [0], [1], [0, 0, 1, 1], [], []>} : vector<128x16xbf16>, vector<16x64xbf16>, vector<128x64xf32> -> vector<128x64xf32>
    %64 = vector.shape_cast %63 : vector<128x64xf32> to vector<8x16x64xf32>
    %65 = arith.mulf %64, %27 : vector<8x16x64xf32>
    %66 = vector.shape_cast %65 : vector<8x16x64xf32> to vector<128x64xf32>
    %c0_23 = arith.constant 0 : index
    %c0_24 = arith.constant 0 : index
    %c0_25 = arith.constant 0 : index
    %67 = vector.load %arg7[%c0_23, %c0_24, %c0_25] : memref<4x64x4xf32, #tpu.memory_space<vmem>>, vector<1x64x4xf32>
    %68 = vector.shape_cast %67 : vector<1x64x4xf32> to vector<64x4xf32>
    %cst_26 = arith.constant dense<0.000000e+00> : vector<128x4xf32>
    %69 = tpu.matmul %66, %68, %cst_26 {dimension_numbers = #tpu.dot_dimension_numbers<[1], [0], [0], [1], [0, 0, 1, 1], [], []>} : vector<128x64xf32>, vector<64x4xf32>, vector<128x4xf32> -> vector<128x4xf32>
    %70 = arith.addf %60, %69 : vector<128x4xf32>
    %c0_27 = arith.constant 0 : index
    %c0_28 = arith.constant 0 : index
    %71 = vector.load %arg14[%c0_27, %c0_28] : memref<128x16xf32, #tpu.memory_space<vmem>>, vector<128x4xf32>
    tpu.vector_store %arg14[%c0_27, %c0_28], %70 {strides = array<i32>} : memref<128x16xf32, #tpu.memory_space<vmem>>, vector<128x4xf32>,
    %72 = vector.extract_strided_slice %20 {offsets = [0, 0, 16], sizes = [8, 16, 16], strides = [1, 1, 1]} : vector<8x16x128xf32> to vector<8x16x16xf32>
    %73 = vector.extract_strided_slice %20 {offsets = [0, 0, 80], sizes = [8, 16, 16], strides = [1, 1, 1]} : vector<8x16x128xf32> to vector<8x16x16xf32>
    %74 = tpu.transpose %72, [0, 2, 1] : vector<8x16x16xf32> -> vector<8x16x16xf32>
    "tpu.trace_start"() <{level = 10 : i32, message = "nim,nmj->nij"}> : () -> ()
    %cst_29 = arith.constant dense<0.000000e+00> : vector<8x16x16xf32>
    %75 = tpu.matmul %74, %73, %cst_29 {dimension_numbers = #tpu.dot_dimension_numbers<[2], [1], [1], [2], [0, 0, 0, 1, 1, 2], [0], [0]>} : vector<8x16x16xf32>, vector<8x16x16xf32>, vector<8x16x16xf32> -> vector<8x16x16xf32>
    "tpu.trace_stop"() : () -> ()
    %c1_30 = arith.constant 1 : index
    %76 = memref.load %arg9[%c1_30] : memref<4xf32, #tpu.memory_space<smem>>
    %77 = vector.broadcast %76 : f32 to vector<8x16x16xf32>
    %78 = arith.mulf %77, %75 : vector<8x16x16xf32>
    %c1_31 = arith.constant 1 : index
    %79 = memref.load %arg10[%c1_31] : memref<4xf32, #tpu.memory_space<smem>>
    %80 = vector.broadcast %79 : f32 to vector<8x16x16xf32>
    %81 = arith.mulf %80, %72 : vector<8x16x16xf32>
    %82 = arith.addf %78, %81 : vector<8x16x16xf32>
    %c1_32 = arith.constant 1 : index
    %83 = memref.load %arg11[%c1_32] : memref<4xf32, #tpu.memory_space<smem>>
    %84 = vector.broadcast %83 : f32 to vector<8x16x16xf32>
    %85 = arith.mulf %84, %73 : vector<8x16x16xf32>
    %86 = arith.addf %82, %85 : vector<8x16x16xf32>
    %c1_33 = arith.constant 1 : index
    %87 = memref.load %arg12[%c1_33] : memref<4xf32, #tpu.memory_space<smem>>
    %88 = vector.broadcast %87 : f32 to vector<8x16x16xf32>
    %89 = arith.addf %86, %88 : vector<8x16x16xf32>
    %cst_34 = arith.constant dense<0xFF800000> : vector<8x16xf32>
    %90 = vector.multi_reduction <maximumf>, %89, %cst_34 [2] : vector<8x16x16xf32> to vector<8x16xf32>
    %91 = vector.shape_cast %90 : vector<8x16xf32> to vector<8x16x1xf32>
    %92 = vector.broadcast %91 : vector<8x16x1xf32> to vector<8x16x16xf32>
    %93 = arith.subf %89, %92 : vector<8x16x16xf32>
    %94 = math.exp %93 : vector<8x16x16xf32>
    %cst_35 = arith.constant dense<0.000000e+00> : vector<8x16xf32>
    %95 = vector.multi_reduction <add>, %94, %cst_35 [2] : vector<8x16x16xf32> to vector<8x16xf32>
    %96 = vector.shape_cast %95 : vector<8x16xf32> to vector<8x16x1xf32>
    %97 = tpu.reciprocal %96 {approx = true} : vector<8x16x1xf32> -> vector<8x16x1xf32>
    %98 = vector.broadcast %97 : vector<8x16x1xf32> to vector<8x16x16xf32>
    %99 = arith.mulf %94, %98 : vector<8x16x16xf32>
    %100 = arith.truncf %99 : vector<8x16x16xf32> to vector<8x16x16xbf16>
    %101 = vector.extract_strided_slice %23 {offsets = [0, 0, 4], sizes = [8, 16, 4], strides = [1, 1, 1]} : vector<8x16x16xbf16> to vector<8x16x4xbf16>
    "tpu.trace_start"() <{level = 10 : i32, message = "nij,njc->nic"}> : () -> ()
    %cst_36 = arith.constant dense<0.000000e+00> : vector<8x16x4xf32>
    %102 = tpu.matmul %100, %101, %cst_36 {dimension_numbers = #tpu.dot_dimension_numbers<[2], [1], [1], [2], [0, 0, 0, 1, 1, 2], [0], [0]>} : vector<8x16x16xbf16>, vector<8x16x4xbf16>, vector<8x16x4xf32> -> vector<8x16x4xf32>
    "tpu.trace_stop"() : () -> ()
    %103 = vector.shape_cast %102 : vector<8x16x4xf32> to vector<128x4xf32>
    %104 = vector.shape_cast %99 : vector<8x16x16xf32> to vector<128x16xf32>
    %105 = arith.truncf %104 : vector<128x16xf32> to vector<128x16xbf16>
    %cst_37 = arith.constant dense<0.000000e+00> : vector<128x64xf32>
    %106 = tpu.matmul %105, %28, %cst_37 {dimension_numbers = #tpu.dot_dimension_numbers<[1], [0], [0], [1], [0, 0, 1, 1], [], []>} : vector<128x16xbf16>, vector<16x64xbf16>, vector<128x64xf32> -> vector<128x64xf32>
    %107 = vector.shape_cast %106 : vector<128x64xf32> to vector<8x16x64xf32>
    %108 = arith.mulf %107, %27 : vector<8x16x64xf32>
    %109 = vector.shape_cast %108 : vector<8x16x64xf32> to vector<128x64xf32>
    %c1_38 = arith.constant 1 : index
    %c0_39 = arith.constant 0 : index
    %c0_40 = arith.constant 0 : index
    %110 = vector.load %arg7[%c1_38, %c0_39, %c0_40] : memref<4x64x4xf32, #tpu.memory_space<vmem>>, vector<1x64x4xf32>
    %111 = vector.shape_cast %110 : vector<1x64x4xf32> to vector<64x4xf32>
    %cst_41 = arith.constant dense<0.000000e+00> : vector<128x4xf32>
    %112 = tpu.matmul %109, %111, %cst_41 {dimension_numbers = #tpu.dot_dimension_numbers<[1], [0], [0], [1], [0, 0, 1, 1], [], []>} : vector<128x64xf32>, vector<64x4xf32>, vector<128x4xf32> -> vector<128x4xf32>
    %113 = arith.addf %103, %112 : vector<128x4xf32>
    %c0_42 = arith.constant 0 : index
    %c4 = arith.constant 4 : index
    %114 = vector.load %arg14[%c0_42, %c4] : memref<128x16xf32, #tpu.memory_space<vmem>>, vector<128x4xf32>
    tpu.vector_store %arg14[%c0_42, %c4], %113 {strides = array<i32>} : memref<128x16xf32, #tpu.memory_space<vmem>>, vector<128x4xf32>,
    %115 = vector.extract_strided_slice %20 {offsets = [0, 0, 32], sizes = [8, 16, 16], strides = [1, 1, 1]} : vector<8x16x128xf32> to vector<8x16x16xf32>
    %116 = vector.extract_strided_slice %20 {offsets = [0, 0, 96], sizes = [8, 16, 16], strides = [1, 1, 1]} : vector<8x16x128xf32> to vector<8x16x16xf32>
    %117 = tpu.transpose %115, [0, 2, 1] : vector<8x16x16xf32> -> vector<8x16x16xf32>
    "tpu.trace_start"() <{level = 10 : i32, message = "nim,nmj->nij"}> : () -> ()
    %cst_43 = arith.constant dense<0.000000e+00> : vector<8x16x16xf32>
    %118 = tpu.matmul %117, %116, %cst_43 {dimension_numbers = #tpu.dot_dimension_numbers<[2], [1], [1], [2], [0, 0, 0, 1, 1, 2], [0], [0]>} : vector<8x16x16xf32>, vector<8x16x16xf32>, vector<8x16x16xf32> -> vector<8x16x16xf32>
    "tpu.trace_stop"() : () -> ()
    %c2 = arith.constant 2 : index
    %119 = memref.load %arg9[%c2] : memref<4xf32, #tpu.memory_space<smem>>
    %120 = vector.broadcast %119 : f32 to vector<8x16x16xf32>
    %121 = arith.mulf %120, %118 : vector<8x16x16xf32>
    %c2_44 = arith.constant 2 : index
    %122 = memref.load %arg10[%c2_44] : memref<4xf32, #tpu.memory_space<smem>>
    %123 = vector.broadcast %122 : f32 to vector<8x16x16xf32>
    %124 = arith.mulf %123, %115 : vector<8x16x16xf32>
    %125 = arith.addf %121, %124 : vector<8x16x16xf32>
    %c2_45 = arith.constant 2 : index
    %126 = memref.load %arg11[%c2_45] : memref<4xf32, #tpu.memory_space<smem>>
    %127 = vector.broadcast %126 : f32 to vector<8x16x16xf32>
    %128 = arith.mulf %127, %116 : vector<8x16x16xf32>
    %129 = arith.addf %125, %128 : vector<8x16x16xf32>
    %c2_46 = arith.constant 2 : index
    %130 = memref.load %arg12[%c2_46] : memref<4xf32, #tpu.memory_space<smem>>
    %131 = vector.broadcast %130 : f32 to vector<8x16x16xf32>
    %132 = arith.addf %129, %131 : vector<8x16x16xf32>
    %cst_47 = arith.constant dense<0xFF800000> : vector<8x16xf32>
    %133 = vector.multi_reduction <maximumf>, %132, %cst_47 [2] : vector<8x16x16xf32> to vector<8x16xf32>
    %134 = vector.shape_cast %133 : vector<8x16xf32> to vector<8x16x1xf32>
    %135 = vector.broadcast %134 : vector<8x16x1xf32> to vector<8x16x16xf32>
    %136 = arith.subf %132, %135 : vector<8x16x16xf32>
    %137 = math.exp %136 : vector<8x16x16xf32>
    %cst_48 = arith.constant dense<0.000000e+00> : vector<8x16xf32>
    %138 = vector.multi_reduction <add>, %137, %cst_48 [2] : vector<8x16x16xf32> to vector<8x16xf32>
    %139 = vector.shape_cast %138 : vector<8x16xf32> to vector<8x16x1xf32>
    %140 = tpu.reciprocal %139 {approx = true} : vector<8x16x1xf32> -> vector<8x16x1xf32>
    %141 = vector.broadcast %140 : vector<8x16x1xf32> to vector<8x16x16xf32>
    %142 = arith.mulf %137, %141 : vector<8x16x16xf32>
    %143 = arith.truncf %142 : vector<8x16x16xf32> to vector<8x16x16xbf16>
    %144 = vector.extract_strided_slice %23 {offsets = [0, 0, 8], sizes = [8, 16, 4], strides = [1, 1, 1]} : vector<8x16x16xbf16> to vector<8x16x4xbf16>
    "tpu.trace_start"() <{level = 10 : i32, message = "nij,njc->nic"}> : () -> ()
    %cst_49 = arith.constant dense<0.000000e+00> : vector<8x16x4xf32>
    %145 = tpu.matmul %143, %144, %cst_49 {dimension_numbers = #tpu.dot_dimension_numbers<[2], [1], [1], [2], [0, 0, 0, 1, 1, 2], [0], [0]>} : vector<8x16x16xbf16>, vector<8x16x4xbf16>, vector<8x16x4xf32> -> vector<8x16x4xf32>
    "tpu.trace_stop"() : () -> ()
    %146 = vector.shape_cast %145 : vector<8x16x4xf32> to vector<128x4xf32>
    %147 = vector.shape_cast %142 : vector<8x16x16xf32> to vector<128x16xf32>
    %148 = arith.truncf %147 : vector<128x16xf32> to vector<128x16xbf16>
    %cst_50 = arith.constant dense<0.000000e+00> : vector<128x64xf32>
    %149 = tpu.matmul %148, %28, %cst_50 {dimension_numbers = #tpu.dot_dimension_numbers<[1], [0], [0], [1], [0, 0, 1, 1], [], []>} : vector<128x16xbf16>, vector<16x64xbf16>, vector<128x64xf32> -> vector<128x64xf32>
    %150 = vector.shape_cast %149 : vector<128x64xf32> to vector<8x16x64xf32>
    %151 = arith.mulf %150, %27 : vector<8x16x64xf32>
    %152 = vector.shape_cast %151 : vector<8x16x64xf32> to vector<128x64xf32>
    %c2_51 = arith.constant 2 : index
    %c0_52 = arith.constant 0 : index
    %c0_53 = arith.constant 0 : index
    %153 = vector.load %arg7[%c2_51, %c0_52, %c0_53] : memref<4x64x4xf32, #tpu.memory_space<vmem>>, vector<1x64x4xf32>
    %154 = vector.shape_cast %153 : vector<1x64x4xf32> to vector<64x4xf32>
    %cst_54 = arith.constant dense<0.000000e+00> : vector<128x4xf32>
    %155 = tpu.matmul %152, %154, %cst_54 {dimension_numbers = #tpu.dot_dimension_numbers<[1], [0], [0], [1], [0, 0, 1, 1], [], []>} : vector<128x64xf32>, vector<64x4xf32>, vector<128x4xf32> -> vector<128x4xf32>
    %156 = arith.addf %146, %155 : vector<128x4xf32>
    %c0_55 = arith.constant 0 : index
    %c8 = arith.constant 8 : index
    %157 = vector.load %arg14[%c0_55, %c8] : memref<128x16xf32, #tpu.memory_space<vmem>>, vector<128x4xf32>
    tpu.vector_store %arg14[%c0_55, %c8], %156 {strides = array<i32>} : memref<128x16xf32, #tpu.memory_space<vmem>>, vector<128x4xf32>,
    %158 = vector.extract_strided_slice %20 {offsets = [0, 0, 48], sizes = [8, 16, 16], strides = [1, 1, 1]} : vector<8x16x128xf32> to vector<8x16x16xf32>
    %159 = vector.extract_strided_slice %20 {offsets = [0, 0, 112], sizes = [8, 16, 16], strides = [1, 1, 1]} : vector<8x16x128xf32> to vector<8x16x16xf32>
    %160 = tpu.transpose %158, [0, 2, 1] : vector<8x16x16xf32> -> vector<8x16x16xf32>
    "tpu.trace_start"() <{level = 10 : i32, message = "nim,nmj->nij"}> : () -> ()
    %cst_56 = arith.constant dense<0.000000e+00> : vector<8x16x16xf32>
    %161 = tpu.matmul %160, %159, %cst_56 {dimension_numbers = #tpu.dot_dimension_numbers<[2], [1], [1], [2], [0, 0, 0, 1, 1, 2], [0], [0]>} : vector<8x16x16xf32>, vector<8x16x16xf32>, vector<8x16x16xf32> -> vector<8x16x16xf32>
    "tpu.trace_stop"() : () -> ()
    %c3 = arith.constant 3 : index
    %162 = memref.load %arg9[%c3] : memref<4xf32, #tpu.memory_space<smem>>
    %163 = vector.broadcast %162 : f32 to vector<8x16x16xf32>
    %164 = arith.mulf %163, %161 : vector<8x16x16xf32>
    %c3_57 = arith.constant 3 : index
    %165 = memref.load %arg10[%c3_57] : memref<4xf32, #tpu.memory_space<smem>>
    %166 = vector.broadcast %165 : f32 to vector<8x16x16xf32>
    %167 = arith.mulf %166, %158 : vector<8x16x16xf32>
    %168 = arith.addf %164, %167 : vector<8x16x16xf32>
    %c3_58 = arith.constant 3 : index
    %169 = memref.load %arg11[%c3_58] : memref<4xf32, #tpu.memory_space<smem>>
    %170 = vector.broadcast %169 : f32 to vector<8x16x16xf32>
    %171 = arith.mulf %170, %159 : vector<8x16x16xf32>
    %172 = arith.addf %168, %171 : vector<8x16x16xf32>
    %c3_59 = arith.constant 3 : index
    %173 = memref.load %arg12[%c3_59] : memref<4xf32, #tpu.memory_space<smem>>
    %174 = vector.broadcast %173 : f32 to vector<8x16x16xf32>
    %175 = arith.addf %172, %174 : vector<8x16x16xf32>
    %cst_60 = arith.constant dense<0xFF800000> : vector<8x16xf32>
    %176 = vector.multi_reduction <maximumf>, %175, %cst_60 [2] : vector<8x16x16xf32> to vector<8x16xf32>
    %177 = vector.shape_cast %176 : vector<8x16xf32> to vector<8x16x1xf32>
    %178 = vector.broadcast %177 : vector<8x16x1xf32> to vector<8x16x16xf32>
    %179 = arith.subf %175, %178 : vector<8x16x16xf32>
    %180 = math.exp %179 : vector<8x16x16xf32>
    %cst_61 = arith.constant dense<0.000000e+00> : vector<8x16xf32>
    %181 = vector.multi_reduction <add>, %180, %cst_61 [2] : vector<8x16x16xf32> to vector<8x16xf32>
    %182 = vector.shape_cast %181 : vector<8x16xf32> to vector<8x16x1xf32>
    %183 = tpu.reciprocal %182 {approx = true} : vector<8x16x1xf32> -> vector<8x16x1xf32>
    %184 = vector.broadcast %183 : vector<8x16x1xf32> to vector<8x16x16xf32>
    %185 = arith.mulf %180, %184 : vector<8x16x16xf32>
    %186 = arith.truncf %185 : vector<8x16x16xf32> to vector<8x16x16xbf16>
    %187 = vector.extract_strided_slice %23 {offsets = [0, 0, 12], sizes = [8, 16, 4], strides = [1, 1, 1]} : vector<8x16x16xbf16> to vector<8x16x4xbf16>
    "tpu.trace_start"() <{level = 10 : i32, message = "nij,njc->nic"}> : () -> ()
    %cst_62 = arith.constant dense<0.000000e+00> : vector<8x16x4xf32>
    %188 = tpu.matmul %186, %187, %cst_62 {dimension_numbers = #tpu.dot_dimension_numbers<[2], [1], [1], [2], [0, 0, 0, 1, 1, 2], [0], [0]>} : vector<8x16x16xbf16>, vector<8x16x4xbf16>, vector<8x16x4xf32> -> vector<8x16x4xf32>
    "tpu.trace_stop"() : () -> ()
    %189 = vector.shape_cast %188 : vector<8x16x4xf32> to vector<128x4xf32>
    %190 = vector.shape_cast %185 : vector<8x16x16xf32> to vector<128x16xf32>
    %191 = arith.truncf %190 : vector<128x16xf32> to vector<128x16xbf16>
    %cst_63 = arith.constant dense<0.000000e+00> : vector<128x64xf32>
    %192 = tpu.matmul %191, %28, %cst_63 {dimension_numbers = #tpu.dot_dimension_numbers<[1], [0], [0], [1], [0, 0, 1, 1], [], []>} : vector<128x16xbf16>, vector<16x64xbf16>, vector<128x64xf32> -> vector<128x64xf32>
    %193 = vector.shape_cast %192 : vector<128x64xf32> to vector<8x16x64xf32>
    %194 = arith.mulf %193, %27 : vector<8x16x64xf32>
    %195 = vector.shape_cast %194 : vector<8x16x64xf32> to vector<128x64xf32>
    %c3_64 = arith.constant 3 : index
    %c0_65 = arith.constant 0 : index
    %c0_66 = arith.constant 0 : index
    %196 = vector.load %arg7[%c3_64, %c0_65, %c0_66] : memref<4x64x4xf32, #tpu.memory_space<vmem>>, vector<1x64x4xf32>
    %197 = vector.shape_cast %196 : vector<1x64x4xf32> to vector<64x4xf32>
    %cst_67 = arith.constant dense<0.000000e+00> : vector<128x4xf32>
    %198 = tpu.matmul %195, %197, %cst_67 {dimension_numbers = #tpu.dot_dimension_numbers<[1], [0], [0], [1], [0, 0, 1, 1], [], []>} : vector<128x64xf32>, vector<64x4xf32>, vector<128x4xf32> -> vector<128x4xf32>
    %199 = arith.addf %189, %198 : vector<128x4xf32>
    %c0_68 = arith.constant 0 : index
    %c12 = arith.constant 12 : index
    %200 = vector.load %arg14[%c0_68, %c12] : memref<128x16xf32, #tpu.memory_space<vmem>>, vector<128x4xf32>
    tpu.vector_store %arg14[%c0_68, %c12], %199 {strides = array<i32>} : memref<128x16xf32, #tpu.memory_space<vmem>>, vector<128x4xf32>,
    %c0_69 = arith.constant 0 : index
    %c0_70 = arith.constant 0 : index
    %201 = vector.load %arg14[%c0_69, %c0_70] : memref<128x16xf32, #tpu.memory_space<vmem>>, vector<128x16xf32>
    %c0_71 = arith.constant 0 : index
    %c0_72 = arith.constant 0 : index
    %202 = vector.load %arg8[%c0_71, %c0_72] : memref<1x16xf32, #tpu.memory_space<vmem>>, vector<1x16xf32>
    %203 = vector.broadcast %202 : vector<1x16xf32> to vector<128x16xf32>
    %204 = arith.addf %201, %203 : vector<128x16xf32>
    %205 = tpu.transpose %204, [1, 0] : vector<128x16xf32> -> vector<16x128xf32>
    %c0_73 = arith.constant 0 : index
    %c0_74 = arith.constant 0 : index
    %206 = vector.load %arg13[%c0_73, %c0_74] : memref<16x128xf32, #tpu.memory_space<vmem>>, vector<16x128xf32>
    tpu.vector_store %arg13[%c0_73, %c0_74], %205 {strides = array<i32>} : memref<16x128xf32, #tpu.memory_space<vmem>>, vector<16x128xf32>,
    return
  }
  func.func @transform_0(%arg0: i32) -> (i32, i32) {
    %c0_i32 = arith.constant 0 : i32
    %c0_i32_0 = arith.constant 0 : i32
    return %arg0, %c0_i32 : i32, i32
  }
  func.func @transform_1(%arg0: i32) -> (i32, i32) {
    %c0_i32 = arith.constant 0 : i32
    %c0_i32_0 = arith.constant 0 : i32
    %c0_i32_1 = arith.constant 0 : i32
    return %c0_i32, %c0_i32_0 : i32, i32
  }
  func.func @transform_2(%arg0: i32) -> (i32, i32) {
    %c0_i32 = arith.constant 0 : i32
    %c0_i32_0 = arith.constant 0 : i32
    %c0_i32_1 = arith.constant 0 : i32
    return %c0_i32, %c0_i32_0 : i32, i32
  }
  func.func @transform_3(%arg0: i32) -> (i32, i32, i32) {
    %c0_i32 = arith.constant 0 : i32
    %c0_i32_0 = arith.constant 0 : i32
    %c0_i32_1 = arith.constant 0 : i32
    %c0_i32_2 = arith.constant 0 : i32
    return %c0_i32, %c0_i32_0, %c0_i32_1 : i32, i32, i32
  }
  func.func @transform_4(%arg0: i32) -> (i32, i32) {
    %c0_i32 = arith.constant 0 : i32
    %c0_i32_0 = arith.constant 0 : i32
    %c0_i32_1 = arith.constant 0 : i32
    return %c0_i32, %c0_i32_0 : i32, i32
  }
  func.func @transform_5(%arg0: i32) -> (i32, i32) {
    %c0_i32 = arith.constant 0 : i32
    %c0_i32_0 = arith.constant 0 : i32
    %c0_i32_1 = arith.constant 0 : i32
    return %c0_i32, %c0_i32_0 : i32, i32
  }
  func.func @transform_6(%arg0: i32) -> (i32, i32, i32) {
    %c0_i32 = arith.constant 0 : i32
    %c0_i32_0 = arith.constant 0 : i32
    %c0_i32_1 = arith.constant 0 : i32
    %c0_i32_2 = arith.constant 0 : i32
    return %c0_i32, %c0_i32_0, %c0_i32_1 : i32, i32, i32
  }
  func.func @transform_7(%arg0: i32) -> (i32, i32) {
    %c0_i32 = arith.constant 0 : i32
    %c0_i32_0 = arith.constant 0 : i32
    %c0_i32_1 = arith.constant 0 : i32
    return %c0_i32, %c0_i32_0 : i32, i32
  }
  func.func @transform_8(%arg0: i32) -> i32 {
    %c0_i32 = arith.constant 0 : i32
    %c0_i32_0 = arith.constant 0 : i32
    return %c0_i32 : i32
  }
  func.func @transform_9(%arg0: i32) -> i32 {
    %c0_i32 = arith.constant 0 : i32
    %c0_i32_0 = arith.constant 0 : i32
    return %c0_i32 : i32
  }
  func.func @transform_10(%arg0: i32) -> i32 {
    %c0_i32 = arith.constant 0 : i32
    %c0_i32_0 = arith.constant 0 : i32
    return %c0_i32 : i32
  }
  func.func @transform_11(%arg0: i32) -> i32 {
    %c0_i32 = arith.constant 0 : i32
    %c0_i32_0 = arith.constant 0 : i32
    return %c0_i32 : i32
  }
  func.func @transform_12(%arg0: i32) -> (i32, i32) {
    %c0_i32 = arith.constant 0 : i32
    %c0_i32_0 = arith.constant 0 : i32
    return %c0_i32, %arg0 : i32, i32
  }
}

</mosaic_0001>

<bundles_post_ra>
// kernel: tpu_custom_call.1
= control target key start
LH: loop header
LB: loop body
LE: loop exit
PB: predicated region body
PF: predicated region fallthrough
CT: control target
= control target key end

     0   :  { %17 = vsyncpa [#allocation5], 0  ;;  %s13740_s0 = inlined_call_operand.vmem [shape: bf16[128,16], index: 0, kind: input, shape index: {}]   ;;  %s13741_s1 = inlined_call_operand.vmem [shape: bf16[16,272], index: 1, kind: input, shape index: {}]   ;;  %s13742_s2 = inlined_call_operand.vmem [shape: f32[1,272], index: 2, kind: input, shape index: {}]   ;;  %s13743_s3 = inlined_call_operand.vmem [shape: f32[2,16,128], index: 3, kind: input, shape index: {}]   ;;  %s13744_s4 = inlined_call_operand.vmem [shape: f32[16,64], index: 4, kind: input, shape index: {}]   ;;  %s13745_s5 = inlined_call_operand.vmem [shape: bf16[16,64], index: 5, kind: input, shape index: {}]   ;;  %s13746_s6 = inlined_call_operand.vmem [shape: f32[4,64,4], index: 6, kind: input, shape index: {}]   ;;  %s13747_s7 = inlined_call_operand.vmem [shape: f32[1,16], index: 7, kind: input, shape index: {}]   ;;  %s13748_s8 = inlined_call_operand.vmem [shape: f32[4], index: 8, kind: input, shape index: {}]   ;;  %s13749_s9 = inlined_call_operand.vmem [shape: f32[4], index: 9, kind: input, shape index: {}]   ;;  %s13750_s10 = inlined_call_operand.vmem [shape: f32[4], index: 10, kind: input, shape index: {}]   ;;  %s13751_s11 = inlined_call_operand.vmem [shape: f32[4], index: 11, kind: input, shape index: {}]   ;;  %s13752_s12 = inlined_call_operand.hbm [shape: f32[16,128], index: 12, kind: output, shape index: {}]  }
   0x1   :  { %18 = vsyncpa [#allocation7], 0 }
   0x2   :  { %19 = vsyncpa [#allocation10], 0  ;;  %s53_s23 = sshll.u32 %s13749_s9, 4  ;;  %s54_s23 = int_to_ptr.vmem [resolvable:$true] %s53_s23 }
   0x3   :  { %20 = vsyncpa [#allocation4], 0  ;;  %s43_s26 = sshll.u32 %s13748_s8, 4  ;;  %s10780_s27 = scalar_lea.vmem %s54_s23, 16  ;;  %s44_s26 = int_to_ptr.vmem [resolvable:$true] %s43_s26 }
   0x4   :  { %p10781_p0 = scmp.ne.s32.totalorder %s54_s23, %s10780_s27  ;;  %p10785_p1 = scmp.lt.s32.totalorder %s54_s23, %s54_s23 }
   0x5   :  { %p10786_p2 = scmp.lt.s32.totalorder %s10780_s27, %s10780_s27 }
   0x7   :  { %p10787_p3 = por %p10786_p2, %p10785_p1 }
   0x9   :  { %p10788_p4 = pnand %p10787_p3, %p10781_p0 }
   0xb   :  { %10791 = shalt.err (!%p10788_p4)
}
   0xc   :  { %s10856_s28 = smov [#allocation6]   ;;  %s10792_s29 = scalar_lea.vmem %s44_s26, 16 }
   0xd   :  { %56 = dma.vmem_to_smem %s54_s23, 16, %s10856_s28, [#allocation7]  }
   0xe   :  { %p10793_p5 = scmp.ne.s32.totalorder %s44_s26, %s10792_s29  ;;  %p10797_p6 = scmp.lt.s32.totalorder %s44_s26, %s44_s26 }
   0xf   :  { %p10798_p7 = scmp.lt.s32.totalorder %s10792_s29, %s10792_s29 }
  0x11   :  { %p10799_p8 = por %p10798_p7, %p10797_p6 }
  0x13   :  { %p10800_p9 = pnand %p10799_p8, %p10793_p5 }
  0x15   :  { %10803 = shalt.err (!%p10800_p9)
}
  0x16   :  { %s10857_s9 = smov [#allocation3]   ;;  %s63_s13 = sshll.u32 %s13750_s10, 4  ;;  %s64_s13 = int_to_ptr.vmem [resolvable:$true] %s63_s13 }
  0x17   :  { %46 = dma.vmem_to_smem %s44_s26, 16, %s10857_s9, [#allocation5]  }
  0x18   :  { %s73_s16 = sshll.u32 %s13751_s11, 4  ;;  %s10804_s17 = scalar_lea.vmem %s64_s13, 16  ;;  %s74_s16 = int_to_ptr.vmem [resolvable:$true] %s73_s16 }
  0x19   :  { %p10805_p10 = scmp.ne.s32.totalorder %s64_s13, %s10804_s17  ;;  %p10809_p11 = scmp.lt.s32.totalorder %s64_s13, %s64_s13 }
  0x1a   :  { %p10810_p12 = scmp.lt.s32.totalorder %s10804_s17, %s10804_s17 }
  0x1c   :  { %p10811_p13 = por %p10810_p12, %p10809_p11 }
  0x1e   :  { %p10812_p0 = pnand %p10811_p13, %p10805_p10 }
  0x20   :  { %10815 = shalt.err (!%p10812_p0)
}
  0x21   :  { %s10858_s18 = smov [#allocation8]   ;;  %s10816_s19 = scalar_lea.vmem %s74_s16, 16 }
  0x22   :  { %66 = dma.vmem_to_smem %s64_s13, 16, %s10858_s18, [#allocation7]  }
  0x23   :  { %p10817_p1 = scmp.ne.s32.totalorder %s74_s16, %s10816_s19  ;;  %p10821_p2 = scmp.lt.s32.totalorder %s74_s16, %s74_s16 }
  0x24   :  { %p10822_p3 = scmp.lt.s32.totalorder %s10816_s19, %s10816_s19 }
  0x26   :  { %p10823_p4 = por %p10822_p3, %p10821_p2 }
  0x28   :  { %p10824_p5 = pnand %p10823_p4, %p10817_p1 }
  0x2a   :  { %10827 = shalt.err (!%p10824_p5)
}
  0x2b   :  { %s10859_s10 = smov [#allocation9]  }
  0x2c   :  { %76 = dma.vmem_to_smem %s74_s16, 16, %s10859_s10, [#allocation10]  }
  0x2d   :  { %10848 = dma.done.wait [#allocation5], 16  }
  0x2e   :  { %10849 = vsyncadd [#allocation5], 4294967280 }
  0x2f   :  { %10850 = dma.done.wait [#allocation7], 32  }
  0x30   :  { %10851 = vsyncadd [#allocation7], 4294967264 }
  0x31   :  { %10852 = dma.done.wait [#allocation10], 16  }
  0x32   :  { %10853 = vsyncadd [#allocation10], 4294967280 }
  0x33   :  { %89 = sfence }
  0x34   :  { %v10502_v0 = vld [vmem:[%s13741_s1 + $0x4] ss:$12 sps:$4 sm:$0xff]   ;;  %v10504_v1 = vld [vmem:[%s13741_s1] ss:$12 sps:$4 sm:$0xff]   ;;  %v10860_v2 = vmov 0   ;;  %vm184_vm0 = vcmask 130048   ;;  %v113_v11 = vlaneseq }
  0x35   :  { %241 = vmatprep.mubr.bf16.mxu0 %v10860_v2  ;;  %223 = vmatprep.subr.bf16.mxu0 %v10502_v0  ;;  %v10505_v3 = vld [vmem:[%s13740_s0] sm:$0xff]   ;;  %v10506_v4 = vld [vmem:[%s13740_s0 + $0x8] sm:$0xff]   ;;  %v10507_v5 = vld [vmem:[%s13740_s0 + $0x10] sm:$0xff]   ;;  %s1470_s27 = sld [smem:[#allocation6]]  ;;  %vm10863_vm1 = vmmov 0   ;;  %s10864_s9 = smov 112  }
  0x36   :  { %224 = vmatpush1.bf16.msra.mxu0 %v10504_v1  ;;  %9816 = vmatprep.mubr.msk.bf16.mxu1 %vm184_vm0, %v10505_v3  ;;  %v10508_v6 = vld [vmem:[%s13740_s0 + $0x18] sm:$0xff]   ;;  %v10509_v7 = vld [vmem:[%s13740_s0 + $0x20] sm:$0xff]   ;;  %v10510_v8 = vld [vmem:[%s13740_s0 + $0x28] sm:$0xff]   ;;  %v10994_v12 = vshrl.u32 %v113_v11, 7  ;;  %s1452_s28 = sld [smem:[#allocation3]]  ;;  %vm2283_vm2 = vcmask 523264  }
  0x37   :  { %v10511_v9 = vld [vmem:[%s13740_s0 + $0x30] sm:$0xff]   ;;  %v10512_v10 = vld [vmem:[%s13740_s0 + $0x38] sm:$0xff]   ;;  %v11000_v14 = vld [vmem:[%s13742_s2] sm:$0x7]  ;;  %s1602_s29 = sld [smem:[#allocation9]]  ;;  %s10865_s0 = smov 48  }
  0x38   :  { %v115_v13 = vsub.s32 0, %v10994_v12  ;;  %v119_v15 = vsub.s32 1, %v10994_v12  ;;  %v11013_v20 = vld [vmem:[%s13743_s3] sm:$0xff]  ;;  %v11018_v22 = vld [vmem:[%s13743_s3 + $0x10] sm:$0xff]  ;;  %v11030_v29 = vld [vmem:[%s13743_s3 + $0x8] sm:$0xff]  ;;  %vm2493_vm3 = vcmask 31744  }
  0x39   :  { %9233 = vmatmul.mubr.msk.bf16.vlgmr.msra.gmra.mxu0 %vm184_vm0, %v10505_v3  ;;  %v10513_v24 = vld [vmem:[%s13741_s1 + $0x8] ss:$12 sps:$4 sm:$0xff]   ;;  %v11035_v31 = vld [vmem:[%s13743_s3 + $0x18] sm:$0xff]  ;;  %s10861_s1 = smov 64   ;;  %s1504_s3 = sld [smem:[#allocation8]]  ;;  %vm4705_vm4 = vcmask 64544  }
  0x3a   :  { %251 = vmatprep.mubr.bf16.mxu0 %v10860_v2  ;;  %v11004_v16 = vrot.slane %v11000_v14, %v115_v13  ;;  %v11007_v17 = vrot.slane %v11000_v14, %v119_v15  ;;  %9814 = vmatprep.subr.bf16.mxu1 %v10513_v24  ;;  %s9319_s8 = sld [smem:[#allocation9 + $0x1]]  ;;  %s10866_s30 = smov 124   ;;  %vm6909_vm5 = vcmask 97344   ;;  %vm9113_vm6 = vcmask 130144  }
  0x3b   :  { %9815 = vmatpush3.bf16.msra.mxu1 %v10513_v24  ;;  %s10867_s13 = smov 96   ;;  %s10868_s16 = smov 32  }
  0x3c   :  { %s9379_s14 = sld [smem:[#allocation9 + $0x2]]  ;;  %s10869_s15 = smov 120  }
  0x3d   :  { %s10871_s19 = smov 16   ;;  %s9439_s17 = sld [smem:[#allocation9 + $0x3]] }
  0x3e   :  { %9817 = vmatmul.mubr.msk.bf16.vlgmr.msra.gmra.mxu1 %vm184_vm0, %v10506_v4  ;;  %s10872_s18 = smov 116   ;;  %s10874_s10 = smov 8  }
  0x3f   :  { %9820 = vmatprep.mubr.msk.bf16.mxu1 %vm184_vm0, %v10507_v5 }
  0x41   :  { %9234 = vmatmul.mubr.msk.bf16.gmra.mxu0 %vm184_vm0, %v10506_v4 }
  0x42   :  { %261 = vmatprep.mubr.bf16.mxu0 %v10860_v2 }
  0x46   :  { %9821 = vmatmul.mubr.msk.bf16.gmra.mxu1 %vm184_vm0, %v10508_v6 }
  0x47   :  { %9824 = vmatprep.mubr.msk.bf16.mxu1 %vm184_vm0, %v10509_v7 }
  0x49   :  { %9235 = vmatmul.mubr.msk.bf16.gmra.mxu0 %vm184_vm0, %v10507_v5 }
  0x4a   :  { %271 = vmatprep.mubr.bf16.mxu0 %v10860_v2 }
  0x4e   :  { %9825 = vmatmul.mubr.msk.bf16.gmra.mxu1 %vm184_vm0, %v10510_v8 }
  0x4f   :  { %9828 = vmatprep.mubr.msk.bf16.mxu1 %vm184_vm0, %v10511_v9 }
  0x51   :  { %9236 = vmatmul.mubr.msk.bf16.gmra.mxu0 %vm184_vm0, %v10508_v6 }
  0x52   :  { %281 = vmatprep.mubr.bf16.mxu0 %v10860_v2 }
  0x56   :  { %9829 = vmatmul.mubr.msk.bf16.gmra.mxu1 %vm184_vm0, %v10512_v10 }
  0x59   :  { %9237 = vmatmul.mubr.msk.bf16.gmra.mxu0 %vm184_vm0, %v10509_v7 }
  0x5a   :  { %291 = vmatprep.mubr.bf16.mxu0 %v10860_v2 }
  0x61   :  { %9238 = vmatmul.mubr.msk.bf16.gmra.mxu0 %vm184_vm0, %v10510_v8 }
  0x62   :  { %301 = vmatprep.mubr.bf16.mxu0 %v10860_v2 }
  0x69   :  { %9239 = vmatmul.mubr.msk.bf16.gmra.mxu0 %vm184_vm0, %v10511_v9 }
  0x6a   :  { %311 = vmatprep.mubr.bf16.mxu0 %v10860_v2 }
  0x71   :  { %9240 = vmatmul.mubr.msk.bf16.gmra.mxu0 %vm184_vm0, %v10512_v10 }
  0xf9   :  { %v243_v18 = vpop.f32.mrf.mxu0 }
  0xfa   :  { %v244_v19 = vadd.f32 %v243_v18, %v11004_v16 }
  0xfb   :  { %v245_v21 = vpop.f32.mrf.mxu0 }
  0xfc   :  { %v246_v23 = vadd.f32 %v245_v21, %v11007_v17  ;;  %v421_v26 = vmul.f32 %v11013_v20, %v244_v19 }
  0xfd   :  { %v247_v25 = vpop.f32.mrf.mxu0 }
  0xfe   :  { %v440_v27 = vmul.f32 %v11018_v22, %v246_v23  ;;  %v248_v28 = vadd.f32 %v247_v25, %v11004_v16 }
  0xff   :  { %v249_v30 = vpop.f32.mrf.mxu0 }
 0x100   :  { %v11037_v32 = vadd.f32 %v440_v27, %v421_v26  ;;  %v250_v33 = vadd.f32 %v249_v30, %v11007_v17  ;;  %v422_v35 = vmul.f32 %v11030_v29, %v248_v28 }
 0x101   :  { %v253_v34 = vpop.f32.mrf.mxu0 }
 0x102   :  { %v441_v36 = vmul.f32 %v11035_v31, %v250_v33  ;;  %v254_v37 = vadd.f32 %v253_v34, %v11004_v16  ;;  %742 = vrot.lane.b32.xlu0 %v11037_v32, %s10861_s1 }
 0x103   :  { %v255_v38 = vpop.f32.mrf.mxu0 }
 0x104   :  { %v11047_v39 = vadd.f32 %v441_v36, %v422_v35  ;;  %v423_v40 = vmul.f32 %v11013_v20, %v254_v37  ;;  %v256_v41 = vadd.f32 %v255_v38, %v11007_v17 }
 0x105   :  { %v257_v42 = vpop.f32.mrf.mxu0 }
 0x106   :  { %v442_v43 = vmul.f32 %v11018_v22, %v256_v41  ;;  %v258_v44 = vadd.f32 %v257_v42, %v11004_v16  ;;  %744 = vrot.lane.b32.xlu0 %v11047_v39, %s10861_s1 }
 0x107   :  { %v259_v45 = vpop.f32.mrf.mxu0 }
 0x108   :  { %v11055_v46 = vadd.f32 %v442_v43, %v423_v40  ;;  %v424_v47 = vmul.f32 %v11030_v29, %v258_v44  ;;  %v260_v48 = vadd.f32 %v259_v45, %v11007_v17 }
 0x109   :  { %v263_v51 = vpop.f32.mrf.mxu0 }
 0x10a   :  { %v443_v49 = vmul.f32 %v11035_v31, %v260_v48  ;;  %831 = vrot.lane.b32.xlu1 %v11055_v46, %s10861_s1  ;;  %v264_v0 = vadd.f32 %v263_v51, %v11004_v16 }
 0x10b   :  { %v265_v52 = vpop.f32.mrf.mxu0 }
 0x10c   :  { %v11064_v50 = vadd.f32 %v443_v49, %v424_v47  ;;  %v266_v1 = vadd.f32 %v265_v52, %v11007_v17  ;;  %v425_v6 = vmul.f32 %v11013_v20, %v264_v0 }
 0x10d   :  { %v267_v53 = vpop.f32.mrf.mxu0 }
 0x10e   :  { %833 = vrot.lane.b32.xlu1 %v11064_v50, %s10861_s1  ;;  %v268_v58 = vadd.f32 %v267_v53, %v11004_v16  ;;  %v444_v7 = vmul.f32 %v11018_v22, %v266_v1 }
 0x10f   :  { %v269_v54 = vpop.f32.mrf.mxu0 }
 0x110   :  { %v270_v59 = vadd.f32 %v269_v54, %v11007_v17  ;;  %v426_v61 = vmul.f32 %v11030_v29, %v268_v58  ;;  %v11093_v13 = vadd.f32 %v444_v7, %v425_v6 }
 0x111   :  { %v273_v55 = vpop.f32.mrf.mxu0 }
 0x112   :  { %v445_v62 = vmul.f32 %v11035_v31, %v270_v59  ;;  %v274_v3 = vadd.f32 %v273_v55, %v11004_v16 }
 0x113   :  { %v275_v56 = vpop.f32.mrf.mxu0 }
 0x114   :  { %v11081_v2 = vadd.f32 %v445_v62, %v426_v61  ;;  %v276_v4 = vadd.f32 %v275_v56, %v11007_v17  ;;  %v427_v8 = vmul.f32 %v11013_v20, %v274_v3 }
 0x115   :  { %v277_v57 = vpop.f32.mrf.mxu0 }
 0x116   :  { %v446_v9 = vmul.f32 %v11018_v22, %v276_v4  ;;  %v278_v40 = vadd.f32 %v277_v57, %v11004_v16 }
 0x117   :  { %v279_v60 = vpop.f32.mrf.mxu0 }
 0x118   :  { %v11095_v15 = vadd.f32 %v446_v9, %v427_v8  ;;  %v280_v41 = vadd.f32 %v279_v60, %v11007_v17  ;;  %v428_v43 = vmul.f32 %v11030_v29, %v278_v40  ;;  %v11149_v8 = vpop.f32.mrf.mxu1 }
 0x119   :  { %v283_v63 = vpop.f32.mrf.mxu0 }
 0x11a   :  { %v284_v10 = vadd.f32 %v283_v63, %v11004_v16  ;;  %v447_v44 = vmul.f32 %v11035_v31, %v280_v41 }
 0x11b   :  { %v285_v5 = vpop.f32.mrf.mxu0 }
 0x11c   :  { %v286_v11 = vadd.f32 %v285_v5, %v11007_v17  ;;  %v429_v18 = vmul.f32 %v11013_v20, %v284_v10  ;;  %v11121_v47 = vadd.f32 %v447_v44, %v428_v43 }
 0x11d   :  { %v287_v26 = vpop.f32.mrf.mxu0 }
 0x11e   :  { %v448_v19 = vmul.f32 %v11018_v22, %v286_v11  ;;  %v288_v30 = vadd.f32 %v287_v26, %v11004_v16  ;;  %13763 = vst [vmem:[#allocation16_spill] sm:$0xff] %v11121_v47  ;;  %v11154_v11 = vpop.f32.mrf.mxu1 }
 0x11f   :  { %v289_v28 = vpop.f32.mrf.mxu0 }
 0x120   :  { %v11101_v21 = vadd.f32 %v448_v19, %v429_v18  ;;  %v290_v33 = vadd.f32 %v289_v28, %v11007_v17  ;;  %v430_v34 = vmul.f32 %v11030_v29, %v288_v30  ;;  %v123_v18 = vsub.s32 2, %v10994_v12 }
 0x121   :  { %v293_v37 = vpop.f32.mrf.mxu0 }
 0x122   :  { %v449_v35 = vmul.f32 %v11035_v31, %v290_v33  ;;  %v294_v49 = vadd.f32 %v293_v37, %v11004_v16 }
 0x123   :  { %v295_v38 = vpop.f32.mrf.mxu0 }
 0x124   :  { %484 = vxpose.xlu0.b32.start [1/2] (short) (narrow) %v11037_v32, 16  ;;  %v11114_v36 = vadd.f32 %v449_v35, %v430_v34  ;;  %v296_v52 = vadd.f32 %v295_v38, %v11007_v17  ;;  %v431_v54 = vmul.f32 %v11013_v20, %v294_v49 }
 0x125   :  { %v297_v42 = vpop.f32.mrf.mxu0 }
 0x126   :  { %v450_v55 = vmul.f32 %v11018_v22, %v296_v52  ;;  %v298_v28 = vadd.f32 %v297_v42, %v11004_v16 }
 0x127   :  { %v299_v45 = vpop.f32.mrf.mxu0 }
 0x128   :  { %485 = vxpose.xlu0.b32.end [2/2] (short) (narrow) %v11047_v39, 16  ;;  %v11133_v59 = vadd.f32 %v450_v55, %v431_v54  ;;  %v300_v30 = vadd.f32 %v299_v45, %v11007_v17  ;;  %v432_v35 = vmul.f32 %v11030_v29, %v298_v28 }
 0x129   :  { %v303_v48 = vpop.f32.mrf.mxu0 }
 0x12a   :  { %v304_v57 = vadd.f32 %v303_v48, %v11004_v16  ;;  %v451_v37 = vmul.f32 %v11035_v31, %v300_v30 }
 0x12b   :  { %v305_v53 = vpop.f32.mrf.mxu0 }
 0x12c   :  { %v306_v58 = vadd.f32 %v305_v53, %v11007_v17  ;;  %v433_v60 = vmul.f32 %v11013_v20, %v304_v57  ;;  %v11179_v43 = vadd.f32 %v451_v37, %v432_v35 }
 0x12d   :  { %v307_v4 = vpop.f32.mrf.mxu0 }
 0x12e   :  { %v452_v61 = vmul.f32 %v11018_v22, %v306_v58  ;;  %v308_v6 = vadd.f32 %v307_v4, %v11004_v16 }
 0x12f   :  { %v309_v5 = vpop.f32.mrf.mxu0 }
 0x130   :  { %v11137_v62 = vadd.f32 %v452_v61, %v433_v60  ;;  %v310_v7 = vadd.f32 %v309_v5, %v11007_v17  ;;  %v434_v9 = vmul.f32 %v11030_v29, %v308_v6 }
 0x131   :  { %v313_v41 = vpop.f32.mrf.mxu0 }
 0x132   :  { %v453_v10 = vmul.f32 %v11035_v31, %v310_v7 }
 0x133   :  { %v315_v52 = vpop.f32.mrf.mxu0 }
 0x134   :  { %v11157_v19 = vadd.f32 %v453_v10, %v434_v9  ;;  %v316_v57 = vadd.f32 %v315_v52, %v11007_v17 }
 0x137   :  { %516 = vxpose.xlu1.b32.start [1/2] (short) (narrow) %v11055_v46, 16 }
 0x13b   :  { %517 = vxpose.xlu1.b32.end [2/2] (short) (narrow) %v11064_v50, 16 }
 0x151   :  { %922 = vrot.lane.b32.xlu0 %v11081_v2, %s10861_s1 }
 0x159   :  { %920 = vrot.lane.b32.xlu1 %v11093_v13, %s10861_s1 }
 0x15d   :  { %1009 = vrot.lane.b32.xlu1 %v11095_v15, %s10861_s1 }
 0x161   :  { %1098 = vrot.lane.b32.xlu1 %v11101_v21, %s10861_s1 }
 0x16f   :  { %548 = vxpose.xlu0.b32.start [1/2] (short) (narrow) %v11093_v13, 16 }
 0x173   :  { %549 = vxpose.xlu0.b32.end [2/2] (short) (narrow) %v11081_v2, 16 }
 0x174   :  { %v743_v23 = vpop.permute.xlu0 %742 }
 0x178   :  { %v745_v24 = vpop.permute.xlu0 %744 }
 0x179   :  { %9832 = vmatprep.subr.mxu0 %v745_v24 }
 0x17a   :  { %9833 = vmatpush3.msra.mxu0 %v745_v24 }
 0x17b   :  { %9834 = vmatprep.subr.mxu0 %v743_v23 }
 0x17c   :  { %9835 = vmatpush3.msra.mxu0 %v743_v23  ;;  %v832_v25 = vpop.permute.xlu1 %831  ;;  %v11159_v23 = vpop.f32.mrf.mxu1 }
 0x17e   :  { %v11162_v24 = vpop.f32.mrf.mxu1 }
 0x180   :  { %v834_v27 = vpop.permute.xlu1 %833  ;;  %v9822_v26 = vpop.f32.mrf.mxu1 }
 0x181   :  { %9839 = vmatprep.subr.mxu1 %v834_v27 }
 0x182   :  { %9840 = vmatpush3.msra.mxu1 %v834_v27  ;;  %v372_v33 = vpop.f32.mrf.mxu1 }
 0x183   :  { %9841 = vmatprep.subr.mxu1 %v832_v25 }
 0x184   :  { %9842 = vmatpush3.msra.mxu1 %v832_v25  ;;  %v11165_v25 = vrot.slane %v11000_v14, %v123_v18  ;;  %v9823_v12 = vpop.f32.mrf.mxu1 }
 0x186   :  { %v381_v27 = vadd.f32 %v9822_v26, %v11165_v25  ;;  %v384_v34 = vadd.f32 %v9823_v12, %v11165_v25  ;;  %v373_v38 = vadd.f32 %v372_v33, %v11165_v25  ;;  %v375_v14 = vpop.f32.mrf.mxu1 }
 0x187   :  { %v376_v42 = vadd.f32 %v375_v14, %v11165_v25 }
 0x188   :  { %v11174_v40 = vpack.c.bf16 %v384_v34, %v381_v27  ;;  %v9826_v44 = vpop.f32.mrf.mxu1  ;;  %v1505_v34 = vstv %s1504_s3 }
 0x189   :  { %v11181_v45 = vpack.c.bf16 %v376_v42, %v373_v38  ;;  %v397_v48 = vadd.f32 %v9826_v44, %v11165_v25  ;;  %v1512_v35 = vmul.f32 %v1505_v34, %v11095_v15  ;;  %v1510_v37 = vmul.f32 %v1505_v34, %v11093_v13 }
 0x18a   :  { %612 = vxpose.xlu1.b32.start [1/2] (short) (narrow) %v11101_v21, 16  ;;  %v1511_v38 = vmul.f32 %v1505_v34, %v11081_v2  ;;  %v1514_v14 = vmul.f32 %v1505_v34, %v11101_v21  ;;  %v1518_v42 = vmul.f32 %v1505_v34, %v11137_v62  ;;  %v1519_v44 = vmul.f32 %v1505_v34, %v11157_v19 }
 0x18e   :  { %613 = vxpose.xlu1.b32.end [2/2] (short) (narrow) %v11114_v36, 16 }
 0x19c   :  { %1011 = vrot.lane.b32.xlu0 %v11121_v47, %s10861_s1 }
 0x1a0   :  { %v500_v51 = vpop.trf.xlu0 }
 0x1a1   :  { %9836 = vmatprep.mubr.msk.f32.mxu0 %vm184_vm0, %v500_v51  ;;  %v11186_v51 = vpop.f32.mrf.mxu1 }
 0x1a3   :  { %v9827_v53 = vpop.f32.mrf.mxu1 }
 0x1a4   :  { %v501_v56 = vpop.trf.xlu0  ;;  %v400_v54 = vadd.f32 %v9827_v53, %v11165_v25  ;;  %v1508_v53 = vmul.f32 %v1505_v34, %v11055_v46 }
 0x1a5   :  { %9837 = vmatmul.mubr.msk.f32.vlgmr.msra.gmra.mxu0 %vm184_vm0, %v501_v56  ;;  %v314_v56 = vadd.f32 %v313_v41, %v11004_v16  ;;  %v11194_v58 = vpop.f32.mrf.mxu1  ;;  %v1515_v41 = vmul.f32 %v1505_v34, %v11114_v36 }
 0x1a6   :  { %v11197_v60 = vpack.c.bf16 %v400_v54, %v397_v48 }
 0x1a7   :  { %v9830_v61 = vpop.f32.mrf.mxu1 }
 0x1ac   :  { %1187 = vrot.lane.b32.xlu1 %v11133_v59, %s10861_s1 }
 0x1b0   :  { %1276 = vrot.lane.b32.xlu1 %v11137_v62, %s10861_s1 }
 0x1b3   :  { %v532_v63 = vpop.trf.xlu1 }
 0x1b4   :  { %9843 = vmatprep.mubr.msk.f32.mxu1 %vm184_vm0, %v532_v63  ;;  %v413_v63 = vadd.f32 %v9830_v61, %v11165_v25  ;;  %v1516_v61 = vmul.f32 %v1505_v34, %v11133_v59 }
 0x1b7   :  { %v533_v0 = vpop.trf.xlu1 }
 0x1b8   :  { %9844 = vmatmul.mubr.msk.f32.vlgmr.msra.gmra.mxu1 %vm184_vm0, %v533_v0  ;;  %v435_v0 = vmul.f32 %v11013_v20, %v314_v56  ;;  %v317_v20 = vpop.f32.mrf.mxu0  ;;  %v1509_v56 = vmul.f32 %v1505_v34, %v11064_v50 }
 0x1b9   :  { %v318_v18 = vadd.f32 %v317_v20, %v11004_v16 }
 0x1ba   :  { %580 = vxpose.xlu0.b32.start [1/2] (short) (narrow) %v11095_v15, 16 }
 0x1bb   :  { %v436_v27 = vmul.f32 %v11030_v29, %v318_v18  ;;  %v1506_v29 = vmul.f32 %v1505_v34, %v11037_v32 }
 0x1be   :  { %581 = vxpose.xlu0.b32.end [2/2] (short) (narrow) %v11121_v47, 16 }
 0x1c3   :  { %v923_v1 = vpop.permute.xlu0 %922 }
 0x1c4   :  { %9846 = vmatprep.subr.mxu1 %v923_v1 }
 0x1c5   :  { %9847 = vmatpush3.msra.mxu1 %v923_v1  ;;  %v454_v1 = vmul.f32 %v11018_v22, %v316_v57  ;;  %v319_v22 = vpop.f32.mrf.mxu0  ;;  %v1513_v57 = vmul.f32 %v1505_v34, %v11121_v47 }
 0x1c6   :  { %v320_v26 = vadd.f32 %v319_v22, %v11007_v17 }
 0x1c7   :  { %v11205_v6 = vadd.f32 %v454_v1, %v435_v0 }
 0x1c8   :  { %v455_v28 = vmul.f32 %v11035_v31, %v320_v26  ;;  %v1507_v31 = vmul.f32 %v1505_v34, %v11047_v39 }
 0x1c9   :  { %v1520_v0 = vmul.f32 %v1505_v34, %v11205_v6 }
 0x1ca   :  { %v11218_v30 = vadd.f32 %v455_v28, %v436_v27  ;;  %v357_v28 = vadd.f32 %v11154_v11, %v11165_v25 }
 0x1cb   :  { %v921_v3 = vpop.permute.xlu1 %920 }
 0x1cc   :  { %9848 = vmatprep.subr.mxu1 %v921_v3  ;;  %13764 = vst [vmem:[#allocation17_spill] sm:$0xff] %v11218_v30  ;;  %v1521_v1 = vmul.f32 %v1505_v34, %v11218_v30 }
 0x1cd   :  { %9849 = vmatpush3.msra.mxu1 %v921_v3  ;;  %v11202_v3 = vpop.f32.mrf.mxu1 }
 0x1cf   :  { %v9831_v4 = vpop.f32.mrf.mxu1  ;;  %v1010_v10 = vpop.permute.xlu1 %1009 }
 0x1d0   :  { %v416_v5 = vadd.f32 %v9831_v4, %v11165_v25 }
 0x1d1   :  { %v11264_v27 = vpop.f32.mrf.mxu1 }
 0x1d2   :  { %v11207_v7 = vpack.c.bf16 %v416_v5, %v413_v63  ;;  %v1517_v63 = vmul.f32 %v1505_v34, %v11179_v43  ;;  %v365_v34 = vadd.f32 %v11149_v8, %v11165_v25 }
 0x1d3   :  { %v1099_v12 = vpop.permute.xlu1 %1098 }
 0x1d9   :  { %676 = vxpose.xlu1.b32.start [1/2] (short) (narrow) %v11137_v62, 16 }
 0x1dd   :  { %677 = vxpose.xlu1.b32.end [2/2] (short) (narrow) %v11157_v19, 16 }
 0x1e7   :  { %1100 = vrot.lane.b32.xlu0 %v11114_v36, %s10861_s1 }
 0x1eb   :  { %1189 = vrot.lane.b32.xlu0 %v11179_v43, %s10861_s1  ;;  %v564_v49 = vpop.trf.xlu0 }
 0x1ec   :  { %9850 = vmatprep.mubr.msk.f32.mxu1 %vm184_vm0, %v564_v49 }
 0x1ef   :  { %1278 = vrot.lane.b32.xlu0 %v11157_v19, %s10861_s1  ;;  %v565_v55 = vpop.trf.xlu0 }
 0x1f0   :  { %9851 = vmatmul.mubr.msk.f32.vlgmr.msra.gmra.mxu1 %vm184_vm0, %v565_v55 }
 0x1fb   :  { %1365 = vrot.lane.b32.xlu1 %v11205_v6, %s10861_s1 }
 0x206   :  { %v628_v17 = vpop.trf.xlu1 }
 0x20a   :  { %v629_v48 = vpop.trf.xlu1 }
 0x20d   :  { %644 = vxpose.xlu0.b32.start [1/2] (short) (narrow) %v11133_v59, 16 }
 0x20e   :  { %v1012_v9 = vpop.permute.xlu0 %1011 }
 0x20f   :  { %9853 = vmatprep.subr.mxu1 %v1012_v9 }
 0x210   :  { %9854 = vmatpush3.msra.mxu1 %v1012_v9 }
 0x211   :  { %645 = vxpose.xlu0.b32.end [2/2] (short) (narrow) %v11179_v43, 16  ;;  %9855 = vmatprep.subr.mxu1 %v1010_v10 }
 0x212   :  { %9856 = vmatpush3.msra.mxu1 %v1010_v10 }
 0x21e   :  { %v1188_v54 = vpop.permute.xlu1 %1187 }
 0x222   :  { %v1277_v4 = vpop.permute.xlu1 %1276 }
 0x224   :  { %708 = vxpose.xlu1.b32.start [1/2] (short) (narrow) %v11205_v6, 16 }
 0x228   :  { %709 = vxpose.xlu1.b32.end [2/2] (short) (narrow) %v11218_v30, 16 }
 0x236   :  { %v596_v33 = vpop.trf.xlu0 }
 0x237   :  { %9857 = vmatprep.mubr.msk.f32.mxu1 %vm184_vm0, %v596_v33  ;;  %v360_v33 = vadd.f32 %v11162_v24, %v11165_v25 }
 0x239   :  { %v11281_v11 = vpack.c.bf16 %v360_v33, %v357_v28 }
 0x23a   :  { %1367 = vrot.lane.b32.xlu0 %v11218_v30, %s10861_s1  ;;  %v597_v16 = vpop.trf.xlu0 }
 0x23b   :  { %9858 = vmatmul.mubr.msk.f32.vlgmr.msra.gmra.mxu1 %vm184_vm0, %v597_v16  ;;  %v368_v16 = vadd.f32 %v11159_v23, %v11165_v25  ;;  %13765 = vst [vmem:[#allocation18_spill] sm:$0xff] %v11281_v11 }
 0x23c   :  { %9864 = vmatprep.mubr.msk.f32.mxu1 %vm184_vm0, %v628_v17  ;;  %v11274_v17 = vstv %s1452_s28  ;;  %s9317_s28 = sld [smem:[#allocation6 + $0x1]] }
 0x23e   :  { %1538 = vrot.lane.b32.xlu0 %v1506_v29, %s10861_s1  ;;  %v11276_v29 = vstv %s1470_s27 }
 0x23f   :  { %v1472_v24 = vmul.f32 %v11276_v29, %v11037_v32 }
 0x242   :  { %1540 = vrot.lane.b32.xlu0 %v1507_v31, %s10861_s1 }
 0x246   :  { %1550 = vrot.lane.b32.xlu1 %v1512_v35, %s10861_s1  ;;  %1546 = vrot.lane.b32.xlu0 %v1510_v37, %s10861_s1 }
 0x24a   :  { %1548 = vrot.lane.b32.xlu0 %v1511_v38, %s10861_s1  ;;  %v11285_v38 = vpack.c.bf16 %v368_v16, %v365_v34 }
 0x24c   :  { %13766 = vst [vmem:[#allocation19_spill] sm:$0xff] %v11285_v38 }
 0x24e   :  { %1554 = vrot.lane.b32.xlu0 %v1514_v14, %s10861_s1 }
 0x252   :  { %1556 = vrot.lane.b32.xlu0 %v1515_v41, %s10861_s1 }
 0x255   :  { %v692_v9 = vpop.trf.xlu1 }
 0x256   :  { %1562 = vrot.lane.b32.xlu0 %v1518_v42, %s10861_s1  ;;  %v13753_v42 = vmov 0.0  }
 0x257   :  { %9888 = vmatprep.subr.bf16.mxu0 %v13753_v42 }
 0x258   :  { %9889 = vmatpush3.bf16.msra.mxu0 %v11281_v11 }
 0x259   :  { %v1101_v49 = vpop.permute.xlu0 %1100  ;;  %v693_v20 = vpop.trf.xlu1  ;;  %9900 = vmatprep.subr.bf16.mxu0 %v13753_v42 }
 0x25a   :  { %9860 = vmatprep.subr.mxu1 %v1101_v49  ;;  %1564 = vrot.lane.b32.xlu0 %v1519_v44, %s10861_s1 }
 0x25b   :  { %9861 = vmatpush3.msra.mxu1 %v1101_v49  ;;  %v11291_v49 = vstv %s1602_s29  ;;  %s9318_s29 = sld [smem:[#allocation8 + $0x1]] }
 0x25c   :  { %9862 = vmatprep.subr.mxu1 %v1099_v12 }
 0x25d   :  { %9863 = vmatpush3.msra.mxu1 %v1099_v12  ;;  %v1190_v52 = vpop.permute.xlu0 %1189 }
 0x25e   :  { %9865 = vmatmul.mubr.msk.f32.vlgmr.msra.gmra.mxu1 %vm184_vm0, %v629_v48  ;;  %9867 = vmatprep.subr.mxu1 %v1190_v52 }
 0x25f   :  { %1542 = vrot.lane.b32.xlu0 %v1508_v53, %s10861_s1  ;;  %9868 = vmatpush3.msra.mxu1 %v1190_v52  ;;  %v1473_v52 = vmul.f32 %v11276_v29, %v11047_v39 }
 0x260   :  { %9869 = vmatprep.subr.mxu1 %v1188_v54 }
 0x261   :  { %9870 = vmatpush3.msra.mxu1 %v1188_v54  ;;  %v1279_v55 = vpop.permute.xlu0 %1278 }
 0x262   :  { %9874 = vmatprep.subr.mxu1 %v1279_v55 }
 0x263   :  { %1544 = vrot.lane.b32.xlu0 %v1509_v56, %s10861_s1 }
 0x265   :  { %v9838_v26 = vpop.f32.mrf.mxu0 }
 0x266   :  { %v1455_v14 = vmul.f32 %v9838_v26, %v11274_v17 }
 0x267   :  { %1552 = vrot.lane.b32.xlu0 %v1513_v57, %s10861_s1  ;;  %v820_v12 = vpop.f32.mrf.mxu0 }
 0x268   :  { %v1454_v35 = vmul.f32 %v11274_v17, %v820_v12  ;;  %v1489_v54 = vadd.f32 %v1473_v52, %v1455_v14 }
 0x26a   :  { %v1488_v41 = vadd.f32 %v1472_v24, %v1454_v35 }
 0x26b   :  { %1558 = vrot.lane.b32.xlu0 %v1516_v61, %s10861_s1 }
 0x26d   :  { %v1366_v22 = vpop.permute.xlu1 %1365 }
 0x26f   :  { %1560 = vrot.lane.b32.xlu0 %v1517_v63, %s10861_s1 }
 0x273   :  { %1566 = vrot.lane.b32.xlu0 %v1520_v0, %s10861_s1 }
 0x277   :  { %1568 = vrot.lane.b32.xlu0 %v1521_v1, %s10861_s1 }
 0x278   :  { %v11278_v31 = vpop.f32.mrf.mxu1 }
 0x27a   :  { %v11287_v8 = vpop.f32.mrf.mxu1 }
 0x289   :  { %v660_v5 = vpop.trf.xlu0 }
 0x28a   :  { %9871 = vmatprep.mubr.msk.f32.mxu1 %vm184_vm0, %v660_v5 }
 0x28d   :  { %v661_v10 = vpop.trf.xlu0 }
 0x28e   :  { %9872 = vmatmul.mubr.msk.f32.vlgmr.msra.gmra.mxu1 %vm184_vm0, %v661_v10  ;;  %v1476_v10 = vmul.f32 %v11276_v29, %v11093_v13 }
 0x28f   :  { %9875 = vmatpush3.msra.mxu1 %v1279_v55  ;;  %9878 = vmatprep.mubr.msk.f32.mxu1 %vm184_vm0, %v692_v9  ;;  %v1477_v9 = vmul.f32 %v11276_v29, %v11081_v2 }
 0x290   :  { %9876 = vmatprep.subr.mxu1 %v1277_v4 }
 0x291   :  { %9877 = vmatpush3.msra.mxu1 %v1277_v4 }
 0x292   :  { %9879 = vmatmul.mubr.msk.f32.vlgmr.msra.gmra.mxu1 %vm184_vm0, %v693_v20 }
 0x2a0   :  { %v724_v18 = vpop.trf.xlu1 }
 0x2a1   :  { %9885 = vmatprep.mubr.msk.f32.mxu1 %vm184_vm0, %v724_v18 }
 0x2a4   :  { %v725_v23 = vpop.trf.xlu1 }
 0x2ac   :  { %v1368_v37 = vpop.permute.xlu0 %1367 }
 0x2ad   :  { %9881 = vmatprep.subr.mxu1 %v1368_v37 }
 0x2ae   :  { %9882 = vmatpush3.msra.mxu1 %v1368_v37 }
 0x2af   :  { %9883 = vmatprep.subr.mxu1 %v1366_v22 }
 0x2b0   :  { %v9852_v44 = vpop.f32.mrf.mxu1  ;;  %9884 = vmatpush3.msra.mxu1 %v1366_v22  ;;  %v1539_v48 = vpop.permute.xlu0 %1538 }
 0x2b1   :  { %v1586_v53 = vadd.f32 %v1539_v48, %v1488_v41  ;;  %9886 = vmatmul.mubr.msk.f32.vlgmr.msra.gmra.mxu1 %vm184_vm0, %v725_v23  ;;  %9894 = vmatprep.subr.bf16.mxu1 %v13753_v42  ;;  %v1459_v0 = vmul.f32 %v9852_v44, %v11274_v17  ;;  %v1481_v44 = vmul.f32 %v11276_v29, %v11114_v36 }
 0x2b2   :  { %9895 = vmatpush3.bf16.msra.mxu1 %v11285_v38  ;;  %v998_v56 = vpop.f32.mrf.mxu1 }
 0x2b3   :  { %v11301_v55 = vadd.f32 %v11291_v49, %v1586_v53  ;;  %9906 = vmatprep.subr.bf16.mxu1 %v13753_v42  ;;  %v1458_v1 = vmul.f32 %v11274_v17, %v998_v56  ;;  %v1493_v22 = vadd.f32 %v1477_v9, %v1459_v0 }
 0x2b4   :  { %v1541_v57 = vpop.permute.xlu0 %1540 }
 0x2b5   :  { %v1587_v61 = vadd.f32 %v1541_v57, %v1489_v54  ;;  %v1620_v63 = vsel %vm184_vm0, %v11301_v55, -inf  ;;  %v1492_v18 = vadd.f32 %v1476_v10, %v1458_v1  ;;  %v1480_v54 = vmul.f32 %v11276_v29, %v11101_v21 }
 0x2b6   :  { %1621 = vmax.xlane.f32.xlu0 %v1620_v63 }
 0x2b7   :  { %v11309_v4 = vadd.f32 %v11291_v49, %v1587_v61 }
 0x2b8   :  { %v1547_v5 = vpop.permute.xlu0 %1546 }
 0x2b9   :  { %v1623_v20 = vsel %vm184_vm0, %v11309_v4, -inf  ;;  %v1590_v28 = vadd.f32 %v1547_v5, %v1492_v18 }
 0x2ba   :  { %1624 = vmax.xlane.f32.xlu1 %v1623_v20 }
 0x2bb   :  { %v11323_v16 = vadd.f32 %v11291_v49, %v1590_v28 }
 0x2bc   :  { %v1549_v26 = vpop.permute.xlu0 %1548 }
 0x2bd   :  { %v1591_v33 = vadd.f32 %v1549_v26, %v1493_v22  ;;  %v1632_v35 = vsel %vm184_vm0, %v11323_v16, -inf }
 0x2bf   :  { %v11318_v12 = vadd.f32 %v11291_v49, %v1591_v33 }
 0x2c0   :  { %v1555_v23 = vpop.permute.xlu0 %1554 }
 0x2c1   :  { %v1635_v34 = vsel %vm184_vm0, %v11318_v12, -inf }
 0x2c2   :  { %1636 = vmax.xlane.f32.xlu0 %v1635_v34 }
 0x2c4   :  { %v1557_v57 = vpop.permute.xlu0 %1556 }
 0x2c6   :  { %1633 = vmax.xlane.f32.xlu0 %v1632_v35  ;;  %v1457_v35 = vmul.f32 %v11278_v31, %v11274_v17  ;;  %v1479_v31 = vmul.f32 %v11276_v29, %v11121_v47 }
 0x2c8   :  { %v1563_v9 = vpop.permute.xlu0 %1562 }
 0x2cc   :  { %v1565_v20 = vpop.permute.xlu0 %1564 }
 0x2d1   :  { %v1543_v22 = vpop.permute.xlu0 %1542 }
 0x2d5   :  { %v1545_v18 = vpop.permute.xlu0 %1544 }
 0x2d9   :  { %v1553_v26 = vpop.permute.xlu0 %1552 }
 0x2dd   :  { %v1559_v28 = vpop.permute.xlu0 %1558 }
 0x2e1   :  { %v1561_v34 = vpop.permute.xlu0 %1560 }
 0x2fb   :  { %v9859_v37 = vpop.f32.mrf.mxu1 }
 0x2fd   :  { %v1087_v24 = vpop.f32.mrf.mxu1 }
 0x31e   :  { %v9866_v14 = vpop.f32.mrf.mxu1 }
 0x31f   :  { %v1463_v41 = vmul.f32 %v9866_v14, %v11274_v17  ;;  %v1475_v14 = vmul.f32 %v11276_v29, %v11064_v50 }
 0x320   :  { %v1176_v48 = vpop.f32.mrf.mxu1 }
 0x321   :  { %v1497_v52 = vadd.f32 %v1481_v44, %v1463_v41  ;;  %v1462_v53 = vmul.f32 %v11274_v17, %v1176_v48  ;;  %v1456_v41 = vmul.f32 %v11274_v17, %v11287_v8  ;;  %v1461_v48 = vmul.f32 %v9859_v37, %v11274_v17 }
 0x322   :  { %v1460_v8 = vmul.f32 %v11274_v17, %v1087_v24  ;;  %v1483_v24 = vmul.f32 %v11276_v29, %v11179_v43 }
 0x323   :  { %v1496_v56 = vadd.f32 %v1480_v54, %v1462_v53  ;;  %v1595_v63 = vadd.f32 %v1557_v57, %v1497_v52  ;;  %v1485_v53 = vmul.f32 %v11276_v29, %v11157_v19  ;;  %v1491_v54 = vadd.f32 %v1475_v14, %v1457_v35 }
 0x324   :  { %v1478_v35 = vmul.f32 %v11276_v29, %v11095_v15  ;;  %v1495_v14 = vadd.f32 %v1479_v31, %v1461_v48 }
 0x325   :  { %v1594_v61 = vadd.f32 %v1555_v23, %v1496_v56  ;;  %v11339_v5 = vadd.f32 %v11291_v49, %v1595_v63  ;;  %v1474_v56 = vmul.f32 %v11276_v29, %v11055_v46 }
 0x327   :  { %v11334_v0 = vadd.f32 %v11291_v49, %v1594_v61  ;;  %v1647_v10 = vsel %vm184_vm0, %v11339_v5, -inf  ;;  %v11357_v61 = vpop.permute.xlu0 %1566 }
 0x329   :  { %v1644_v1 = vsel %vm184_vm0, %v11334_v0, -inf }
 0x32a   :  { %1645 = vmax.xlane.f32.xlu0 %v1644_v1  ;;  %v1484_v1 = vmul.f32 %v11276_v29, %v11137_v62 }
 0x32e   :  { %1648 = vmax.xlane.f32.xlu0 %v1647_v10  ;;  %v1490_v10 = vadd.f32 %v1474_v56, %v1456_v41  ;;  %v1593_v56 = vadd.f32 %v1553_v26, %v1495_v14 }
 0x330   :  { %v1588_v47 = vadd.f32 %v1543_v22, %v1490_v10 }
 0x34e   :  { %v9873_v33 = vpop.f32.mrf.mxu1 }
 0x34f   :  { %v1465_v42 = vmul.f32 %v9873_v33, %v11274_v17  ;;  %v1569_v33 = vpop.permute.xlu0 %1568 }
 0x350   :  { %v1265_v23 = vpop.f32.mrf.mxu1 }
 0x352   :  { %v9880_v44 = vpop.f32.mrf.mxu1 }
 0x353   :  { %v1467_v52 = vmul.f32 %v9880_v44, %v11274_v17  ;;  %v1589_v44 = vadd.f32 %v1545_v18, %v1491_v54  ;;  %v1482_v18 = vmul.f32 %v11276_v29, %v11133_v59  ;;  %v1499_v54 = vadd.f32 %v1483_v24, %v1465_v42 }
 0x354   :  { %v1354_v57 = vpop.f32.mrf.mxu1 }
 0x355   :  { %v1501_v63 = vadd.f32 %v1485_v53, %v1467_v52  ;;  %v1466_v37 = vmul.f32 %v11274_v17, %v1354_v57  ;;  %v1494_v52 = vadd.f32 %v1478_v35, %v1460_v8  ;;  %v1464_v53 = vmul.f32 %v11274_v17, %v1265_v23  ;;  %v1551_v23 = vpop.permute.xlu1 %1550  ;;  %v1622_v8 = vpop.xlane.xlu0 %1621 }
 0x356   :  { %v11375_v48 = vadd.f32 %v11291_v49, %v1589_v44 }
 0x357   :  { %v1500_v38 = vadd.f32 %v1484_v1, %v1466_v37  ;;  %v1599_v11 = vadd.f32 %v1565_v20, %v1501_v63  ;;  %v1592_v31 = vadd.f32 %v1551_v23, %v1494_v52  ;;  %v11390_v63 = vadd.f32 %v11291_v49, %v1593_v56 }
 0x358   :  { %v1629_v42 = vsel %vm184_vm0, %v11375_v48, -inf  ;;  %v1597_v37 = vadd.f32 %v1561_v34, %v1499_v54 }
 0x359   :  { %v11370_v57 = vadd.f32 %v11291_v49, %v1599_v11  ;;  %v1598_v41 = vadd.f32 %v1563_v9, %v1500_v38  ;;  %v1498_v11 = vadd.f32 %v1482_v18, %v1464_v53  ;;  %v11385_v9 = vadd.f32 %v11291_v49, %v1588_v47  ;;  %v1625_v47 = vpop.xlane.xlu1 %1624  ;;  %v1637_v44 = vpop.xlane.xlu0 %1636 }
 0x35a   :  { %v11395_v1 = vadd.f32 %v11291_v49, %v1592_v31  ;;  %v1641_v35 = vsel %vm184_vm0, %v11390_v63, -inf  ;;  %v11400_v14 = vadd.f32 %v11291_v49, %v1597_v37  ;;  %v1669_v52 = vsub.f32 %v11309_v4, %v1625_v47 }
 0x35b   :  { %v1659_v20 = vsel %vm184_vm0, %v11370_v57, -inf  ;;  %v11380_v22 = vadd.f32 %v11291_v49, %v1598_v41  ;;  %v1626_v26 = vsel %vm184_vm0, %v11385_v9, -inf  ;;  %v1596_v10 = vadd.f32 %v1559_v28, %v1498_v11 }
 0x35c   :  { %1660 = vmax.xlane.f32.xlu0 %v1659_v20  ;;  %v1638_v34 = vsel %vm184_vm0, %v11395_v1, -inf  ;;  %v1653_v28 = vsel %vm184_vm0, %v11400_v14, -inf  ;;  %v1668_v53 = vsub.f32 %v11301_v55, %v1622_v8  ;;  %v1686_v54 = vmul.f32 1.442695, %v1669_v52 }
 0x35d   :  { %v1656_v38 = vsel %vm184_vm0, %v11380_v22, -inf  ;;  %v11405_v24 = vadd.f32 %v11291_v49, %v1596_v10  ;;  %v1634_v41 = vpop.xlane.xlu0 %1633  ;;  %v1673_v20 = vsub.f32 %v11318_v12, %v1637_v44  ;;  %v1487_v31 = vmul.f32 %v11276_v29, %v11218_v30 }
 0x35e   :  { %1657 = vmax.xlane.f32.xlu1 %v1656_v38  ;;  %v1684_v56 = vmul.f32 1.442695, %v1668_v53  ;;  %v1672_v23 = vsub.f32 %v11323_v16, %v1634_v41  ;;  %10515 = vpow2.f32 %v1686_v54  ;;  %v1486_v37 = vmul.f32 %v11276_v29, %v11205_v6 }
 0x35f   :  { %v1650_v18 = vsel %vm184_vm0, %v11405_v24, -inf  ;;  %v1694_v4 = vmul.f32 1.442695, %v1673_v20  ;;  %v13767_v41 = vmov 0.0  }
 0x360   :  { %1630 = vmax.xlane.f32.xlu0 %v1629_v42  ;;  %10517 = vpow2.f32 %v1684_v56  ;;  %v1692_v11 = vmul.f32 1.442695, %v1672_v23  ;;  %9890 = vmatprep.mubr.msk.bf16.mxu0 %vm10863_vm1, %v13767_v41 }
 0x361   :  { %10519 = vpow2.f32 %v1694_v4  ;;  %9896 = vmatprep.mubr.msk.bf16.mxu1 %vm10863_vm1, %v13767_v41 }
 0x362   :  { %1627 = vmax.xlane.f32.xlu1 %v1626_v26  ;;  %10521 = vpow2.f32 %v1692_v11 }
 0x364   :  { %1642 = vmax.xlane.f32.xlu0 %v1641_v35 }
 0x366   :  { %1639 = vmax.xlane.f32.xlu1 %v1638_v34 }
 0x368   :  { %1654 = vmax.xlane.f32.xlu0 %v1653_v28 }
 0x36a   :  { %1651 = vmax.xlane.f32.xlu1 %v1650_v18 }
 0x36b   :  { %v11430_v34 = vpop.eup %10515 }
 0x36d   :  { %v11434_v29 = vpop.eup %10517 }
 0x36e   :  { %v11438_v52 = vpop.eup %10519 }
 0x36f   :  { %v1731_v28 = vsel %vm184_vm0, %v11438_v52, 0.0 }
 0x371   :  { %v9887_v38 = vpop.f32.mrf.mxu1 }
 0x372   :  { %v1469_v55 = vmul.f32 %v9887_v38, %v11274_v17 }
 0x373   :  { %v1443_v8 = vpop.f32.mrf.mxu1 }
 0x374   :  { %v1503_v42 = vadd.f32 %v1487_v31, %v1469_v55  ;;  %v1468_v12 = vmul.f32 %v11274_v17, %v1443_v8 }
 0x376   :  { %v1502_v16 = vadd.f32 %v1486_v37, %v1468_v12  ;;  %v1601_v26 = vadd.f32 %v1569_v33, %v1503_v42  ;;  %v1719_v33 = vsel %vm184_vm0, %v11430_v34, 0.0 }
 0x378   :  { %v11422_v10 = vadd.f32 %v11291_v49, %v1601_v26  ;;  %v1600_v47 = vadd.f32 %v11357_v61, %v1502_v16  ;;  %v1716_v61 = vsel %vm184_vm0, %v11434_v29, 0.0 }
 0x37a   :  { %v1665_v44 = vsel %vm184_vm0, %v11422_v10, -inf  ;;  %v11428_v35 = vadd.f32 %v11291_v49, %v1600_v47  ;;  %v11442_v49 = vpop.eup %10521 }
 0x37b   :  { %1666 = vmax.xlane.f32.xlu0 %v1665_v44  ;;  %v1728_v53 = vsel %vm184_vm0, %v11442_v49, 0.0 }
 0x37c   :  { %v1662_v17 = vsel %vm184_vm0, %v11428_v35, -inf }
 0x37d   :  { %1663 = vmax.xlane.f32.xlu1 %v1662_v17 }
 0x37f   :  { %1720 = vadd.xlane.f32.xlu0 %v1719_v33 }
 0x381   :  { %1717 = vadd.xlane.f32.xlu1 %v1716_v61 }
 0x383   :  { %1732 = vadd.xlane.f32.xlu0 %v1731_v28 }
 0x385   :  { %1729 = vadd.xlane.f32.xlu1 %v1728_v53 }
 0x3b3   :  { %v1646_v18 = vpop.xlane.xlu0 %1645 }
 0x3b4   :  { %v1676_v54 = vsub.f32 %v11334_v0, %v1646_v18 }
 0x3b6   :  { %v1700_v20 = vmul.f32 1.442695, %v1676_v54 }
 0x3b7   :  { %v1649_v56 = vpop.xlane.xlu0 %1648 }
 0x3b8   :  { %10523 = vpow2.f32 %v1700_v20  ;;  %v1677_v23 = vsub.f32 %v11339_v5, %v1649_v56 }
 0x3ba   :  { %v1702_v4 = vmul.f32 1.442695, %v1677_v23 }
 0x3bc   :  { %10525 = vpow2.f32 %v1702_v4 }
 0x3c5   :  { %v11454_v11 = vpop.eup %10523 }
 0x3c6   :  { %v1740_v38 = vsel %vm184_vm0, %v11454_v11, 0.0 }
 0x3c7   :  { %1741 = vadd.xlane.f32.xlu1 %v1740_v38 }
 0x3c9   :  { %v11458_v55 = vpop.eup %10525 }
 0x3ca   :  { %v1743_v31 = vsel %vm184_vm0, %v11458_v55, 0.0 }
 0x3cb   :  { %1744 = vadd.xlane.f32.xlu0 %v1743_v31 }
 0x3e5   :  { %v1661_v0 = vpop.xlane.xlu0 %1660 }
 0x3e6   :  { %v1681_v8 = vsub.f32 %v11370_v57, %v1661_v0 }
 0x3e7   :  { %v1658_v42 = vpop.xlane.xlu1 %1657 }
 0x3e8   :  { %v1710_v12 = vmul.f32 1.442695, %v1681_v8  ;;  %v1680_v5 = vsub.f32 %v11380_v22, %v1658_v42 }
 0x3e9   :  { %v1631_v37 = vpop.xlane.xlu0 %1630 }
 0x3ea   :  { %10527 = vpow2.f32 %v1710_v12  ;;  %v1708_v16 = vmul.f32 1.442695, %v1680_v5  ;;  %v1671_v26 = vsub.f32 %v11375_v48, %v1631_v37 }
 0x3eb   :  { %v1628_v47 = vpop.xlane.xlu1 %1627 }
 0x3ec   :  { %10529 = vpow2.f32 %v1708_v16  ;;  %v1690_v44 = vmul.f32 1.442695, %v1671_v26  ;;  %v1670_v17 = vsub.f32 %v11385_v9, %v1628_v47 }
 0x3ed   :  { %v1643_v33 = vpop.xlane.xlu0 %1642 }
 0x3ee   :  { %10531 = vpow2.f32 %v1690_v44  ;;  %v1688_v61 = vmul.f32 1.442695, %v1670_v17  ;;  %v1675_v28 = vsub.f32 %v11390_v63, %v1643_v33 }
 0x3ef   :  { %v1640_v57 = vpop.xlane.xlu1 %1639 }
 0x3f0   :  { %10533 = vpow2.f32 %v1688_v61  ;;  %v1698_v53 = vmul.f32 1.442695, %v1675_v28  ;;  %v1674_v22 = vsub.f32 %v11395_v1, %v1640_v57 }
 0x3f1   :  { %v1655_v18 = vpop.xlane.xlu0 %1654 }
 0x3f2   :  { %10535 = vpow2.f32 %v1698_v53  ;;  %v1696_v54 = vmul.f32 1.442695, %v1674_v22  ;;  %v1679_v48 = vsub.f32 %v11400_v14, %v1655_v18 }
 0x3f3   :  { %v1652_v20 = vpop.xlane.xlu1 %1651 }
 0x3f4   :  { %10537 = vpow2.f32 %v1696_v54  ;;  %v1706_v56 = vmul.f32 1.442695, %v1679_v48  ;;  %v1678_v9 = vsub.f32 %v11405_v24, %v1652_v20 }
 0x3f6   :  { %10539 = vpow2.f32 %v1706_v56  ;;  %v1704_v23 = vmul.f32 1.442695, %v1678_v9 }
 0x3f7   :  { %v11470_v4 = vpop.eup %10527 }
 0x3f8   :  { %10541 = vpow2.f32 %v1704_v23  ;;  %v1755_v63 = vsel %vm184_vm0, %v11470_v4, 0.0 }
 0x3f9   :  { %v11474_v38 = vpop.eup %10529  ;;  %1756 = vadd.xlane.f32.xlu0 %v1755_v63 }
 0x3fa   :  { %v1752_v1 = vsel %vm184_vm0, %v11474_v38, 0.0 }
 0x3fb   :  { %v11478_v14 = vpop.eup %10531  ;;  %1753 = vadd.xlane.f32.xlu1 %v1752_v1 }
 0x3fc   :  { %v1725_v24 = vsel %vm184_vm0, %v11478_v14, 0.0 }
 0x3fd   :  { %v11482_v31 = vpop.eup %10533  ;;  %1726 = vadd.xlane.f32.xlu0 %v1725_v24 }
 0x3fe   :  { %v1722_v0 = vsel %vm184_vm0, %v11482_v31, 0.0 }
 0x3ff   :  { %v11486_v8 = vpop.eup %10535  ;;  %1723 = vadd.xlane.f32.xlu1 %v1722_v0 }
 0x400   :  { %v1737_v42 = vsel %vm184_vm0, %v11486_v8, 0.0 }
 0x401   :  { %v11490_v12 = vpop.eup %10537  ;;  %1738 = vadd.xlane.f32.xlu0 %v1737_v42 }
 0x402   :  { %v1734_v5 = vsel %vm184_vm0, %v11490_v12, 0.0 }
 0x403   :  { %v11494_v37 = vpop.eup %10539  ;;  %1735 = vadd.xlane.f32.xlu1 %v1734_v5 }
 0x404   :  { %v1667_v16 = vpop.xlane.xlu0 %1666  ;;  %v1749_v26 = vsel %vm184_vm0, %v11494_v37, 0.0 }
 0x405   :  { %v11498_v47 = vpop.eup %10541  ;;  %v1683_v44 = vsub.f32 %v11422_v10, %v1667_v16  ;;  %1750 = vadd.xlane.f32.xlu0 %v1749_v26 }
 0x406   :  { %v1664_v17 = vpop.xlane.xlu1 %1663  ;;  %v1746_v33 = vsel %vm184_vm0, %v11498_v47, 0.0 }
 0x407   :  { %v1714_v61 = vmul.f32 1.442695, %v1683_v44  ;;  %v1682_v28 = vsub.f32 %v11428_v35, %v1664_v17  ;;  %1747 = vadd.xlane.f32.xlu1 %v1746_v33  ;;  %v405_v44 = vadd.f32 %v11202_v3, %v11165_v25  ;;  %v408_v17 = vadd.f32 %v11264_v27, %v11165_v25 }
 0x408   :  { %v1721_v57 = vpop.xlane.xlu0 %1720 }
 0x409   :  { %10543 = vpow2.f32 %v1714_v61  ;;  %v1712_v53 = vmul.f32 1.442695, %v1682_v28 }
 0x40a   :  { %10545 = vrcp.f32 %v1721_v57  ;;  %v1718_v22 = vpop.xlane.xlu1 %1717  ;;  %v10514_v57 = vld [vmem:[%s13745_s5] sm:$0xff]  }
 0x40b   :  { %10547 = vpow2.f32 %v1712_v53  ;;  %v11565_v53 = vpack.c.bf16 %v408_v17, %v405_v44 }
 0x40c   :  { %10549 = vrcp.f32 %v1718_v22  ;;  %v1733_v54 = vpop.xlane.xlu0 %1732 }
 0x40e   :  { %v1730_v18 = vpop.xlane.xlu1 %1729 }
 0x40f   :  { %10551 = vrcp.f32 %v1730_v18 }
 0x410   :  { %10553 = vrcp.f32 %v1733_v54 }
 0x416   :  { %v11504_v10 = vpop.eup %10543 }
 0x417   :  { %v10546_v48 = vpop.eup %10545  ;;  %v1761_v20 = vsel %vm184_vm0, %v11504_v10, 0.0 }
 0x418   :  { %v11508_v56 = vpop.eup %10547  ;;  %1762 = vadd.xlane.f32.xlu0 %v1761_v20  ;;  %v1781_v63 = vmul.f32 %v10546_v48, %v11430_v34  ;;  %v392_v34 = vadd.f32 %v11194_v58, %v11165_v25 }
 0x419   :  { %v10550_v35 = vpop.eup %10549  ;;  %v1758_v9 = vsel %vm184_vm0, %v11508_v56, 0.0 }
 0x41a   :  { %1759 = vadd.xlane.f32.xlu1 %v1758_v9  ;;  %v1780_v23 = vmul.f32 %v10550_v35, %v11434_v29  ;;  %v389_v29 = vadd.f32 %v11186_v51, %v11165_v25 }
 0x41c   :  { %v11514_v1 = vpack.c.bf16 %v1781_v63, %v1780_v23  ;;  %v10552_v24 = vpop.eup %10551  ;;  %v11530_v26 = vpack.c.bf16 %v392_v34, %v389_v29 }
 0x41d   :  { %v10554_v0 = vpop.eup %10553  ;;  %v1784_v42 = vmul.f32 %v10552_v24, %v11442_v49 }
 0x41e   :  { %9891 = vmatmul.mubr.msk.bf16.vlgmr.msra.gmra.mxu0 %vm184_vm0, %v11514_v1  ;;  %v1785_v5 = vmul.f32 %v10554_v0, %v11438_v52 }
 0x41f   :  { %9901 = vmatpush3.bf16.msra.mxu0 %v11181_v45  ;;  %9902 = vmatprep.mubr.msk.bf16.mxu0 %vm10863_vm1, %v13767_v41 }
 0x420   :  { %9912 = vmatprep.subr.bf16.mxu0 %v13767_v41  ;;  %v11528_v16 = vpack.c.bf16 %v1785_v5, %v1784_v42 }
 0x426   :  { %9903 = vmatmul.mubr.msk.bf16.vlgmr.msra.gmra.mxu0 %vm184_vm0, %v11528_v16 }
 0x427   :  { %9913 = vmatpush3.bf16.msra.mxu0 %v11530_v26  ;;  %9914 = vmatprep.mubr.msk.bf16.mxu0 %vm10863_vm1, %v13767_v41 }
 0x428   :  { %9924 = vmatprep.subr.bf16.mxu0 %v13767_v41 }
 0x42b   :  { %2510 = vrot.lane.b32.xlu1 %v11037_v32, %s10864_s9 }
 0x42e   :  { %2512 = vrot.lane.b32.xlu0 %v11047_v39, %s10864_s9 }
 0x42f   :  { %2514 = vrot.lane.b32.xlu1 %v11055_v46, %s10864_s9 }
 0x432   :  { %2520 = vrot.lane.b32.xlu0 %v11081_v2, %s10864_s9 }
 0x433   :  { %2516 = vrot.lane.b32.xlu1 %v11064_v50, %s10864_s9 }
 0x436   :  { %2528 = vrot.lane.b32.xlu0 %v11114_v36, %s10864_s9 }
 0x437   :  { %2518 = vrot.lane.b32.xlu1 %v11093_v13, %s10864_s9 }
 0x43a   :  { %2536 = vrot.lane.b32.xlu0 %v11157_v19, %s10864_s9 }
 0x43b   :  { %2526 = vrot.lane.b32.xlu1 %v11101_v21, %s10864_s9 }
 0x450   :  { %v1742_v51 = vpop.xlane.xlu1 %1741 }
 0x451   :  { %10555 = vrcp.f32 %v1742_v51 }
 0x454   :  { %v1745_v58 = vpop.xlane.xlu0 %1744 }
 0x455   :  { %10557 = vrcp.f32 %v1745_v58 }
 0x45e   :  { %v10556_v52 = vpop.eup %10555 }
 0x45f   :  { %v1788_v33 = vmul.f32 %v10556_v52, %v11454_v11 }
 0x462   :  { %v10558_v49 = vpop.eup %10557 }
 0x463   :  { %v1789_v61 = vmul.f32 %v10558_v49, %v11458_v55 }
 0x465   :  { %v1800_v28 = vpack.c.bf16 %v1789_v61, %v1788_v33 }
 0x467   :  { %9915 = vmatmul.mubr.msk.bf16.vlgmr.msra.gmra.mxu0 %vm184_vm0, %v1800_v28 }
 0x468   :  { %9925 = vmatpush3.bf16.msra.mxu0 %v11565_v53  ;;  %9926 = vmatprep.mubr.msk.bf16.mxu0 %vm10863_vm1, %v13767_v41 }
 0x469   :  { %9936 = vmatprep.subr.bf16.mxu0 %v10514_v57 }
 0x482   :  { %v1757_v25 = vpop.xlane.xlu0 %1756 }
 0x483   :  { %10559 = vrcp.f32 %v1757_v25 }
 0x484   :  { %v1754_v3 = vpop.xlane.xlu1 %1753 }
 0x485   :  { %10561 = vrcp.f32 %v1754_v3 }
 0x486   :  { %v1727_v27 = vpop.xlane.xlu0 %1726 }
 0x487   :  { %10563 = vrcp.f32 %v1727_v27 }
 0x488   :  { %v1724_v11 = vpop.xlane.xlu1 %1723 }
 0x489   :  { %10565 = vrcp.f32 %v1724_v11  ;;  %v2282_v11 = vld [vmem:[%s13746_s6 + $0x38] sm:$0xff] }
 0x48a   :  { %v1739_v55 = vpop.xlane.xlu0 %1738 }
 0x48c   :  { %v1736_v22 = vpop.xlane.xlu1 %1735 }
 0x48d   :  { %10567 = vrcp.f32 %v1736_v22 }
 0x48e   :  { %10569 = vrcp.f32 %v1739_v55  ;;  %v1751_v23 = vpop.xlane.xlu0 %1750  ;;  %v2279_v55 = vld [vmem:[%s13746_s6 + $0x20] sm:$0xff] }
 0x490   :  { %v10560_v18 = vpop.eup %10559  ;;  %v1748_v48 = vpop.xlane.xlu1 %1747 }
 0x491   :  { %v1793_v35 = vmul.f32 %v10560_v18, %v11470_v4  ;;  %10571 = vrcp.f32 %v1748_v48 }
 0x492   :  { %v10562_v54 = vpop.eup %10561  ;;  %10573 = vrcp.f32 %v1751_v23 }
 0x493   :  { %v1792_v20 = vmul.f32 %v10562_v54, %v11474_v38  ;;  %v2278_v54 = vld [vmem:[%s13746_s6 + $0x18] sm:$0xff] }
 0x494   :  { %v10564_v9 = vpop.eup %10563 }
 0x495   :  { %v1802_v63 = vpack.c.bf16 %v1793_v35, %v1792_v20  ;;  %v1783_v42 = vmul.f32 %v10564_v9, %v11478_v14  ;;  %v2277_v20 = vld [vmem:[%s13746_s6 + $0x10] sm:$0xff]  ;;  %v2276_v9 = vld [vmem:[%s13746_s6 + $0x8] sm:$0xff] }
 0x496   :  { %v10566_v24 = vpop.eup %10565 }
 0x497   :  { %9927 = vmatmul.mubr.msk.bf16.vlgmr.msra.gmra.mxu0 %vm184_vm0, %v1802_v63  ;;  %v1782_v0 = vmul.f32 %v10566_v24, %v11482_v31 }
 0x498   :  { %9938 = vmatprep.mubr.msk.bf16.mxu0 %vm184_vm0, %v11514_v1  ;;  %9937 = vmatpush3.bf16.msra.mxu0 %v10514_v57 }
 0x499   :  { %v1797_v29 = vpack.c.bf16 %v1783_v42, %v1782_v0  ;;  %v13768_v42 = vld [vmem:[#allocation16_spill] sm:$0xff] }
 0x49a   :  { %v10568_v38 = vpop.eup %10567 }
 0x49b   :  { %9897 = vmatmul.mubr.msk.bf16.vlgmr.msra.gmra.mxu1 %vm184_vm0, %v1797_v29  ;;  %v10570_v4 = vpop.eup %10569  ;;  %v1786_v31 = vmul.f32 %v10568_v38, %v11490_v12 }
 0x49c   :  { %9907 = vmatpush3.bf16.msra.mxu1 %v11174_v40  ;;  %9908 = vmatprep.mubr.msk.bf16.mxu1 %vm10863_vm1, %v13767_v41  ;;  %v1787_v14 = vmul.f32 %v10570_v4, %v11486_v8 }
 0x49d   :  { %9918 = vmatprep.subr.bf16.mxu1 %v13767_v41 }
 0x49e   :  { %v1799_v34 = vpack.c.bf16 %v1787_v14, %v1786_v31  ;;  %v10572_v5 = vpop.eup %10571 }
 0x49f   :  { %9939 = vmatmul.mubr.msk.bf16.vlgmr.msra.gmra.mxu0 %vm184_vm0, %v1797_v29  ;;  %v10574_v58 = vpop.eup %10573  ;;  %v1790_v8 = vmul.f32 %v10572_v5, %v11498_v47 }
 0x4a0   :  { %9942 = vmatprep.mubr.msk.bf16.mxu0 %vm184_vm0, %v11528_v16  ;;  %v1791_v16 = vmul.f32 %v10574_v58, %v11494_v37 }
 0x4a1   :  { %v1763_v1 = vpop.xlane.xlu0 %1762 }
 0x4a2   :  { %10575 = vrcp.f32 %v1763_v1  ;;  %v1801_v52 = vpack.c.bf16 %v1791_v16, %v1790_v8 }
 0x4a3   :  { %v1760_v51 = vpop.xlane.xlu1 %1759  ;;  %9909 = vmatmul.mubr.msk.bf16.vlgmr.msra.gmra.mxu1 %vm184_vm0, %v1799_v34 }
 0x4a4   :  { %10577 = vrcp.f32 %v1760_v51  ;;  %9919 = vmatpush3.bf16.msra.mxu1 %v11197_v60  ;;  %9920 = vmatprep.mubr.msk.bf16.mxu1 %vm10863_vm1, %v13767_v41 }
 0x4a5   :  { %9930 = vmatprep.subr.bf16.mxu1 %v13767_v41  ;;  %v2513_v44 = vpop.permute.xlu0 %2512 }
 0x4a7   :  { %v2511_v12 = vpop.permute.xlu1 %2510  ;;  %9943 = vmatmul.mubr.msk.bf16.gmra.mxu0 %vm184_vm0, %v1799_v34 }
 0x4a8   :  { %2558 = vxpose.xlu1.b32.start [1/2] (short) (narrow) %v2511_v12, 16  ;;  %9946 = vmatprep.mubr.msk.bf16.mxu0 %vm184_vm0, %v1800_v28 }
 0x4a9   :  { %v2521_v25 = vpop.permute.xlu0 %2520 }
 0x4ab   :  { %v2515_v49 = vpop.permute.xlu1 %2514  ;;  %9921 = vmatmul.mubr.msk.bf16.vlgmr.msra.gmra.mxu1 %vm184_vm0, %v1801_v52 }
 0x4ac   :  { %9931 = vmatpush3.bf16.msra.mxu1 %v11207_v7  ;;  %2590 = vxpose.xlu0.b32.start [1/2] (short) (narrow) %v2515_v49, 16 }
 0x4ad   :  { %2559 = vxpose.xlu1.b32.end [2/2] (short) (narrow) %v2513_v44, 16  ;;  %9932 = vmatprep.mubr.msk.bf16.mxu1 %vm10863_vm1, %v13767_v41  ;;  %v2529_v27 = vpop.permute.xlu0 %2528 }
 0x4ae   :  { %9954 = vmatprep.subr.mxu1 %v2282_v11 }
 0x4af   :  { %v10576_v47 = vpop.eup %10575  ;;  %v2517_v17 = vpop.permute.xlu1 %2516  ;;  %9947 = vmatmul.mubr.msk.bf16.gmra.mxu0 %vm184_vm0, %v1801_v52 }
 0x4b0   :  { %2591 = vxpose.xlu0.b32.end [2/2] (short) (narrow) %v2517_v17, 16  ;;  %9950 = vmatprep.mubr.msk.bf16.mxu0 %vm184_vm0, %v1802_v63  ;;  %v1795_v61 = vmul.f32 %v10576_v47, %v11504_v10  ;;  %v2281_v10 = vld [vmem:[%s13746_s6 + $0x30] sm:$0xff]  ;;  %v2275_v63 = vld [vmem:[%s13746_s6] sm:$0xff] }
 0x4b1   :  { %v10578_v37 = vpop.eup %10577  ;;  %v2537_v8 = vpop.permute.xlu0 %2536 }
 0x4b2   :  { %v1794_v33 = vmul.f32 %v10578_v37, %v11508_v56  ;;  %v2280_v56 = vld [vmem:[%s13746_s6 + $0x28] sm:$0xff] }
 0x4b3   :  { %v2519_v28 = vpop.permute.xlu1 %2518 }
 0x4b4   :  { %2622 = vxpose.xlu0.b32.start [1/2] (short) (narrow) %v2519_v28, 16  ;;  %v1803_v57 = vpack.c.bf16 %v1795_v61, %v1794_v33 }
 0x4b6   :  { %9933 = vmatmul.mubr.msk.bf16.vlgmr.msra.gmra.mxu1 %vm184_vm0, %v1803_v57 }
 0x4b7   :  { %v2527_v3 = vpop.permute.xlu1 %2526  ;;  %9951 = vmatmul.mubr.msk.bf16.gmra.mxu0 %vm184_vm0, %v1803_v57  ;;  %9955 = vmatpush3.msra.mxu1 %v2282_v11 }
 0x4b8   :  { %2686 = vxpose.xlu1.b32.start [1/2] (short) (narrow) %v2527_v3, 16  ;;  %2623 = vxpose.xlu0.b32.end [2/2] (short) (narrow) %v2521_v25, 16  ;;  %v11687_v3 = vld [vmem:[%s13744_s4] sm:$0xff] }
 0x4b9   :  { %9956 = vmatprep.subr.mxu1 %v2281_v10 }
 0x4ba   :  { %9957 = vmatpush3.msra.mxu1 %v2281_v10 }
 0x4bb   :  { %9958 = vmatprep.subr.mxu1 %v2280_v56 }
 0x4bc   :  { %2687 = vxpose.xlu1.b32.end [2/2] (short) (narrow) %v2529_v27, 16  ;;  %9959 = vmatpush3.msra.mxu1 %v2280_v56 }
 0x4bd   :  { %9960 = vmatprep.subr.mxu1 %v2279_v55 }
 0x4be   :  { %9961 = vmatpush3.msra.mxu1 %v2279_v55 }
 0x4bf   :  { %9962 = vmatprep.subr.mxu1 %v2278_v54 }
 0x4c0   :  { %9963 = vmatpush3.msra.mxu1 %v2278_v54  ;;  %v481_v54 = vld [vmem:[%s13744_s4 + $0x8] sm:$0xff] }
 0x4c1   :  { %9964 = vmatprep.subr.mxu1 %v2277_v20 }
 0x4c2   :  { %9965 = vmatpush3.msra.mxu1 %v2277_v20 }
 0x4c3   :  { %9966 = vmatprep.subr.mxu1 %v2276_v9 }
 0x4c4   :  { %9967 = vmatpush3.msra.mxu1 %v2276_v9 }
 0x4c5   :  { %9968 = vmatprep.subr.mxu1 %v2275_v63 }
 0x4c6   :  { %9969 = vmatpush3.msra.mxu1 %v2275_v63 }
 0x4da   :  { %2534 = vrot.lane.b32.xlu1 %v11137_v62, %s10864_s9 }
 0x4de   :  { %v11621_v22 = vpop.f32.mrf.mxu0  ;;  %2816 = vrot.lane.b32.xlu1 %v11047_v39, %s10865_s0 }
 0x4e0   :  { %v9892_v18 = vpop.f32.mrf.mxu0 }
 0x4e2   :  { %v11628_v48 = vpop.f32.mrf.mxu0  ;;  %2903 = vrot.lane.b32.xlu1 %v11064_v50, %s10865_s0 }
 0x4e4   :  { %v9893_v35 = vpop.f32.mrf.mxu0 }
 0x4e6   :  { %v11638_v23 = vpop.f32.mrf.mxu0  ;;  %2522 = vrot.lane.b32.xlu1 %v11095_v15, %s10864_s9 }
 0x4e8   :  { %v9904_v24 = vpop.f32.mrf.mxu0 }
 0x4ea   :  { %v11645_v0 = vpop.f32.mrf.mxu0  ;;  %2524 = vrot.lane.b32.xlu1 %v13768_v42, %s10864_s9 }
 0x4ec   :  { %v9905_v29 = vpop.f32.mrf.mxu0 }
 0x4ee   :  { %2530 = vrot.lane.b32.xlu1 %v11133_v59, %s10864_s9 }
 0x4f2   :  { %2532 = vrot.lane.b32.xlu1 %v11179_v43, %s10864_s9 }
 0x4f6   :  { %2538 = vrot.lane.b32.xlu1 %v11205_v6, %s10864_s9 }
 0x4fa   :  { %2540 = vrot.lane.b32.xlu1 %v11218_v30, %s10864_s9 }
 0x4fe   :  { %3075 = vrot.lane.b32.xlu1 %v11095_v15, %s10865_s0 }
 0x502   :  { %3425 = vrot.lane.b32.xlu1 %v11218_v30, %s10865_s0 }
 0x525   :  { %v2574_v38 = vpop.trf.xlu1 }
 0x526   :  { %9998 = vmatprep.mubr.msk.f32.mxu0 %vm184_vm0, %v2574_v38 }
 0x527   :  { %v11662_v4 = vpop.f32.mrf.mxu0 }
 0x529   :  { %v9916_v31 = vpop.f32.mrf.mxu0  ;;  %v11666_v34 = vpop.trf.xlu1 }
 0x52b   :  { %v11664_v14 = vpop.f32.mrf.mxu0 }
 0x52d   :  { %v9917_v1 = vpop.f32.mrf.mxu0 }
 0x534   :  { %v11668_v5 = vpop.trf.xlu1 }
 0x538   :  { %v11670_v51 = vpop.trf.xlu1 }
 0x54c   :  { %v2535_v58 = vpop.permute.xlu1 %2534 }
 0x54d   :  { %2750 = vxpose.xlu0.b32.start [1/2] (short) (narrow) %v2535_v58, 16 }
 0x550   :  { %v2817_v12 = vpop.permute.xlu1 %2816 }
 0x551   :  { %9994 = vmatprep.subr.mxu0 %v2817_v12  ;;  %2751 = vxpose.xlu0.b32.end [2/2] (short) (narrow) %v2537_v8, 16 }
 0x552   :  { %9995 = vmatpush3.msra.mxu0 %v2817_v12 }
 0x554   :  { %v11672_v16 = vpop.permute.xlu1 %2903 }
 0x557   :  { %v11674_v52 = vpop.f32.mrf.mxu0 }
 0x558   :  { %v2523_v49 = vpop.permute.xlu1 %2522 }
 0x559   :  { %v9928_v44 = vpop.f32.mrf.mxu0  ;;  %2654 = vxpose.xlu1.b32.start [1/2] (short) (narrow) %v2523_v49, 16 }
 0x55b   :  { %v11676_v47 = vpop.f32.mrf.mxu1  ;;  %v11678_v17 = vpop.f32.mrf.mxu0 }
 0x55c   :  { %v2525_v37 = vpop.permute.xlu1 %2524 }
 0x55d   :  { %v9898_v33 = vpop.f32.mrf.mxu1  ;;  %v9929_v61 = vpop.f32.mrf.mxu0  ;;  %2655 = vxpose.xlu1.b32.end [2/2] (short) (narrow) %v2525_v37, 16 }
 0x55f   :  { %v11680_v28 = vpop.f32.mrf.mxu1  ;;  %v9940_v57 = vpop.f32.mrf.mxu0 }
 0x560   :  { %v11682_v25 = vpop.permute.xlu1 %2530  ;;  %v2261_v63 = vmul.f32 %v9940_v57, %v11687_v3 }
 0x561   :  { %v9899_v27 = vpop.f32.mrf.mxu1  ;;  %v2196_v11 = vpop.f32.mrf.mxu0 }
 0x562   :  { %v2259_v10 = vmul.f32 %v2196_v11, %v11687_v3 }
 0x563   :  { %v11690_v56 = vpop.f32.mrf.mxu1  ;;  %v9941_v55 = vpop.f32.mrf.mxu0 }
 0x564   :  { %9970 = vmatprep.mubr.msk.f32.mxu1 %vm2283_vm2, %v2259_v10  ;;  %v11693_v18 = vpop.permute.xlu1 %2532  ;;  %v2262_v58 = vmul.f32 %v9941_v55, %v481_v54 }
 0x565   :  { %v9910_v20 = vpop.f32.mrf.mxu1  ;;  %v2199_v35 = vpop.f32.mrf.mxu0 }
 0x566   :  { %v2260_v9 = vmul.f32 %v2199_v35, %v481_v54 }
 0x567   :  { %v11699_v24 = vpop.f32.mrf.mxu1  ;;  %v9944_v29 = vpop.f32.mrf.mxu0 }
 0x568   :  { %9971 = vmatmul.mubr.msk.f32.vlgmr.msra.gmra.mxu1 %vm2283_vm2, %v2260_v9  ;;  %v2539_v38 = vpop.permute.xlu1 %2538  ;;  %v2265_v57 = vmul.f32 %v9944_v29, %v11687_v3 }
 0x569   :  { %v9911_v31 = vpop.f32.mrf.mxu1  ;;  %v2212_v1 = vpop.f32.mrf.mxu0  ;;  %9973 = vmatprep.mubr.msk.f32.mxu1 %vm2283_vm2, %v2261_v63  ;;  %2782 = vxpose.xlu1.b32.start [1/2] (short) (narrow) %v2539_v38, 16 }
 0x56a   :  { %v2263_v8 = vmul.f32 %v2212_v1, %v11687_v3 }
 0x56b   :  { %v11704_v12 = vpop.f32.mrf.mxu1  ;;  %v9945_v49 = vpop.f32.mrf.mxu0 }
 0x56c   :  { %9974 = vmatmul.mubr.msk.f32.gmra.mxu1 %vm2283_vm2, %v2262_v58  ;;  %v2541_v44 = vpop.permute.xlu1 %2540  ;;  %v2266_v20 = vmul.f32 %v9945_v49, %v481_v54 }
 0x56d   :  { %v9922_v37 = vpop.f32.mrf.mxu1  ;;  %v2215_v33 = vpop.f32.mrf.mxu0  ;;  %9976 = vmatprep.mubr.msk.f32.mxu1 %vm2283_vm2, %v2263_v8  ;;  %2783 = vxpose.xlu1.b32.end [2/2] (short) (narrow) %v2541_v44, 16 }
 0x56e   :  { %v2264_v61 = vmul.f32 %v2215_v33, %v481_v54 }
 0x56f   :  { %v11709_v27 = vpop.f32.mrf.mxu1  ;;  %v9948_v11 = vpop.f32.mrf.mxu0 }
 0x570   :  { %9977 = vmatmul.mubr.msk.f32.gmra.mxu1 %vm2283_vm2, %v2264_v61  ;;  %v2269_v31 = vmul.f32 %v9948_v11, %v11687_v3 }
 0x571   :  { %v9923_v10 = vpop.f32.mrf.mxu1  ;;  %v2228_v55 = vpop.f32.mrf.mxu0  ;;  %9979 = vmatprep.mubr.msk.f32.mxu1 %vm2283_vm2, %v2265_v57 }
 0x572   :  { %v2267_v35 = vmul.f32 %v2228_v55, %v11687_v3 }
 0x573   :  { %v9949_v9 = vpop.f32.mrf.mxu0 }
 0x574   :  { %9980 = vmatmul.mubr.msk.f32.gmra.mxu1 %vm2283_vm2, %v2266_v20  ;;  %v2270_v49 = vmul.f32 %v9949_v9, %v481_v54  ;;  %v11738_v20 = vstv %s9317_s28 }
 0x575   :  { %v2231_v63 = vpop.f32.mrf.mxu0  ;;  %9982 = vmatprep.mubr.msk.f32.mxu1 %vm2283_vm2, %v2267_v35  ;;  %v11744_v35 = vstv %s9318_s29 }
 0x576   :  { %v2268_v38 = vmul.f32 %v2231_v63, %v481_v54  ;;  %v11716_v29 = vpop.f32.mrf.mxu1  ;;  %v3629_v9 = vmul.f32 %v11744_v35, %v11047_v39  ;;  %v3534_v63 = vmul.f32 %v11738_v20, %v11093_v13 }
 0x577   :  { %v9952_v1 = vpop.f32.mrf.mxu0 }
 0x578   :  { %v9934_v58 = vpop.f32.mrf.mxu1  ;;  %9983 = vmatmul.mubr.msk.f32.gmra.mxu1 %vm2283_vm2, %v2268_v38  ;;  %v2273_v10 = vmul.f32 %v9952_v1, %v11687_v3  ;;  %v3632_v38 = vmul.f32 %v11744_v35, %v11093_v13  ;;  %v3636_v1 = vmul.f32 %v11744_v35, %v11101_v21 }
 0x579   :  { %v2244_v8 = vpop.f32.mrf.mxu0  ;;  %9985 = vmatprep.mubr.msk.f32.mxu1 %vm2283_vm2, %v2269_v31  ;;  %v3538_v31 = vmul.f32 %v11738_v20, %v11101_v21  ;;  %v3542_v58 = vmul.f32 %v11738_v20, %v11137_v62 }
 0x57a   :  { %v2271_v44 = vmul.f32 %v2244_v8, %v11687_v3  ;;  %v11722_v37 = vpop.f32.mrf.mxu1  ;;  %2814 = vrot.lane.b32.xlu0 %v11037_v32, %s10865_s0  ;;  %v3531_v3 = vmul.f32 %v11738_v20, %v11047_v39  ;;  %v3640_v8 = vmul.f32 %v11744_v35, %v11137_v62 }
 0x57b   :  { %v9953_v33 = vpop.f32.mrf.mxu0 }
 0x57c   :  { %v9935_v61 = vpop.f32.mrf.mxu1  ;;  %9986 = vmatmul.mubr.msk.f32.gmra.mxu1 %vm2283_vm2, %v2270_v49  ;;  %v2274_v55 = vmul.f32 %v9953_v33, %v481_v54  ;;  %v3532_v49 = vmul.f32 %v11738_v20, %v11055_v46  ;;  %v3536_v33 = vmul.f32 %v11738_v20, %v11095_v15 }
 0x57d   :  { %v2247_v57 = vpop.f32.mrf.mxu0  ;;  %9988 = vmatprep.mubr.msk.f32.mxu1 %vm2283_vm2, %v2271_v44  ;;  %v3630_v44 = vmul.f32 %v11744_v35, %v11055_v46  ;;  %v3634_v61 = vmul.f32 %v11744_v35, %v11095_v15 }
 0x57e   :  { %v2272_v11 = vmul.f32 %v2247_v57, %v481_v54  ;;  %2901 = vrot.lane.b32.xlu0 %v11055_v46, %s10865_s0  ;;  %v3628_v54 = vmul.f32 %v11744_v35, %v11037_v32  ;;  %v3540_v57 = vmul.f32 %v11738_v20, %v11133_v59 }
 0x580   :  { %9989 = vmatmul.mubr.msk.f32.gmra.mxu1 %vm2283_vm2, %v2272_v11  ;;  %v3638_v11 = vmul.f32 %v11744_v35, %v11133_v59 }
 0x581   :  { %9991 = vmatprep.mubr.msk.f32.mxu1 %vm2283_vm2, %v2273_v10  ;;  %v3544_v10 = vmul.f32 %v11738_v20, %v11205_v6 }
 0x582   :  { %2990 = vrot.lane.b32.xlu0 %v11081_v2, %s10865_s0 }
 0x584   :  { %9992 = vmatmul.mubr.msk.f32.gmra.mxu1 %vm2283_vm2, %v2274_v55  ;;  %v2606_v55 = vpop.trf.xlu0 }
 0x586   :  { %2988 = vrot.lane.b32.xlu0 %v11093_v13, %s10865_s0 }
 0x58a   :  { %3164 = vrot.lane.b32.xlu0 %v11114_v36, %s10865_s0 }
 0x58b   :  { %3564 = vrot.lane.b32.xlu1 %v3531_v3, %s10864_s9  ;;  %v3642_v3 = vmul.f32 %v11744_v35, %v11205_v6 }
 0x58e   :  { %3162 = vrot.lane.b32.xlu0 %v11101_v21, %s10865_s0 }
 0x58f   :  { %3660 = vrot.lane.b32.xlu1 %v3628_v54, %s10865_s0  ;;  %v11810_v54 = vpop.permute.xlu1 %3075 }
 0x592   :  { %3338 = vrot.lane.b32.xlu0 %v11157_v19, %s10865_s0 }
 0x593   :  { %3662 = vrot.lane.b32.xlu1 %v3629_v9, %s10865_s0  ;;  %v2607_v9 = vpop.trf.xlu0 }
 0x596   :  { %3336 = vrot.lane.b32.xlu0 %v11137_v62, %s10865_s0 }
 0x597   :  { %3570 = vrot.lane.b32.xlu1 %v3534_v63, %s10864_s9  ;;  %v11813_v63 = vpop.permute.xlu1 %3425 }
 0x59a   :  { %3077 = vrot.lane.b32.xlu0 %v13768_v42, %s10865_s0 }
 0x59b   :  { %3668 = vrot.lane.b32.xlu1 %v3632_v38, %s10865_s0  ;;  %v2638_v38 = vpop.trf.xlu0 }
 0x59e   :  { %3251 = vrot.lane.b32.xlu0 %v11179_v43, %s10865_s0 }
 0x59f   :  { %3578 = vrot.lane.b32.xlu1 %v3538_v31, %s10864_s9  ;;  %v2639_v31 = vpop.trf.xlu0 }
 0x5a2   :  { %3249 = vrot.lane.b32.xlu0 %v11133_v59, %s10865_s0 }
 0x5a3   :  { %3676 = vrot.lane.b32.xlu1 %v3636_v1, %s10865_s0 }
 0x5a6   :  { %3423 = vrot.lane.b32.xlu0 %v11205_v6, %s10865_s0 }
 0x5a7   :  { %3586 = vrot.lane.b32.xlu1 %v3542_v58, %s10864_s9 }
 0x5ab   :  { %3684 = vrot.lane.b32.xlu1 %v3640_v8, %s10865_s0 }
 0x5af   :  { %3566 = vrot.lane.b32.xlu1 %v3532_v49, %s10864_s9 }
 0x5b3   :  { %3664 = vrot.lane.b32.xlu1 %v3630_v44, %s10865_s0  ;;  %v3535_v44 = vmul.f32 %v11738_v20, %v11081_v2 }
 0x5b7   :  { %3574 = vrot.lane.b32.xlu1 %v3536_v33, %s10864_s9 }
 0x5bb   :  { %3672 = vrot.lane.b32.xlu1 %v3634_v61, %s10865_s0  ;;  %v3539_v61 = vmul.f32 %v11738_v20, %v11114_v36 }
 0x5bf   :  { %3582 = vrot.lane.b32.xlu1 %v3540_v57, %s10864_s9 }
 0x5c3   :  { %3680 = vrot.lane.b32.xlu1 %v3638_v11, %s10865_s0  ;;  %v3637_v11 = vmul.f32 %v11744_v35, %v11114_v36 }
 0x5c4   :  { %2718 = vxpose.xlu0.b32.start [1/2] (short) (narrow) %v11682_v25, 16 }
 0x5c7   :  { %3590 = vrot.lane.b32.xlu1 %v3544_v10, %s10864_s9 }
 0x5c8   :  { %2719 = vxpose.xlu0.b32.end [2/2] (short) (narrow) %v11693_v18, 16  ;;  %v3530_v18 = vmul.f32 %v11738_v20, %v11037_v32 }
 0x5c9   :  { %v2766_v1 = vpop.trf.xlu0 }
 0x5cb   :  { %3688 = vrot.lane.b32.xlu1 %v3642_v3, %s10865_s0  ;;  %v3641_v3 = vmul.f32 %v11744_v35, %v11157_v19 }
 0x5cd   :  { %v2767_v58 = vpop.trf.xlu0 }
 0x5d5   :  { %v2670_v25 = vpop.trf.xlu1 }
 0x5d6   :  { %10019 = vmatprep.mubr.msk.f32.mxu1 %vm184_vm0, %v2670_v25  ;;  %v3631_v25 = vmul.f32 %v11744_v35, %v11064_v50 }
 0x5ec   :  { %v2815_v8 = vpop.permute.xlu0 %2814 }
 0x5ed   :  { %9996 = vmatprep.subr.mxu0 %v2815_v8 }
 0x5ee   :  { %9997 = vmatpush3.msra.mxu0 %v2815_v8 }
 0x5ef   :  { %9999 = vmatmul.mubr.msk.f32.vlgmr.msra.gmra.mxu0 %vm184_vm0, %v11666_v34  ;;  %10001 = vmatprep.subr.mxu0 %v11672_v16 }
 0x5f0   :  { %10002 = vmatpush3.msra.mxu0 %v11672_v16  ;;  %10005 = vmatprep.mubr.msk.f32.mxu0 %vm184_vm0, %v2606_v55  ;;  %v2902_v49 = vpop.permute.xlu0 %2901  ;;  %v3633_v16 = vmul.f32 %v11744_v35, %v11081_v2  ;;  %v3543_v55 = vmul.f32 %v11738_v20, %v11157_v19 }
 0x5f1   :  { %3562 = vrot.lane.b32.xlu0 %v3530_v18, %s10864_s9  ;;  %10003 = vmatprep.subr.mxu0 %v2902_v49  ;;  %v3541_v18 = vmul.f32 %v11738_v20, %v11179_v43 }
 0x5f2   :  { %10004 = vmatpush3.msra.mxu0 %v2902_v49  ;;  %v3639_v49 = vmul.f32 %v11744_v35, %v11179_v43 }
 0x5f3   :  { %10006 = vmatmul.mubr.msk.f32.vlgmr.msra.gmra.mxu0 %vm184_vm0, %v2607_v9 }
 0x5f4   :  { %10012 = vmatprep.mubr.msk.f32.mxu0 %vm184_vm0, %v2638_v38  ;;  %v2991_v34 = vpop.permute.xlu0 %2990 }
 0x5f5   :  { %3572 = vrot.lane.b32.xlu0 %v3535_v44, %s10864_s9  ;;  %10008 = vmatprep.subr.mxu0 %v2991_v34  ;;  %v3545_v44 = vmul.f32 %v11738_v20, %v11218_v30 }
 0x5f6   :  { %10009 = vmatpush3.msra.mxu0 %v2991_v34  ;;  %v3643_v34 = vmul.f32 %v11744_v35, %v11218_v30 }
 0x5f8   :  { %v2989_v33 = vpop.permute.xlu0 %2988 }
 0x5f9   :  { %3670 = vrot.lane.b32.xlu0 %v3633_v16, %s10865_s0  ;;  %10010 = vmatprep.subr.mxu0 %v2989_v33 }
 0x5fa   :  { %10011 = vmatpush3.msra.mxu0 %v2989_v33 }
 0x5fb   :  { %10013 = vmatmul.mubr.msk.f32.vlgmr.msra.gmra.mxu0 %vm184_vm0, %v2639_v31  ;;  %v2671_v31 = vpop.trf.xlu1 }
 0x5fc   :  { %10026 = vmatprep.mubr.msk.f32.mxu0 %vm184_vm0, %v11668_v5  ;;  %v3165_v57 = vpop.permute.xlu0 %3164 }
 0x5fd   :  { %3580 = vrot.lane.b32.xlu0 %v3539_v61, %s10864_s9  ;;  %10022 = vmatprep.subr.mxu0 %v3165_v57 }
 0x5fe   :  { %10023 = vmatpush3.msra.mxu0 %v3165_v57 }
 0x600   :  { %v3163_v10 = vpop.permute.xlu0 %3162 }
 0x601   :  { %3678 = vrot.lane.b32.xlu0 %v3637_v11, %s10865_s0  ;;  %10024 = vmatprep.subr.mxu0 %v3163_v10 }
 0x602   :  { %10025 = vmatpush3.msra.mxu0 %v3163_v10 }
 0x603   :  { %10027 = vmatmul.mubr.msk.f32.vlgmr.msra.gmra.mxu0 %vm184_vm0, %v11670_v51  ;;  %v3533_v51 = vmul.f32 %v11738_v20, %v11064_v50 }
 0x604   :  { %10040 = vmatprep.mubr.msk.f32.mxu0 %vm184_vm0, %v2766_v1  ;;  %v3339_v5 = vpop.permute.xlu0 %3338 }
 0x605   :  { %3588 = vrot.lane.b32.xlu0 %v3543_v55, %s10864_s9  ;;  %10036 = vmatprep.subr.mxu0 %v3339_v5 }
 0x606   :  { %10037 = vmatpush3.msra.mxu0 %v3339_v5 }
 0x608   :  { %v3337_v9 = vpop.permute.xlu0 %3336 }
 0x609   :  { %3686 = vrot.lane.b32.xlu0 %v3641_v3, %s10865_s0  ;;  %10038 = vmatprep.subr.mxu0 %v3337_v9 }
 0x60a   :  { %10039 = vmatpush3.msra.mxu0 %v3337_v9 }
 0x60b   :  { %10041 = vmatmul.mubr.msk.f32.vlgmr.msra.gmra.mxu0 %vm184_vm0, %v2767_v58  ;;  %10050 = vmatprep.subr.bf16.mxu0 %v13767_v41  ;;  %v3537_v58 = vmul.f32 %v11738_v20, %v13768_v42 }
 0x60c   :  { %v3078_v38 = vpop.permute.xlu0 %3077  ;;  %10052 = vmatprep.mubr.msk.bf16.mxu0 %vm10863_vm1, %v13767_v41 }
 0x60d   :  { %3568 = vrot.lane.b32.xlu0 %v3533_v51, %s10864_s9  ;;  %10015 = vmatprep.subr.mxu1 %v3078_v38 }
 0x60e   :  { %10016 = vmatpush3.msra.mxu1 %v3078_v38 }
 0x60f   :  { %10017 = vmatprep.subr.mxu1 %v11810_v54 }
 0x610   :  { %10018 = vmatpush3.msra.mxu1 %v11810_v54  ;;  %v3252_v1 = vpop.permute.xlu0 %3251  ;;  %v3635_v54 = vmul.f32 %v11744_v35, %v13768_v42 }
 0x611   :  { %3666 = vrot.lane.b32.xlu0 %v3631_v25, %s10865_s0  ;;  %10020 = vmatmul.mubr.msk.f32.vlgmr.msra.gmra.mxu1 %vm184_vm0, %v2671_v31 }
 0x612   :  { %10029 = vmatprep.subr.mxu1 %v3252_v1 }
 0x613   :  { %10030 = vmatpush3.msra.mxu1 %v3252_v1 }
 0x614   :  { %v3250_v8 = vpop.permute.xlu0 %3249 }
 0x615   :  { %3576 = vrot.lane.b32.xlu0 %v3537_v58, %s10864_s9  ;;  %10031 = vmatprep.subr.mxu1 %v3250_v8 }
 0x616   :  { %10032 = vmatpush3.msra.mxu1 %v3250_v8 }
 0x617   :  { %10043 = vmatprep.subr.mxu1 %v11813_v63 }
 0x618   :  { %v3424_v25 = vpop.permute.xlu0 %3423 }
 0x619   :  { %3674 = vrot.lane.b32.xlu0 %v3635_v54, %s10865_s0 }
 0x61d   :  { %3584 = vrot.lane.b32.xlu0 %v3541_v18, %s10864_s9 }
 0x621   :  { %3682 = vrot.lane.b32.xlu0 %v3639_v49, %s10865_s0 }
 0x625   :  { %3592 = vrot.lane.b32.xlu0 %v3545_v44, %s10864_s9  ;;  %s9316_s9 = sld [smem:[#allocation3 + $0x1]] }
 0x628   :  { %v9972_v16 = vpop.f32.mrf.mxu1 }
 0x629   :  { %v2478_v33 = vadd.f32 %v9972_v16, %v11628_v48  ;;  %3690 = vrot.lane.b32.xlu0 %v3643_v34, %s10865_s0 }
 0x62a   :  { %v2398_v61 = vpop.f32.mrf.mxu1 }
 0x62b   :  { %2495 = vst.msk [vmem:[#allocation2 + $0x8] sm:$0xff] %vm2493_vm3, %v2478_v33  ;;  %v2477_v57 = vadd.f32 %v2398_v61, %v11621_v22 }
 0x62c   :  { %v9975_v11 = vpop.f32.mrf.mxu1 }
 0x62d   :  { %2494 = vst.msk [vmem:[#allocation2] sm:$0xff] %vm2493_vm3, %v2477_v57  ;;  %v2480_v20 = vadd.f32 %v9975_v11, %v11680_v28 }
 0x62e   :  { %v2408_v10 = vpop.f32.mrf.mxu1 }
 0x62f   :  { %2497 = vst.msk [vmem:[#allocation2 + $0x18] sm:$0xff] %vm2493_vm3, %v2480_v20  ;;  %v2479_v35 = vadd.f32 %v2408_v10, %v11676_v47  ;;  %v11922_v10 = vstv %s9316_s9 }
 0x630   :  { %v9978_v55 = vpop.f32.mrf.mxu1 }
 0x631   :  { %2496 = vst.msk [vmem:[#allocation2 + $0x10] sm:$0xff] %vm2493_vm3, %v2479_v35  ;;  %v2482_v48 = vadd.f32 %v9978_v55, %v11645_v0 }
 0x632   :  { %v2418_v5 = vpop.f32.mrf.mxu1 }
 0x633   :  { %2499 = vst.msk [vmem:[#allocation2 + $0x28] sm:$0xff] %vm2493_vm3, %v2482_v48  ;;  %v2481_v22 = vadd.f32 %v2418_v5, %v11638_v23 }
 0x634   :  { %v9981_v3 = vpop.f32.mrf.mxu1 }
 0x635   :  { %2498 = vst.msk [vmem:[#allocation2 + $0x20] sm:$0xff] %vm2493_vm3, %v2481_v22  ;;  %v2484_v28 = vadd.f32 %v9981_v3, %v11699_v24 }
 0x636   :  { %v2428_v9 = vpop.f32.mrf.mxu1 }
 0x637   :  { %2501 = vst.msk [vmem:[#allocation2 + $0x38] sm:$0xff] %vm2493_vm3, %v2484_v28  ;;  %v2483_v47 = vadd.f32 %v2428_v9, %v11690_v56  ;;  %v11926_v9 = vstv %s9319_s8  ;;  %s9377_s8 = sld [smem:[#allocation6 + $0x2]] }
 0x638   :  { %v9984_v51 = vpop.f32.mrf.mxu1 }
 0x639   :  { %2500 = vst.msk [vmem:[#allocation2 + $0x30] sm:$0xff] %vm2493_vm3, %v2483_v47  ;;  %v2486_v0 = vadd.f32 %v9984_v51, %v11664_v14 }
 0x63a   :  { %v2438_v38 = vpop.f32.mrf.mxu1 }
 0x63b   :  { %2503 = vst.msk [vmem:[#allocation2 + $0x48] sm:$0xff] %vm2493_vm3, %v2486_v0  ;;  %v2485_v23 = vadd.f32 %v2438_v38, %v11662_v4  ;;  %v2798_v4 = vpop.trf.xlu1 }
 0x63c   :  { %v9987_v31 = vpop.f32.mrf.mxu1 }
 0x63d   :  { %2502 = vst.msk [vmem:[#allocation2 + $0x40] sm:$0xff] %vm2493_vm3, %v2485_v23  ;;  %v2488_v24 = vadd.f32 %v9987_v31, %v11709_v27 }
 0x63e   :  { %v2448_v1 = vpop.f32.mrf.mxu1 }
 0x63f   :  { %2505 = vst.msk [vmem:[#allocation2 + $0x58] sm:$0xff] %vm2493_vm3, %v2488_v24  ;;  %v2487_v56 = vadd.f32 %v2448_v1, %v11704_v12  ;;  %v2799_v34 = vpop.trf.xlu1 }
 0x640   :  { %v9990_v58 = vpop.f32.mrf.mxu1  ;;  %v2734_v8 = vpop.trf.xlu0 }
 0x641   :  { %2504 = vst.msk [vmem:[#allocation2 + $0x50] sm:$0xff] %vm2493_vm3, %v2487_v56  ;;  %v2490_v14 = vadd.f32 %v9990_v58, %v11678_v17  ;;  %10033 = vmatprep.mubr.msk.f32.mxu1 %vm184_vm0, %v2734_v8 }
 0x642   :  { %v2458_v54 = vpop.f32.mrf.mxu1 }
 0x643   :  { %2507 = vst.msk [vmem:[#allocation2 + $0x68] sm:$0xff] %vm2493_vm3, %v2490_v14  ;;  %v2489_v18 = vadd.f32 %v2458_v54, %v11674_v52  ;;  %v3565_v52 = vpop.permute.xlu1 %3564 }
 0x644   :  { %v9993_v27 = vpop.f32.mrf.mxu1  ;;  %v2735_v49 = vpop.trf.xlu0 }
 0x645   :  { %2506 = vst.msk [vmem:[#allocation2 + $0x60] sm:$0xff] %vm2493_vm3, %v2489_v18  ;;  %v2492_v12 = vadd.f32 %v9993_v27, %v11722_v37  ;;  %10034 = vmatmul.mubr.msk.f32.vlgmr.msra.gmra.mxu1 %vm184_vm0, %v2735_v49 }
 0x646   :  { %10044 = vmatpush3.msra.mxu1 %v11813_v63  ;;  %v2468_v44 = vpop.f32.mrf.mxu1  ;;  %10047 = vmatprep.mubr.msk.f32.mxu1 %vm184_vm0, %v2798_v4 }
 0x647   :  { %2509 = vst.msk [vmem:[#allocation2 + $0x78] sm:$0xff] %vm2493_vm3, %v2492_v12  ;;  %v2491_v17 = vadd.f32 %v2468_v44, %v11716_v29  ;;  %10045 = vmatprep.subr.mxu1 %v3424_v25  ;;  %v3661_v37 = vpop.permute.xlu1 %3660 }
 0x648   :  { %10046 = vmatpush3.msra.mxu1 %v3424_v25 }
 0x649   :  { %2508 = vst.msk [vmem:[#allocation2 + $0x70] sm:$0xff] %vm2493_vm3, %v2491_v17  ;;  %10048 = vmatmul.mubr.msk.f32.vlgmr.msra.gmra.mxu1 %vm184_vm0, %v2799_v34  ;;  %10056 = vmatprep.subr.bf16.mxu1 %v13767_v41 }
 0x64a   :  { %10058 = vmatprep.mubr.msk.bf16.mxu1 %vm10863_vm1, %v13767_v41 }
 0x64b   :  { %v3663_v63 = vpop.permute.xlu1 %3662 }
 0x64f   :  { %v3571_v33 = vpop.permute.xlu1 %3570 }
 0x653   :  { %v3669_v57 = vpop.permute.xlu1 %3668 }
 0x657   :  { %v3579_v11 = vpop.permute.xlu1 %3578 }
 0x65b   :  { %v3677_v55 = vpop.permute.xlu1 %3676 }
 0x65f   :  { %v3587_v38 = vpop.permute.xlu1 %3586 }
 0x663   :  { %v3563_v16 = vpop.permute.xlu0 %3562  ;;  %v3685_v14 = vpop.permute.xlu1 %3684 }
 0x667   :  { %v3573_v61 = vpop.permute.xlu0 %3572  ;;  %v3567_v17 = vpop.permute.xlu1 %3566 }
 0x66b   :  { %v3671_v29 = vpop.permute.xlu0 %3670 }
 0x66f   :  { %v3581_v20 = vpop.permute.xlu0 %3580 }
 0x673   :  { %v3679_v5 = vpop.permute.xlu0 %3678 }
 0x677   :  { %v3589_v31 = vpop.permute.xlu0 %3588 }
 0x67b   :  { %v3687_v54 = vpop.permute.xlu0 %3686 }
 0x6af   :  { %v10000_v35 = vpop.f32.mrf.mxu0 }
 0x6b0   :  { %v3513_v48 = vmul.f32 %v10000_v35, %v11922_v10 }
 0x6b1   :  { %v2892_v22 = vpop.f32.mrf.mxu0 }
 0x6b2   :  { %v3611_v3 = vadd.f32 %v3565_v52, %v3513_v48  ;;  %v3512_v28 = vmul.f32 %v11922_v10, %v2892_v22 }
 0x6b3   :  { %v10007_v0 = vpop.f32.mrf.mxu0 }
 0x6b4   :  { %v3709_v47 = vadd.f32 %v3663_v63, %v3611_v3  ;;  %v3610_v51 = vadd.f32 %v3563_v16, %v3512_v28 }
 0x6b5   :  { %v2979_v56 = vpop.f32.mrf.mxu0 }
 0x6b6   :  { %v11929_v23 = vadd.f32 %v11926_v9, %v3709_v47  ;;  %v3708_v25 = vadd.f32 %v3661_v37, %v3610_v51  ;;  %v3514_v44 = vmul.f32 %v11922_v10, %v2979_v56  ;;  %v3569_v37 = vpop.permute.xlu0 %3568 }
 0x6b8   :  { %v3745_v24 = vsel %vm184_vm0, %v11929_v23, -inf  ;;  %v11934_v1 = vadd.f32 %v11926_v9, %v3708_v25  ;;  %v3612_v48 = vadd.f32 %v3567_v17, %v3514_v44 }
 0x6b9   :  { %3746 = vmax.xlane.f32.xlu0 %v3745_v24 }
 0x6ba   :  { %v3742_v58 = vsel %vm184_vm0, %v11934_v1, -inf  ;;  %v3667_v25 = vpop.permute.xlu0 %3666 }
 0x6bb   :  { %v10014_v8 = vpop.f32.mrf.mxu0  ;;  %3743 = vmax.xlane.f32.xlu1 %v3742_v58 }
 0x6bc   :  { %v3517_v4 = vmul.f32 %v10014_v8, %v11922_v10 }
 0x6bd   :  { %v3066_v18 = vpop.f32.mrf.mxu0 }
 0x6be   :  { %v3615_v27 = vadd.f32 %v3573_v61, %v3517_v4  ;;  %v3516_v49 = vmul.f32 %v11922_v10, %v3066_v18  ;;  %v3577_v44 = vpop.permute.xlu0 %3576 }
 0x6c0   :  { %v3614_v12 = vadd.f32 %v3571_v33, %v3516_v49  ;;  %v3713_v34 = vadd.f32 %v3671_v29, %v3615_v27  ;;  %v3515_v29 = vmul.f32 %v10007_v0, %v11922_v10 }
 0x6c2   :  { %v3712_v52 = vadd.f32 %v3669_v57, %v3614_v12  ;;  %v11949_v28 = vadd.f32 %v11926_v9, %v3713_v34  ;;  %v3665_v57 = vpop.permute.xlu1 %3664  ;;  %v3613_v4 = vadd.f32 %v3569_v37, %v3515_v29 }
 0x6c3   :  { %v10028_v63 = vpop.f32.mrf.mxu0  ;;  %v3710_v24 = vadd.f32 %v3665_v57, %v3612_v48 }
 0x6c4   :  { %v3521_v16 = vmul.f32 %v10028_v63, %v11922_v10  ;;  %v11943_v35 = vadd.f32 %v11926_v9, %v3712_v52  ;;  %v3711_v17 = vadd.f32 %v3667_v25, %v3613_v4 }
 0x6c5   :  { %v3240_v22 = vpop.f32.mrf.mxu0 }
 0x6c6   :  { %v3619_v3 = vadd.f32 %v3581_v20, %v3521_v16  ;;  %v3520_v61 = vmul.f32 %v11922_v10, %v3240_v22  ;;  %v3754_v33 = vsel %vm184_vm0, %v11943_v35, -inf  ;;  %v3757_v20 = vsel %vm184_vm0, %v11949_v28, -inf }
 0x6c7   :  { %3755 = vmax.xlane.f32.xlu0 %v3754_v33 }
 0x6c8   :  { %v3717_v47 = vadd.f32 %v3679_v5, %v3619_v3  ;;  %v3618_v51 = vadd.f32 %v3579_v11, %v3520_v61  ;;  %v11962_v11 = vadd.f32 %v11926_v9, %v3710_v24 }
 0x6ca   :  { %v3716_v56 = vadd.f32 %v3677_v55, %v3618_v51  ;;  %v11955_v58 = vadd.f32 %v11926_v9, %v3717_v47 }
 0x6cb   :  { %v10042_v8 = vpop.f32.mrf.mxu0  ;;  %3758 = vmax.xlane.f32.xlu0 %v3757_v20 }
 0x6cc   :  { %v3525_v18 = vmul.f32 %v10042_v8, %v11922_v10  ;;  %v11959_v27 = vadd.f32 %v11926_v9, %v3716_v56  ;;  %v3769_v12 = vsel %vm184_vm0, %v11955_v58, -inf }
 0x6cd   :  { %v3414_v0 = vpop.f32.mrf.mxu0 }
 0x6ce   :  { %v3623_v5 = vadd.f32 %v3589_v31, %v3525_v18  ;;  %v3524_v55 = vmul.f32 %v11922_v10, %v3414_v0  ;;  %v3766_v49 = vsel %vm184_vm0, %v11959_v27, -inf  ;;  %v3748_v31 = vsel %vm184_vm0, %v11962_v11, -inf }
 0x6cf   :  { %3767 = vmax.xlane.f32.xlu1 %v3766_v49  ;;  %3770 = vmax.xlane.f32.xlu0 %v3769_v12 }
 0x6d0   :  { %v3721_v34 = vadd.f32 %v3687_v54, %v3623_v5  ;;  %v3622_v52 = vadd.f32 %v3587_v38, %v3524_v55  ;;  %v11981_v38 = vadd.f32 %v11926_v9, %v3711_v17  ;;  %v3675_v54 = vpop.permute.xlu0 %3674  ;;  %v3575_v5 = vpop.permute.xlu1 %3574 }
 0x6d1   :  { %v10021_v37 = vpop.f32.mrf.mxu1 }
 0x6d2   :  { %v3519_v63 = vmul.f32 %v10021_v37, %v11922_v10  ;;  %v11973_v16 = vadd.f32 %v11926_v9, %v3721_v34  ;;  %v3720_v48 = vadd.f32 %v3685_v14, %v3622_v52  ;;  %v3751_v14 = vsel %vm184_vm0, %v11981_v38, -inf }
 0x6d3   :  { %3749 = vmax.xlane.f32.xlu1 %v3748_v31  ;;  %v3153_v25 = vpop.f32.mrf.mxu1 }
 0x6d4   :  { %v3617_v22 = vadd.f32 %v3577_v44, %v3519_v63  ;;  %v3781_v3 = vsel %vm184_vm0, %v11973_v16, -inf  ;;  %v11978_v61 = vadd.f32 %v11926_v9, %v3720_v48  ;;  %v3585_v51 = vpop.permute.xlu0 %3584  ;;  %v3673_v55 = vpop.permute.xlu1 %3672 }
 0x6d5   :  { %3782 = vmax.xlane.f32.xlu0 %v3781_v3 }
 0x6d6   :  { %v3715_v33 = vadd.f32 %v3675_v54, %v3617_v22  ;;  %v3778_v57 = vsel %vm184_vm0, %v11978_v61, -inf }
 0x6d7   :  { %3779 = vmax.xlane.f32.xlu1 %v3778_v57 }
 0x6d8   :  { %v11988_v29 = vadd.f32 %v11926_v9, %v3715_v33  ;;  %v3683_v8 = vpop.permute.xlu0 %3682  ;;  %v3583_v49 = vpop.permute.xlu1 %3582 }
 0x6d9   :  { %3752 = vmax.xlane.f32.xlu0 %v3751_v14  ;;  %v3518_v14 = vmul.f32 %v11922_v10, %v3153_v25 }
 0x6da   :  { %v3763_v47 = vsel %vm184_vm0, %v11988_v29, -inf }
 0x6dc   :  { %v3681_v12 = vpop.permute.xlu1 %3680  ;;  %v3593_v44 = vpop.permute.xlu0 %3592 }
 0x6dd   :  { %3764 = vmax.xlane.f32.xlu0 %v3763_v47 }
 0x6e0   :  { %v11998_v17 = vpop.permute.xlu1 %3590  ;;  %v3691_v34 = vpop.permute.xlu0 %3690 }
 0x6e4   :  { %v12000_v52 = vpop.permute.xlu1 %3688 }
 0x705   :  { %v10035_v24 = vpop.f32.mrf.mxu1 }
 0x706   :  { %v3523_v56 = vmul.f32 %v10035_v24, %v11922_v10 }
 0x707   :  { %v3327_v37 = vpop.f32.mrf.mxu1 }
 0x708   :  { %v3621_v20 = vadd.f32 %v3585_v51, %v3523_v56  ;;  %v3616_v51 = vadd.f32 %v3575_v5, %v3518_v14  ;;  %v3522_v5 = vmul.f32 %v11922_v10, %v3327_v37 }
 0x709   :  { %v10049_v54 = vpop.f32.mrf.mxu1 }
 0x70a   :  { %v3719_v4 = vadd.f32 %v3683_v8, %v3621_v20  ;;  %v3527_v57 = vmul.f32 %v10049_v54, %v11922_v10  ;;  %v3620_v37 = vadd.f32 %v3583_v49, %v3522_v5 }
 0x70c   :  { %v11994_v18 = vadd.f32 %v11926_v9, %v3719_v4  ;;  %v3625_v47 = vadd.f32 %v3593_v44, %v3527_v57 }
 0x70e   :  { %v3775_v0 = vsel %vm184_vm0, %v11994_v18, -inf  ;;  %v3723_v56 = vadd.f32 %v3691_v34, %v3625_v47 }
 0x70f   :  { %3776 = vmax.xlane.f32.xlu0 %v3775_v0 }
 0x742   :  { %v3747_v63 = vpop.xlane.xlu0 %3746 }
 0x743   :  { %v3791_v31 = vsub.f32 %v11929_v23, %v3747_v63  ;;  %v3714_v23 = vadd.f32 %v3673_v55, %v3616_v51  ;;  %v3718_v51 = vadd.f32 %v3681_v12, %v3620_v37 }
 0x744   :  { %v3744_v48 = vpop.xlane.xlu1 %3743 }
 0x745   :  { %v3808_v22 = vmul.f32 1.442695, %v3791_v31  ;;  %v3790_v3 = vsub.f32 %v11934_v1, %v3744_v48  ;;  %v12013_v31 = vadd.f32 %v11926_v9, %v3723_v56  ;;  %v12021_v44 = vadd.f32 %v11926_v9, %v3714_v23 }
 0x747   :  { %10579 = vpow2.f32 %v3808_v22  ;;  %v3806_v33 = vmul.f32 1.442695, %v3790_v3  ;;  %v3787_v3 = vsel %vm184_vm0, %v12013_v31, -inf  ;;  %v3760_v57 = vsel %vm184_vm0, %v12021_v44, -inf }
 0x749   :  { %10581 = vpow2.f32 %v3806_v33 }
 0x750   :  { %v3756_v24 = vpop.xlane.xlu0 %3755 }
 0x751   :  { %v3794_v20 = vsub.f32 %v11943_v35, %v3756_v24 }
 0x753   :  { %v3814_v8 = vmul.f32 1.442695, %v3794_v20 }
 0x754   :  { %v12007_v4 = vpop.eup %10579  ;;  %v3759_v0 = vpop.xlane.xlu0 %3758 }
 0x755   :  { %10583 = vpow2.f32 %v3814_v8  ;;  %v3795_v1 = vsub.f32 %v11949_v28, %v3759_v0  ;;  %v3841_v63 = vsel %vm184_vm0, %v12007_v4, 0.0  ;;  %v12035_v0 = vadd.f32 %v11926_v9, %v3718_v51  ;;  %v3501_v51 = vpop.f32.mrf.mxu1 }
 0x756   :  { %v12015_v25 = vpop.eup %10581  ;;  %3842 = vadd.xlane.f32.xlu0 %v3841_v63 }
 0x757   :  { %v3816_v35 = vmul.f32 1.442695, %v3795_v1  ;;  %v3838_v55 = vsel %vm184_vm0, %v12015_v25, 0.0 }
 0x758   :  { %3839 = vadd.xlane.f32.xlu1 %v3838_v55  ;;  %v3768_v28 = vpop.xlane.xlu1 %3767  ;;  %v3771_v34 = vpop.xlane.xlu0 %3770 }
 0x759   :  { %10585 = vpow2.f32 %v3816_v35  ;;  %v3798_v48 = vsub.f32 %v11959_v27, %v3768_v28  ;;  %v3799_v22 = vsub.f32 %v11955_v58, %v3771_v34 }
 0x75a   :  { %3788 = vmax.xlane.f32.xlu0 %v3787_v3 }
 0x75b   :  { %v3822_v54 = vmul.f32 1.442695, %v3798_v48  ;;  %v3824_v33 = vmul.f32 1.442695, %v3799_v22 }
 0x75c   :  { %3761 = vmax.xlane.f32.xlu1 %v3760_v57  ;;  %v3750_v14 = vpop.xlane.xlu1 %3749 }
 0x75d   :  { %10587 = vpow2.f32 %v3822_v54  ;;  %v3792_v47 = vsub.f32 %v11962_v11, %v3750_v14  ;;  %v13769_v14 = vld [vmem:[#allocation18_spill] sm:$0xff] }
 0x75e   :  { %10589 = vpow2.f32 %v3824_v33  ;;  %v3783_v27 = vpop.xlane.xlu0 %3782 }
 0x75f   :  { %v3803_v58 = vsub.f32 %v11973_v16, %v3783_v27  ;;  %v3810_v24 = vmul.f32 1.442695, %v3792_v47 }
 0x760   :  { %v3780_v56 = vpop.xlane.xlu1 %3779 }
 0x761   :  { %v3832_v20 = vmul.f32 1.442695, %v3803_v58  ;;  %v3802_v49 = vsub.f32 %v11978_v61, %v3780_v56  ;;  %v3772_v61 = vsel %vm184_vm0, %v12035_v0, -inf  ;;  %v3526_v58 = vmul.f32 %v11922_v10, %v3501_v51 }
 0x762   :  { %v12032_v8 = vpop.eup %10583  ;;  %v3753_v23 = vpop.xlane.xlu0 %3752 }
 0x763   :  { %10591 = vpow2.f32 %v3832_v20  ;;  %v3830_v1 = vmul.f32 1.442695, %v3802_v49  ;;  %v3793_v11 = vsub.f32 %v11981_v38, %v3753_v23  ;;  %v3850_v12 = vsel %vm184_vm0, %v12032_v8, 0.0 }
 0x764   :  { %10593 = vpow2.f32 %v3810_v24  ;;  %3851 = vadd.xlane.f32.xlu1 %v3850_v12  ;;  %v3624_v56 = vadd.f32 %v11998_v17, %v3526_v58 }
 0x765   :  { %10595 = vpow2.f32 %v3830_v1  ;;  %v3812_v16 = vmul.f32 1.442695, %v3793_v11 }
 0x766   :  { %v12040_v63 = vpop.eup %10585  ;;  %v3765_v47 = vpop.xlane.xlu0 %3764  ;;  %v3722_v20 = vadd.f32 %v12000_v52, %v3624_v56 }
 0x767   :  { %v3853_v5 = vsel %vm184_vm0, %v12040_v63, 0.0  ;;  %10597 = vpow2.f32 %v3812_v16  ;;  %v3797_v27 = vsub.f32 %v11988_v29, %v3765_v47 }
 0x768   :  { %3773 = vmax.xlane.f32.xlu1 %v3772_v61  ;;  %3854 = vadd.xlane.f32.xlu0 %v3853_v5  ;;  %v12079_v49 = vadd.f32 %v11926_v9, %v3722_v20 }
 0x769   :  { %v3820_v24 = vmul.f32 1.442695, %v3797_v27 }
 0x76a   :  { %v12046_v35 = vpop.eup %10587  ;;  %v3784_v23 = vsel %vm184_vm0, %v12079_v49, -inf }
 0x76b   :  { %v12048_v38 = vpop.eup %10589  ;;  %v3862_v55 = vsel %vm184_vm0, %v12046_v35, 0.0  ;;  %10599 = vpow2.f32 %v3820_v24 }
 0x76c   :  { %3863 = vadd.xlane.f32.xlu1 %v3862_v55  ;;  %v3865_v28 = vsel %vm184_vm0, %v12048_v38, 0.0 }
 0x76d   :  { %3866 = vadd.xlane.f32.xlu0 %v3865_v28 }
 0x770   :  { %v12054_v34 = vpop.eup %10591 }
 0x771   :  { %v12056_v48 = vpop.eup %10593  ;;  %v3877_v22 = vsel %vm184_vm0, %v12054_v34, 0.0 }
 0x772   :  { %v12060_v3 = vpop.eup %10595  ;;  %3878 = vadd.xlane.f32.xlu0 %v3877_v22  ;;  %v3844_v54 = vsel %vm184_vm0, %v12056_v48, 0.0 }
 0x773   :  { %v3874_v37 = vsel %vm184_vm0, %v12060_v3, 0.0 }
 0x774   :  { %3875 = vadd.xlane.f32.xlu1 %v3874_v37  ;;  %v12066_v33 = vpop.eup %10597 }
 0x775   :  { %v3847_v57 = vsel %vm184_vm0, %v12066_v33, 0.0 }
 0x776   :  { %3845 = vadd.xlane.f32.xlu0 %v3844_v54 }
 0x778   :  { %v12083_v1 = vpop.eup %10599 }
 0x779   :  { %v3859_v29 = vsel %vm184_vm0, %v12083_v1, 0.0 }
 0x77a   :  { %3848 = vadd.xlane.f32.xlu0 %v3847_v57 }
 0x785   :  { %3927 = vrot.lane.b32.xlu1 %v13769_v14, %s10866_s30 }
 0x790   :  { %4023 = vrot.lane.b32.xlu0 %v11181_v45, %s10866_s30 }
 0x798   :  { %v3777_v17 = vpop.xlane.xlu0 %3776 }
 0x799   :  { %v3801_v5 = vsub.f32 %v11994_v18, %v3777_v17 }
 0x79b   :  { %v3828_v37 = vmul.f32 1.442695, %v3801_v5 }
 0x7a9   :  { %3785 = vmax.xlane.f32.xlu1 %v3784_v23 }
 0x7af   :  { %3860 = vadd.xlane.f32.xlu0 %v3859_v29 }
 0x7ba   :  { %4119 = vrot.lane.b32.xlu1 %v11530_v26, %s10866_s30 }
 0x7df   :  { %v3843_v9 = vpop.xlane.xlu0 %3842 }
 0x7e1   :  { %v3840_v10 = vpop.xlane.xlu1 %3839 }
 0x7e3   :  { %v3789_v16 = vpop.xlane.xlu0 %3788 }
 0x7e5   :  { %v3762_v11 = vpop.xlane.xlu1 %3761 }
 0x7e6   :  { %v3796_v52 = vsub.f32 %v12021_v44, %v3762_v11 }
 0x7e8   :  { %v3818_v12 = vmul.f32 1.442695, %v3796_v52 }
 0x7ea   :  { %10601 = vpow2.f32 %v3818_v12 }
 0x7eb   :  { %10603 = vrcp.f32 %v3840_v10 }
 0x7ec   :  { %10605 = vrcp.f32 %v3843_v9 }
 0x7ed   :  { %v3852_v61 = vpop.xlane.xlu1 %3851 }
 0x7f1   :  { %v3774_v55 = vpop.xlane.xlu1 %3773  ;;  %v3855_v28 = vpop.xlane.xlu0 %3854 }
 0x7f2   :  { %v3800_v22 = vsub.f32 %v12035_v0, %v3774_v55 }
 0x7f4   :  { %v3826_v54 = vmul.f32 1.442695, %v3800_v22 }
 0x7f5   :  { %v3864_v51 = vpop.xlane.xlu1 %3863 }
 0x7f6   :  { %10607 = vpow2.f32 %v3826_v54  ;;  %v3867_v44 = vpop.xlane.xlu0 %3866 }
 0x7f7   :  { %v12092_v57 = vpop.eup %10601  ;;  %10609 = vrcp.f32 %v3855_v28 }
 0x7f8   :  { %10611 = vpow2.f32 %v3828_v37  ;;  %v3856_v47 = vsel %vm184_vm0, %v12092_v57, 0.0  ;;  %v10604_v27 = vpop.eup %10603 }
 0x7f9   :  { %10613 = vrcp.f32 %v3852_v61  ;;  %3857 = vadd.xlane.f32.xlu1 %v3856_v47  ;;  %v10606_v24 = vpop.eup %10605  ;;  %v3902_v56 = vmul.f32 %v10604_v27, %v12015_v25 }
 0x7fa   :  { %v3903_v23 = vmul.f32 %v10606_v24, %v12007_v4 }
 0x7fb   :  { %v12096_v18 = vpop.xlane.xlu0 %3878 }
 0x7fc   :  { %v12104_v17 = vpack.c.bf16 %v3903_v23, %v3902_v56 }
 0x7fd   :  { %v3876_v58 = vpop.xlane.xlu1 %3875 }
 0x7ff   :  { %v12098_v0 = vpop.xlane.xlu0 %3845 }
 0x801   :  { %v3928_v20 = vpop.permute.xlu1 %3927 }
 0x802   :  { %10051 = vmatpush3.bf16.msra.mxu0 %v3928_v20 }
 0x803   :  { %v12102_v29 = vpop.eup %10607  ;;  %v3849_v10 = vpop.xlane.xlu0 %3848  ;;  %10062 = vmatprep.subr.bf16.mxu0 %v13767_v41 }
 0x804   :  { %v10610_v11 = vpop.eup %10609  ;;  %v3868_v52 = vsel %vm184_vm0, %v12102_v29, 0.0 }
 0x805   :  { %v12109_v9 = vpop.eup %10611  ;;  %3869 = vadd.xlane.f32.xlu0 %v3868_v52  ;;  %10053 = vmatmul.mubr.msk.bf16.vlgmr.msra.gmra.mxu0 %vm184_vm0, %v12104_v17  ;;  %v3907_v12 = vmul.f32 %v10610_v11, %v12040_v63  ;;  %v3805_v63 = vsub.f32 %v12013_v31, %v3789_v16 }
 0x806   :  { %v10614_v25 = vpop.eup %10613  ;;  %10064 = vmatprep.mubr.msk.bf16.mxu0 %vm10863_vm1, %v13767_v41  ;;  %v3871_v61 = vsel %vm184_vm0, %v12109_v9, 0.0 }
 0x807   :  { %v4024_v4 = vpop.permute.xlu0 %4023  ;;  %v3906_v5 = vmul.f32 %v10614_v25, %v12032_v8  ;;  %v3836_v28 = vmul.f32 1.442695, %v3805_v63 }
 0x808   :  { %10063 = vmatpush3.bf16.msra.mxu0 %v4024_v4 }
 0x809   :  { %3872 = vadd.xlane.f32.xlu0 %v3871_v61  ;;  %10074 = vmatprep.subr.bf16.mxu0 %v13767_v41  ;;  %v12122_v55 = vpack.c.bf16 %v3907_v12, %v3906_v5  ;;  %10615 = vpow2.f32 %v3836_v28 }
 0x80a   :  { %4215 = vrot.lane.b32.xlu1 %v11565_v53, %s10866_s30  ;;  %10617 = vrcp.f32 %v3864_v51 }
 0x80b   :  { %10619 = vrcp.f32 %v3867_v44 }
 0x80d   :  { %10065 = vmatmul.mubr.msk.bf16.vlgmr.msra.gmra.mxu0 %vm184_vm0, %v12122_v55 }
 0x80e   :  { %10076 = vmatprep.mubr.msk.bf16.mxu0 %vm10863_vm1, %v13767_v41 }
 0x816   :  { %v12129_v8 = vpop.eup %10615 }
 0x817   :  { %v3883_v22 = vsel %vm184_vm0, %v12129_v8, 0.0  ;;  %v10618_v37 = vpop.eup %10617 }
 0x818   :  { %v10620_v54 = vpop.eup %10619  ;;  %v3910_v24 = vmul.f32 %v10618_v37, %v12046_v35 }
 0x819   :  { %v3911_v56 = vmul.f32 %v10620_v54, %v12048_v38  ;;  %v13770_v38 = vld [vmem:[#allocation19_spill] sm:$0xff] }
 0x81b   :  { %v3922_v44 = vpack.c.bf16 %v3911_v56, %v3910_v24 }
 0x82e   :  { %3884 = vadd.xlane.f32.xlu1 %v3883_v22 }
 0x832   :  { %v3786_v47 = vpop.xlane.xlu1 %3785 }
 0x833   :  { %v3804_v27 = vsub.f32 %v12079_v49, %v3786_v47 }
 0x835   :  { %v3834_v31 = vmul.f32 1.442695, %v3804_v27 }
 0x836   :  { %v4120_v16 = vpop.permute.xlu1 %4119 }
 0x837   :  { %10621 = vpow2.f32 %v3834_v31  ;;  %10075 = vmatpush3.bf16.msra.mxu0 %v4120_v16 }
 0x838   :  { %10086 = vmatprep.subr.bf16.mxu0 %v13767_v41  ;;  %10623 = vrcp.f32 %v3876_v58  ;;  %v3861_v23 = vpop.xlane.xlu0 %3860 }
 0x839   :  { %10625 = vrcp.f32 %v12096_v18 }
 0x83a   :  { %10077 = vmatmul.mubr.msk.bf16.vlgmr.msra.gmra.mxu0 %vm184_vm0, %v3922_v44  ;;  %10627 = vrcp.f32 %v3849_v10 }
 0x83b   :  { %10088 = vmatprep.mubr.msk.bf16.mxu0 %vm10863_vm1, %v13767_v41  ;;  %10629 = vrcp.f32 %v12098_v0  ;;  %v10771_v0 = vld [vmem:[%s13745_s5] sm:$0xff]  }
 0x83f   :  { %4728 = vrot.lane.b32.xlu1 %v11064_v50, %s10867_s13 }
 0x844   :  { %v12142_v49 = vpop.eup %10621 }
 0x845   :  { %v3880_v35 = vsel %vm184_vm0, %v12142_v49, 0.0  ;;  %v10624_v51 = vpop.eup %10623 }
 0x846   :  { %3881 = vadd.xlane.f32.xlu0 %v3880_v35  ;;  %v10626_v58 = vpop.eup %10625  ;;  %v3914_v18 = vmul.f32 %v10624_v51, %v12060_v3 }
 0x847   :  { %v3915_v11 = vmul.f32 %v10626_v58, %v12054_v34  ;;  %v10628_v25 = vpop.eup %10627 }
 0x848   :  { %v10630_v4 = vpop.eup %10629  ;;  %v3905_v3 = vmul.f32 %v10628_v25, %v12066_v33 }
 0x849   :  { %v3924_v52 = vpack.c.bf16 %v3915_v11, %v3914_v18  ;;  %v3904_v34 = vmul.f32 %v10630_v4, %v12056_v48 }
 0x84b   :  { %v3919_v61 = vpack.c.bf16 %v3905_v3, %v3904_v34 }
 0x85c   :  { %4722 = vrot.lane.b32.xlu0 %v11037_v32, %s10867_s13 }
 0x860   :  { %4724 = vrot.lane.b32.xlu0 %v11047_v39, %s10867_s13 }
 0x864   :  { %3975 = vrot.lane.b32.xlu0 %v13770_v38, %s10866_s30 }
 0x868   :  { %4726 = vrot.lane.b32.xlu0 %v11055_v46, %s10867_s13 }
 0x86c   :  { %4730 = vrot.lane.b32.xlu0 %v11093_v13, %s10867_s13 }
 0x870   :  { %4732 = vrot.lane.b32.xlu0 %v11081_v2, %s10867_s13 }
 0x874   :  { %4071 = vrot.lane.b32.xlu0 %v11174_v40, %s10866_s30 }
 0x878   :  { %4738 = vrot.lane.b32.xlu0 %v11101_v21, %s10867_s13 }
 0x87c   :  { %4740 = vrot.lane.b32.xlu0 %v11114_v36, %s10867_s13 }
 0x880   :  { %4746 = vrot.lane.b32.xlu0 %v11137_v62, %s10867_s13 }
 0x882   :  { %v3858_v20 = vpop.xlane.xlu1 %3857 }
 0x883   :  { %10631 = vrcp.f32 %v3858_v20 }
 0x884   :  { %4748 = vrot.lane.b32.xlu0 %v11157_v19, %s10867_s13  ;;  %10633 = vrcp.f32 %v3861_v23 }
 0x886   :  { %v4216_v10 = vpop.permute.xlu1 %4215 }
 0x887   :  { %10087 = vmatpush3.bf16.msra.mxu0 %v4216_v10 }
 0x888   :  { %10098 = vmatprep.subr.bf16.mxu0 %v10771_v0 }
 0x88a   :  { %10089 = vmatmul.mubr.msk.bf16.vlgmr.msra.gmra.mxu0 %vm184_vm0, %v3924_v52 }
 0x88b   :  { %10100 = vmatprep.mubr.msk.bf16.mxu0 %vm184_vm0, %v12104_v17  ;;  %10099 = vmatpush3.bf16.msra.mxu0 %v10771_v0 }
 0x88e   :  { %v3870_v12 = vpop.xlane.xlu0 %3869 }
 0x88f   :  { %10635 = vrcp.f32 %v3870_v12 }
 0x890   :  { %v10632_v5 = vpop.eup %10631 }
 0x891   :  { %v10634_v28 = vpop.eup %10633  ;;  %v3908_v22 = vmul.f32 %v10632_v5, %v12092_v57 }
 0x892   :  { %10101 = vmatmul.mubr.msk.bf16.vlgmr.msra.gmra.mxu0 %vm184_vm0, %v3919_v61  ;;  %v3873_v63 = vpop.xlane.xlu0 %3872  ;;  %v3909_v17 = vmul.f32 %v10634_v28, %v12083_v1 }
 0x893   :  { %10637 = vrcp.f32 %v3873_v63  ;;  %10104 = vmatprep.mubr.msk.bf16.mxu0 %vm184_vm0, %v12122_v55 }
 0x894   :  { %v3921_v37 = vpack.c.bf16 %v3909_v17, %v3908_v22 }
 0x89a   :  { %10105 = vmatmul.mubr.msk.bf16.gmra.mxu0 %vm184_vm0, %v3921_v37 }
 0x89b   :  { %10108 = vmatprep.mubr.msk.bf16.mxu0 %vm184_vm0, %v3922_v44 }
 0x89c   :  { %v10636_v48 = vpop.eup %10635 }
 0x89d   :  { %v3912_v54 = vmul.f32 %v10636_v48, %v12102_v29 }
 0x8a0   :  { %v10638_v33 = vpop.eup %10637 }
 0x8a1   :  { %v3913_v47 = vmul.f32 %v10638_v33, %v12109_v9 }
 0x8a3   :  { %v12189_v27 = vpack.c.bf16 %v3913_v47, %v3912_v54 }
 0x8a5   :  { %10109 = vmatmul.mubr.msk.bf16.gmra.mxu0 %vm184_vm0, %v12189_v27 }
 0x8a6   :  { %10112 = vmatprep.mubr.msk.bf16.mxu0 %vm184_vm0, %v3924_v52 }
 0x8b7   :  { %v3885_v24 = vpop.xlane.xlu1 %3884 }
 0x8b8   :  { %10639 = vrcp.f32 %v3885_v24 }
 0x8bb   :  { %v4729_v0 = vpop.permute.xlu1 %4728 }
 0x8c5   :  { %v12194_v57 = vpop.f32.mrf.mxu0  ;;  %v10640_v20 = vpop.eup %10639 }
 0x8c6   :  { %13771 = vst [vmem:[#allocation16_spill] sm:$0xff] %v12194_v57  ;;  %v3917_v10 = vmul.f32 %v10640_v20, %v12129_v8 }
 0x8c7   :  { %v10054_v1 = vpop.f32.mrf.mxu0 }
 0x8c9   :  { %v12196_v55 = vpop.f32.mrf.mxu0 }
 0x8ca   :  { %13772 = vst [vmem:[#allocation18_spill] sm:$0xff] %v12196_v55 }
 0x8cb   :  { %v10055_v56 = vpop.f32.mrf.mxu0 }
 0x8cd   :  { %v12198_v31 = vpop.f32.mrf.mxu0 }
 0x8ce   :  { %13773 = vst [vmem:[#allocation19_spill] sm:$0xff] %v12198_v31 }
 0x8cf   :  { %v10066_v29 = vpop.f32.mrf.mxu0  ;;  %v3882_v16 = vpop.xlane.xlu0 %3881 }
 0x8d0   :  { %10641 = vrcp.f32 %v3882_v16 }
 0x8d1   :  { %v12200_v9 = vpop.f32.mrf.mxu0 }
 0x8d2   :  { %13774 = vst [vmem:[#allocation20_spill] sm:$0xff] %v12200_v9 }
 0x8d3   :  { %v10067_v44 = vpop.f32.mrf.mxu0  ;;  %v4723_v35 = vpop.permute.xlu0 %4722 }
 0x8d4   :  { %4770 = vxpose.xlu1.b32.start [1/2] (short) (narrow) %v4723_v35, 16 }
 0x8d7   :  { %v4725_v51 = vpop.permute.xlu0 %4724 }
 0x8d8   :  { %4771 = vxpose.xlu1.b32.end [2/2] (short) (narrow) %v4725_v51, 16 }
 0x8db   :  { %v3976_v58 = vpop.permute.xlu0 %3975 }
 0x8dc   :  { %10057 = vmatpush3.bf16.msra.mxu1 %v3976_v58  ;;  %v9343_v58 = vld [vmem:[%s13746_s6 + $0x78] sm:$0xff] }
 0x8dd   :  { %v10642_v23 = vpop.eup %10641  ;;  %10068 = vmatprep.subr.bf16.mxu1 %v13767_v41 }
 0x8de   :  { %v3916_v18 = vmul.f32 %v10642_v23, %v12142_v49 }
 0x8df   :  { %10059 = vmatmul.mubr.msk.bf16.vlgmr.msra.gmra.mxu1 %vm184_vm0, %v3919_v61  ;;  %v4727_v11 = vpop.permute.xlu0 %4726 }
 0x8e0   :  { %4802 = vxpose.xlu0.b32.start [1/2] (short) (narrow) %v4727_v11, 16  ;;  %v12206_v52 = vpack.c.bf16 %v3917_v10, %v3916_v18  ;;  %10070 = vmatprep.mubr.msk.bf16.mxu1 %vm10863_vm1, %v13767_v41 }
 0x8e2   :  { %10113 = vmatmul.mubr.msk.bf16.gmra.mxu0 %vm184_vm0, %v12206_v52 }
 0x8e3   :  { %v4731_v25 = vpop.permute.xlu0 %4730 }
 0x8e4   :  { %4803 = vxpose.xlu0.b32.end [2/2] (short) (narrow) %v4729_v0, 16 }
 0x8e7   :  { %v4733_v4 = vpop.permute.xlu0 %4732 }
 0x8e8   :  { %4834 = vxpose.xlu0.b32.start [1/2] (short) (narrow) %v4731_v25, 16  ;;  %v12304_v25 = vld [vmem:[%s13744_s4] sm:$0xff] }
 0x8eb   :  { %v4072_v49 = vpop.permute.xlu0 %4071 }
 0x8ec   :  { %4835 = vxpose.xlu0.b32.end [2/2] (short) (narrow) %v4733_v4, 16  ;;  %10069 = vmatpush3.bf16.msra.mxu1 %v4072_v49  ;;  %v9342_v4 = vld [vmem:[%s13746_s6 + $0x70] sm:$0xff] }
 0x8ed   :  { %10080 = vmatprep.subr.bf16.mxu1 %v13767_v41 }
 0x8ef   :  { %10071 = vmatmul.mubr.msk.bf16.vlgmr.msra.gmra.mxu1 %vm184_vm0, %v3921_v37  ;;  %v4739_v8 = vpop.permute.xlu0 %4738 }
 0x8f0   :  { %4898 = vxpose.xlu1.b32.start [1/2] (short) (narrow) %v4739_v8, 16  ;;  %10082 = vmatprep.mubr.msk.bf16.mxu1 %vm10863_vm1, %v13767_v41 }
 0x8f3   :  { %v4741_v3 = vpop.permute.xlu0 %4740 }
 0x8f4   :  { %4899 = vxpose.xlu1.b32.end [2/2] (short) (narrow) %v4741_v3, 16  ;;  %v9341_v3 = vld [vmem:[%s13746_s6 + $0x68] sm:$0xff] }
 0x8f7   :  { %v4747_v12 = vpop.permute.xlu0 %4746 }
 0x8f8   :  { %4962 = vxpose.xlu0.b32.start [1/2] (short) (narrow) %v4747_v12, 16 }
 0x8fa   :  { %v12216_v34 = vpop.f32.mrf.mxu0 }
 0x8fb   :  { %13775 = vst [vmem:[#allocation21_spill] sm:$0xff] %v12216_v34  ;;  %v4749_v61 = vpop.permute.xlu0 %4748 }
 0x8fc   :  { %v10078_v5 = vpop.f32.mrf.mxu0  ;;  %4963 = vxpose.xlu0.b32.end [2/2] (short) (narrow) %v4749_v61, 16  ;;  %v9340_v61 = vld [vmem:[%s13746_s6 + $0x60] sm:$0xff] }
 0x8fe   :  { %v12218_v63 = vpop.f32.mrf.mxu0 }
 0x8ff   :  { %13776 = vst [vmem:[#allocation22_spill] sm:$0xff] %v12218_v63 }
 0x900   :  { %v10079_v28 = vpop.f32.mrf.mxu0 }
 0x901   :  { %v9339_v28 = vld [vmem:[%s13746_s6 + $0x58] sm:$0xff] }
 0x912   :  { %4167 = vrot.lane.b32.xlu1 %v11197_v60, %s10866_s30 }
 0x916   :  { %4263 = vrot.lane.b32.xlu1 %v11207_v7, %s10866_s30  ;;  %s9378_s30 = sld [smem:[#allocation8 + $0x2]] }
 0x91a   :  { %5028 = vrot.lane.b32.xlu1 %v11047_v39, %s10868_s16 }
 0x91e   :  { %5115 = vrot.lane.b32.xlu1 %v11064_v50, %s10868_s16 }
 0x922   :  { %4734 = vrot.lane.b32.xlu1 %v11095_v15, %s10867_s13 }
 0x925   :  { %5026 = vrot.lane.b32.xlu0 %v11037_v32, %s10868_s16 }
 0x926   :  { %4736 = vrot.lane.b32.xlu1 %v13768_v42, %s10867_s13 }
 0x929   :  { %5113 = vrot.lane.b32.xlu0 %v11055_v46, %s10868_s16 }
 0x92a   :  { %4742 = vrot.lane.b32.xlu1 %v11133_v59, %s10867_s13 }
 0x92d   :  { %5202 = vrot.lane.b32.xlu0 %v11081_v2, %s10868_s16 }
 0x92e   :  { %4744 = vrot.lane.b32.xlu1 %v11179_v43, %s10867_s13 }
 0x931   :  { %5200 = vrot.lane.b32.xlu0 %v11093_v13, %s10868_s16 }
 0x932   :  { %4750 = vrot.lane.b32.xlu1 %v11205_v6, %s10867_s13 }
 0x935   :  { %5376 = vrot.lane.b32.xlu0 %v11114_v36, %s10868_s16 }
 0x936   :  { %4752 = vrot.lane.b32.xlu1 %v11218_v30, %s10867_s13 }
 0x939   :  { %5374 = vrot.lane.b32.xlu0 %v11101_v21, %s10868_s16 }
 0x93a   :  { %5289 = vrot.lane.b32.xlu1 %v13768_v42, %s10868_s16 }
 0x93d   :  { %5550 = vrot.lane.b32.xlu0 %v11157_v19, %s10868_s16 }
 0x93e   :  { %5637 = vrot.lane.b32.xlu1 %v11218_v30, %s10868_s16 }
 0x941   :  { %5548 = vrot.lane.b32.xlu0 %v11137_v62, %s10868_s16 }
 0x945   :  { %5287 = vrot.lane.b32.xlu0 %v11095_v15, %s10868_s16 }
 0x949   :  { %5463 = vrot.lane.b32.xlu0 %v11179_v43, %s10868_s16 }
 0x94a   :  { %v12264_v22 = vpop.f32.mrf.mxu0 }
 0x94b   :  { %13777 = vst [vmem:[#allocation23_spill] sm:$0xff] %v12264_v22  ;;  %v12519_v22 = vstv %s9379_s14  ;;  %s9437_s14 = sld [smem:[#allocation6 + $0x3]] }
 0x94c   :  { %v10090_v17 = vpop.f32.mrf.mxu0 }
 0x94d   :  { %5461 = vrot.lane.b32.xlu0 %v11133_v59, %s10868_s16 }
 0x94e   :  { %v12268_v37 = vpop.f32.mrf.mxu0 }
 0x94f   :  { %13778 = vst [vmem:[#allocation24_spill] sm:$0xff] %v12268_v37 }
 0x950   :  { %v10091_v48 = vpop.f32.mrf.mxu0  ;;  %v4786_v33 = vpop.trf.xlu1 }
 0x951   :  { %5635 = vrot.lane.b32.xlu0 %v11205_v6, %s10868_s16  ;;  %10160 = vmatprep.mubr.msk.f32.mxu0 %vm184_vm0, %v4786_v33  ;;  %v9338_v48 = vld [vmem:[%s13746_s6 + $0x50] sm:$0xff] }
 0x952   :  { %v12279_v56 = vpop.f32.mrf.mxu0 }
 0x954   :  { %v4787_v54 = vpop.trf.xlu1  ;;  %v4344_v44 = vpop.f32.mrf.mxu0 }
 0x956   :  { %v12285_v35 = vpop.f32.mrf.mxu0 }
 0x958   :  { %v4347_v23 = vpop.f32.mrf.mxu0 }
 0x95a   :  { %v12299_v11 = vpop.f32.mrf.mxu0 }
 0x95c   :  { %v12273_v47 = vpop.trf.xlu0  ;;  %v12310_v49 = vpop.f32.mrf.mxu0 }
 0x95e   :  { %v12323_v5 = vpop.f32.mrf.mxu0 }
 0x960   :  { %v12277_v24 = vpop.trf.xlu0  ;;  %v4363_v33 = vpop.f32.mrf.mxu0 }
 0x964   :  { %v12283_v16 = vpop.trf.xlu0 }
 0x968   :  { %v12287_v20 = vpop.trf.xlu0 }
 0x96c   :  { %v12275_v1 = vpop.trf.xlu1 }
 0x970   :  { %v12281_v29 = vpop.trf.xlu1 }
 0x974   :  { %v12297_v10 = vpop.trf.xlu0 }
 0x978   :  { %v12318_v12 = vpop.trf.xlu0 }
 0x984   :  { %v4168_v51 = vpop.permute.xlu1 %4167 }
 0x985   :  { %10081 = vmatpush3.bf16.msra.mxu1 %v4168_v51  ;;  %v9337_v51 = vld [vmem:[%s13746_s6 + $0x48] sm:$0xff] }
 0x986   :  { %10092 = vmatprep.subr.bf16.mxu1 %v13767_v41 }
 0x988   :  { %10083 = vmatmul.mubr.msk.bf16.vlgmr.msra.gmra.mxu1 %vm184_vm0, %v12189_v27  ;;  %v4264_v18 = vpop.permute.xlu1 %4263  ;;  %v4407_v27 = vmul.f32 %v12304_v25, %v4344_v44 }
 0x989   :  { %10093 = vmatpush3.bf16.msra.mxu1 %v4264_v18  ;;  %10094 = vmatprep.mubr.msk.bf16.mxu1 %vm10863_vm1, %v13767_v41 }
 0x98a   :  { %10116 = vmatprep.subr.mxu1 %v9343_v58 }
 0x98c   :  { %v5029_v0 = vpop.permute.xlu1 %5028 }
 0x98d   :  { %10156 = vmatprep.subr.mxu0 %v5029_v0 }
 0x98e   :  { %10157 = vmatpush3.msra.mxu0 %v5029_v0 }
 0x990   :  { %10095 = vmatmul.mubr.msk.bf16.vlgmr.msra.gmra.mxu1 %vm184_vm0, %v12206_v52  ;;  %v5116_v8 = vpop.permute.xlu1 %5115 }
 0x991   :  { %10117 = vmatpush3.msra.mxu1 %v9343_v58  ;;  %10132 = vmatprep.mubr.msk.f32.mxu1 %vm2283_vm2, %v4407_v27  ;;  %v12334_v58 = vpop.f32.mrf.mxu0  ;;  %v9336_v27 = vld [vmem:[%s13746_s6 + $0x40] sm:$0xff] }
 0x992   :  { %10118 = vmatprep.subr.mxu1 %v9342_v4 }
 0x993   :  { %10119 = vmatpush3.msra.mxu1 %v9342_v4  ;;  %v4376_v4 = vpop.f32.mrf.mxu0 }
 0x994   :  { %10120 = vmatprep.subr.mxu1 %v9341_v3  ;;  %v4735_v52 = vpop.permute.xlu1 %4734 }
 0x995   :  { %10121 = vmatpush3.msra.mxu1 %v9341_v3  ;;  %4866 = vxpose.xlu1.b32.start [1/2] (short) (narrow) %v4735_v52, 16  ;;  %v12345_v3 = vld [vmem:[%s13744_s4 + $0x8] sm:$0xff] }
 0x996   :  { %10122 = vmatprep.subr.mxu1 %v9340_v61 }
 0x997   :  { %10123 = vmatpush3.msra.mxu1 %v9340_v61  ;;  %v5027_v17 = vpop.permute.xlu0 %5026 }
 0x998   :  { %10124 = vmatprep.subr.mxu1 %v9339_v28  ;;  %v4737_v44 = vpop.permute.xlu1 %4736  ;;  %10158 = vmatprep.subr.mxu0 %v5027_v17 }
 0x999   :  { %10125 = vmatpush3.msra.mxu1 %v9339_v28  ;;  %4867 = vxpose.xlu1.b32.end [2/2] (short) (narrow) %v4737_v44, 16 }
 0x99a   :  { %10126 = vmatprep.subr.mxu1 %v9338_v48  ;;  %10159 = vmatpush3.msra.mxu0 %v5027_v17  ;;  %v10111_v17 = vpop.f32.mrf.mxu0 }
 0x99b   :  { %10127 = vmatpush3.msra.mxu1 %v9338_v48  ;;  %10161 = vmatmul.mubr.msk.f32.vlgmr.msra.gmra.mxu0 %vm184_vm0, %v4787_v54  ;;  %v5114_v18 = vpop.permute.xlu0 %5113  ;;  %v4408_v54 = vmul.f32 %v12345_v3, %v4347_v23  ;;  %v4410_v23 = vmul.f32 %v12345_v3, %v12285_v35  ;;  %v4412_v35 = vmul.f32 %v12345_v3, %v4363_v33 }
 0x99c   :  { %10163 = vmatprep.subr.mxu0 %v5116_v8  ;;  %10128 = vmatprep.subr.mxu1 %v9337_v51  ;;  %v4743_v0 = vpop.permute.xlu1 %4742  ;;  %v4414_v33 = vmul.f32 %v12345_v3, %v12323_v5 }
 0x99d   :  { %10164 = vmatpush3.msra.mxu0 %v5116_v8  ;;  %10167 = vmatprep.mubr.msk.f32.mxu0 %vm184_vm0, %v12273_v47  ;;  %v4409_v8 = vmul.f32 %v12304_v25, %v12279_v56 }
 0x99e   :  { %10129 = vmatpush3.msra.mxu1 %v9337_v51  ;;  %10165 = vmatprep.subr.mxu0 %v5114_v18 }
 0x99f   :  { %10130 = vmatprep.subr.mxu1 %v9336_v27  ;;  %4930 = vxpose.xlu0.b32.start [1/2] (short) (narrow) %v4743_v0, 16  ;;  %v12348_v61 = vpop.f32.mrf.mxu1  ;;  %v5203_v52 = vpop.permute.xlu0 %5202  ;;  %v4413_v0 = vmul.f32 %v12304_v25, %v12299_v11  ;;  %v4415_v11 = vmul.f32 %v12304_v25, %v4376_v4  ;;  %v4417_v4 = vmul.f32 %v12304_v25, %v12334_v58 }
 0x9a0   :  { %13779 = vst [vmem:[#allocation25_spill] sm:$0xff] %v12348_v61  ;;  %10166 = vmatpush3.msra.mxu0 %v5114_v18  ;;  %10131 = vmatpush3.msra.mxu1 %v9336_v27  ;;  %v4745_v47 = vpop.permute.xlu1 %4744 }
 0x9a1   :  { %10168 = vmatmul.mubr.msk.f32.vlgmr.msra.gmra.mxu0 %vm184_vm0, %v12277_v24  ;;  %10133 = vmatmul.mubr.msk.f32.vlgmr.msra.gmra.mxu1 %vm2283_vm2, %v4408_v54  ;;  %v10060_v28 = vpop.f32.mrf.mxu1  ;;  %v4411_v24 = vmul.f32 %v12304_v25, %v12310_v49 }
 0x9a2   :  { %10174 = vmatprep.mubr.msk.f32.mxu0 %vm184_vm0, %v12283_v16  ;;  %10135 = vmatprep.mubr.msk.f32.mxu1 %vm2283_vm2, %v4409_v8  ;;  %v4379_v16 = vpop.f32.mrf.mxu0 }
 0x9a3   :  { %10170 = vmatprep.subr.mxu0 %v5203_v52  ;;  %4931 = vxpose.xlu0.b32.end [2/2] (short) (narrow) %v4745_v47, 16  ;;  %v12360_v56 = vpop.f32.mrf.mxu1  ;;  %v5201_v48 = vpop.permute.xlu0 %5200 }
 0x9a4   :  { %13780 = vst [vmem:[#allocation26_spill] sm:$0xff] %v12360_v56  ;;  %10171 = vmatpush3.msra.mxu0 %v5203_v52  ;;  %v4751_v44 = vpop.permute.xlu1 %4750  ;;  %v10114_v27 = vpop.f32.mrf.mxu0 }
 0x9a5   :  { %10136 = vmatmul.mubr.msk.f32.gmra.mxu1 %vm2283_vm2, %v4410_v23  ;;  %10172 = vmatprep.subr.mxu0 %v5201_v48  ;;  %v10061_v51 = vpop.f32.mrf.mxu1  ;;  %v4418_v23 = vmul.f32 %v12345_v3, %v10111_v17  ;;  %v4421_v17 = vmul.f32 %v12304_v25, %v10114_v27 }
 0x9a6   :  { %10138 = vmatprep.mubr.msk.f32.mxu1 %vm2283_vm2, %v4411_v24  ;;  %4994 = vxpose.xlu1.b32.start [1/2] (short) (narrow) %v4751_v44, 16  ;;  %v4392_v52 = vpop.f32.mrf.mxu0 }
 0x9a7   :  { %10173 = vmatpush3.msra.mxu0 %v5201_v48  ;;  %v5377_v18 = vpop.permute.xlu0 %5376  ;;  %v4419_v24 = vmul.f32 %v12304_v25, %v4392_v52  ;;  %v5839_v25 = vstv %s9378_s30 }
 0x9a8   :  { %10175 = vmatmul.mubr.msk.f32.vlgmr.msra.gmra.mxu0 %vm184_vm0, %v12287_v20  ;;  %v4753_v49 = vpop.permute.xlu1 %4752  ;;  %10184 = vmatprep.subr.mxu0 %v5377_v18  ;;  %v10115_v47 = vpop.f32.mrf.mxu0  ;;  %v5840_v27 = vmul.f32 %v5839_v25, %v11037_v32  ;;  %v5844_v52 = vmul.f32 %v5839_v25, %v11093_v13 }
 0x9a9   :  { %10139 = vmatmul.mubr.msk.f32.gmra.mxu1 %vm2283_vm2, %v4412_v35  ;;  %10188 = vmatprep.mubr.msk.f32.mxu0 %vm184_vm0, %v12275_v1  ;;  %v4416_v1 = vmul.f32 %v12345_v3, %v4379_v16  ;;  %v4422_v16 = vmul.f32 %v12345_v3, %v10115_v47  ;;  %v5853_v47 = vmul.f32 %v5839_v25, %v11157_v19 }
 0x9aa   :  { %10141 = vmatprep.mubr.msk.f32.mxu1 %vm2283_vm2, %v4413_v0  ;;  %4995 = vxpose.xlu1.b32.end [2/2] (short) (narrow) %v4753_v49, 16  ;;  %v4395_v44 = vpop.f32.mrf.mxu0  ;;  %v5841_v49 = vmul.f32 %v5839_v25, %v11047_v39 }
 0x9ab   :  { %10185 = vmatpush3.msra.mxu0 %v5377_v18  ;;  %v5375_v54 = vpop.permute.xlu0 %5374 }
 0x9ac   :  { %v5290_v8 = vpop.permute.xlu1 %5289  ;;  %10186 = vmatprep.subr.mxu0 %v5375_v54 }
 0x9ad   :  { %10142 = vmatmul.mubr.msk.f32.gmra.mxu1 %vm2283_vm2, %v4414_v33  ;;  %10177 = vmatprep.subr.mxu1 %v5290_v8  ;;  %v5845_v33 = vmul.f32 %v5839_v25, %v11081_v2 }
 0x9ae   :  { %10144 = vmatprep.mubr.msk.f32.mxu1 %vm2283_vm2, %v4415_v11  ;;  %10187 = vmatpush3.msra.mxu0 %v5375_v54 }
 0x9af   :  { %10178 = vmatpush3.msra.mxu1 %v5290_v8  ;;  %10189 = vmatmul.mubr.msk.f32.vlgmr.msra.gmra.mxu0 %vm184_vm0, %v12281_v29  ;;  %v12383_v20 = vpop.f32.mrf.mxu1  ;;  %v5551_v5 = vpop.permute.xlu0 %5550  ;;  %v5849_v8 = vmul.f32 %v5839_v25, %v11114_v36 }
 0x9b0   :  { %13781 = vst [vmem:[#allocation27_spill] sm:$0xff] %v12383_v20  ;;  %10202 = vmatprep.mubr.msk.f32.mxu0 %vm184_vm0, %v12297_v10  ;;  %10198 = vmatprep.subr.mxu0 %v5551_v5  ;;  %v4420_v10 = vmul.f32 %v12345_v3, %v4395_v44 }
 0x9b1   :  { %10145 = vmatmul.mubr.msk.f32.gmra.mxu1 %vm2283_vm2, %v4416_v1  ;;  %v10072_v28 = vpop.f32.mrf.mxu1  ;;  %10199 = vmatpush3.msra.mxu0 %v5551_v5 }
 0x9b2   :  { %10147 = vmatprep.mubr.msk.f32.mxu1 %vm2283_vm2, %v4417_v4  ;;  %v5848_v4 = vmul.f32 %v5839_v25, %v11101_v21 }
 0x9b3   :  { %v12392_v29 = vpop.f32.mrf.mxu1  ;;  %v5549_v48 = vpop.permute.xlu0 %5548 }
 0x9b4   :  { %13782 = vst [vmem:[#allocation28_spill] sm:$0xff] %v12392_v29  ;;  %10200 = vmatprep.subr.mxu0 %v5549_v48 }
 0x9b5   :  { %10148 = vmatmul.mubr.msk.f32.gmra.mxu1 %vm2283_vm2, %v4418_v23  ;;  %v10073_v58 = vpop.f32.mrf.mxu1  ;;  %10201 = vmatpush3.msra.mxu0 %v5549_v48  ;;  %v5852_v48 = vmul.f32 %v5839_v25, %v11137_v62 }
 0x9b6   :  { %10150 = vmatprep.mubr.msk.f32.mxu1 %vm2283_vm2, %v4419_v24  ;;  %10203 = vmatmul.mubr.msk.f32.vlgmr.msra.gmra.mxu0 %vm184_vm0, %v12318_v12  ;;  %v5741_v12 = vstv %s9377_s8  ;;  %v5843_v24 = vmul.f32 %v5839_v25, %v11064_v50 }
 0x9b7   :  { %v5288_v51 = vpop.permute.xlu0 %5287  ;;  %10212 = vmatprep.subr.bf16.mxu0 %v13767_v41  ;;  %10214 = vmatprep.mubr.msk.bf16.mxu0 %vm10863_vm1, %v13767_v41  ;;  %v5742_v18 = vmul.f32 %v5741_v12, %v11037_v32  ;;  %v5743_v0 = vmul.f32 %v5741_v12, %v11047_v39  ;;  %v5747_v3 = vmul.f32 %v5741_v12, %v11081_v2 }
 0x9b8   :  { %10179 = vmatprep.subr.mxu1 %v5288_v51  ;;  %v5746_v54 = vmul.f32 %v5741_v12, %v11093_v13  ;;  %v5751_v11 = vmul.f32 %v5741_v12, %v11114_v36  ;;  %v5750_v1 = vmul.f32 %v5741_v12, %v11101_v21  ;;  %v5755_v5 = vmul.f32 %v5741_v12, %v11157_v19 }
 0x9b9   :  { %10151 = vmatmul.mubr.msk.f32.gmra.mxu1 %vm2283_vm2, %v4420_v10  ;;  %v5754_v28 = vmul.f32 %v5741_v12, %v11137_v62  ;;  %v5745_v23 = vmul.f32 %v5741_v12, %v11064_v50  ;;  %v5744_v44 = vmul.f32 %v5741_v12, %v11055_v46  ;;  %v5749_v58 = vmul.f32 %v5741_v12, %v13768_v42 }
 0x9ba   :  { %10153 = vmatprep.mubr.msk.f32.mxu1 %vm2283_vm2, %v4421_v17  ;;  %10180 = vmatpush3.msra.mxu1 %v5288_v51  ;;  %v5842_v10 = vmul.f32 %v5839_v25, %v11055_v46  ;;  %v5847_v51 = vmul.f32 %v5839_v25, %v13768_v42  ;;  %v5748_v17 = vmul.f32 %v5741_v12, %v11095_v15 }
 0x9bb   :  { %v12407_v35 = vpop.permute.xlu0 %5463 }
 0x9bc   :  { %10191 = vmatprep.subr.mxu1 %v12407_v35 }
 0x9bd   :  { %10154 = vmatmul.mubr.msk.f32.gmra.mxu1 %vm2283_vm2, %v4422_v16  ;;  %v5753_v16 = vmul.f32 %v5741_v12, %v11179_v43 }
 0x9c8   :  { %5774 = vrot.lane.b32.xlu1 %v5742_v18, %s10867_s13  ;;  %v5846_v18 = vmul.f32 %v5839_v25, %v11095_v15 }
 0x9cc   :  { %5776 = vrot.lane.b32.xlu0 %v5743_v0, %s10867_s13  ;;  %5872 = vrot.lane.b32.xlu1 %v5840_v27, %s10868_s16  ;;  %v5851_v0 = vmul.f32 %v5839_v25, %v11179_v43  ;;  %v5752_v27 = vmul.f32 %v5741_v12, %v11133_v59 }
 0x9d0   :  { %5784 = vrot.lane.b32.xlu0 %v5747_v3, %s10867_s13  ;;  %5874 = vrot.lane.b32.xlu1 %v5841_v49, %s10868_s16  ;;  %v5757_v3 = vmul.f32 %v5741_v12, %v11218_v30  ;;  %v5850_v49 = vmul.f32 %v5839_v25, %v11133_v59 }
 0x9d4   :  { %5882 = vrot.lane.b32.xlu0 %v5845_v33, %s10868_s16  ;;  %5782 = vrot.lane.b32.xlu1 %v5746_v54, %s10867_s13  ;;  %v5855_v33 = vmul.f32 %v5839_v25, %v11218_v30  ;;  %v5756_v54 = vmul.f32 %v5741_v12, %v11205_v6 }
 0x9d8   :  { %5792 = vrot.lane.b32.xlu0 %v5751_v11, %s10867_s13  ;;  %5880 = vrot.lane.b32.xlu1 %v5844_v52, %s10868_s16  ;;  %v5854_v11 = vmul.f32 %v5839_v25, %v11205_v6  ;;  %v5638_v52 = vpop.permute.xlu1 %5637 }
 0x9dc   :  { %5890 = vrot.lane.b32.xlu0 %v5849_v8, %s10868_s16  ;;  %5790 = vrot.lane.b32.xlu1 %v5750_v1, %s10867_s13  ;;  %v5462_v8 = vpop.permute.xlu0 %5461 }
 0x9e0   :  { %5800 = vrot.lane.b32.xlu0 %v5755_v5, %s10867_s13  ;;  %5888 = vrot.lane.b32.xlu1 %v5848_v4, %s10868_s16  ;;  %v5636_v4 = vpop.permute.xlu0 %5635 }
 0x9e4   :  { %5898 = vrot.lane.b32.xlu0 %v5853_v47, %s10868_s16  ;;  %5798 = vrot.lane.b32.xlu1 %v5754_v28, %s10867_s13 }
 0x9e8   :  { %5780 = vrot.lane.b32.xlu0 %v5745_v23, %s10867_s13  ;;  %5896 = vrot.lane.b32.xlu1 %v5852_v48, %s10868_s16 }
 0x9ec   :  { %5878 = vrot.lane.b32.xlu0 %v5843_v24, %s10868_s16  ;;  %5778 = vrot.lane.b32.xlu1 %v5744_v44, %s10867_s13 }
 0x9f0   :  { %5788 = vrot.lane.b32.xlu0 %v5749_v58, %s10867_s13  ;;  %5876 = vrot.lane.b32.xlu1 %v5842_v10, %s10868_s16 }
 0x9f4   :  { %5886 = vrot.lane.b32.xlu0 %v5847_v51, %s10868_s16  ;;  %5786 = vrot.lane.b32.xlu1 %v5748_v17, %s10867_s13 }
 0x9f8   :  { %5796 = vrot.lane.b32.xlu0 %v5753_v16, %s10867_s13  ;;  %5884 = vrot.lane.b32.xlu1 %v5846_v18, %s10868_s16 }
 0x9fc   :  { %5894 = vrot.lane.b32.xlu0 %v5851_v0, %s10868_s16  ;;  %5794 = vrot.lane.b32.xlu1 %v5752_v27, %s10867_s13 }
 0xa00   :  { %5804 = vrot.lane.b32.xlu0 %v5757_v3, %s10867_s13  ;;  %5892 = vrot.lane.b32.xlu1 %v5850_v49, %s10868_s16 }
 0xa04   :  { %5902 = vrot.lane.b32.xlu0 %v5855_v33, %s10868_s16  ;;  %5802 = vrot.lane.b32.xlu1 %v5756_v54, %s10867_s13  ;;  %s9376_s13 = sld [smem:[#allocation3 + $0x2]] }
 0xa08   :  { %5900 = vrot.lane.b32.xlu1 %v5854_v11, %s10868_s16  ;;  %s10870_s16 = smov 80  }
 0xa11   :  { %v4882_v1 = vpop.trf.xlu1 }
 0xa12   :  { %10181 = vmatprep.mubr.msk.f32.mxu1 %vm184_vm0, %v4882_v1 }
 0xa15   :  { %v4883_v5 = vpop.trf.xlu1 }
 0xa16   :  { %10182 = vmatmul.mubr.msk.f32.vlgmr.msra.gmra.mxu1 %vm184_vm0, %v4883_v5 }
 0xa17   :  { %10192 = vmatpush3.msra.mxu1 %v12407_v35 }
 0xa18   :  { %10193 = vmatprep.subr.mxu1 %v5462_v8 }
 0xa19   :  { %10194 = vmatpush3.msra.mxu1 %v5462_v8 }
 0xa1a   :  { %10205 = vmatprep.subr.mxu1 %v5638_v52 }
 0xa1b   :  { %v4946_v12 = vpop.trf.xlu0 }
 0xa1c   :  { %10195 = vmatprep.mubr.msk.f32.mxu1 %vm184_vm0, %v4946_v12  ;;  %v12513_v12 = vstv %s9376_s13 }
 0xa1f   :  { %v4947_v25 = vpop.trf.xlu0 }
 0xa20   :  { %10196 = vmatmul.mubr.msk.f32.vlgmr.msra.gmra.mxu1 %vm184_vm0, %v4947_v25 }
 0xa21   :  { %10206 = vmatpush3.msra.mxu1 %v5638_v52 }
 0xa22   :  { %10207 = vmatprep.subr.mxu1 %v5636_v4  ;;  %v5010_v47 = vpop.trf.xlu1 }
 0xa23   :  { %10208 = vmatpush3.msra.mxu1 %v5636_v4  ;;  %10209 = vmatprep.mubr.msk.f32.mxu1 %vm184_vm0, %v5010_v47 }
 0xa24   :  { %10218 = vmatprep.subr.bf16.mxu1 %v13767_v41 }
 0xa26   :  { %v5011_v28 = vpop.trf.xlu1 }
 0xa27   :  { %10210 = vmatmul.mubr.msk.f32.vlgmr.msra.gmra.mxu1 %vm184_vm0, %v5011_v28 }
 0xa28   :  { %10220 = vmatprep.mubr.msk.bf16.mxu1 %vm10863_vm1, %v13767_v41 }
 0xa3a   :  { %v5775_v35 = vpop.permute.xlu1 %5774 }
 0xa3e   :  { %v5777_v23 = vpop.permute.xlu0 %5776  ;;  %v5873_v48 = vpop.permute.xlu1 %5872 }
 0xa42   :  { %v5785_v24 = vpop.permute.xlu0 %5784  ;;  %v5875_v44 = vpop.permute.xlu1 %5874 }
 0xa46   :  { %v12485_v58 = vpop.permute.xlu0 %5882  ;;  %v12487_v10 = vpop.permute.xlu1 %5782 }
 0xa48   :  { %v12489_v51 = vpop.f32.mrf.mxu1 }
 0xa4a   :  { %v12491_v17 = vpop.permute.xlu0 %5792  ;;  %v12493_v16 = vpop.permute.xlu1 %5880 }
 0xa4b   :  { %v10084_v18 = vpop.f32.mrf.mxu1 }
 0xa4d   :  { %v12495_v0 = vpop.f32.mrf.mxu1 }
 0xa4e   :  { %v12497_v27 = vpop.permute.xlu0 %5890  ;;  %v12499_v3 = vpop.permute.xlu1 %5790 }
 0xa4f   :  { %v10085_v49 = vpop.f32.mrf.mxu1 }
 0xa51   :  { %v12501_v33 = vpop.f32.mrf.mxu1 }
 0xa52   :  { %13783 = vst [vmem:[#allocation29_spill] sm:$0xff] %v12501_v33  ;;  %v12503_v54 = vpop.permute.xlu1 %5888  ;;  %v12505_v11 = vpop.permute.xlu0 %5800 }
 0xa53   :  { %v10096_v52 = vpop.f32.mrf.mxu1 }
 0xa55   :  { %v12507_v8 = vpop.f32.mrf.mxu1 }
 0xa56   :  { %v12509_v1 = vpop.permute.xlu1 %5798  ;;  %v12511_v4 = vpop.permute.xlu0 %5898 }
 0xa57   :  { %v10097_v5 = vpop.f32.mrf.mxu1 }
 0xa5a   :  { %v12515_v25 = vpop.permute.xlu1 %5896  ;;  %v5781_v52 = vpop.permute.xlu0 %5780 }
 0xa5b   :  { %v10162_v47 = vpop.f32.mrf.mxu0 }
 0xa5c   :  { %v5725_v28 = vmul.f32 %v10162_v47, %v12513_v12 }
 0xa5d   :  { %v5104_v18 = vpop.f32.mrf.mxu0 }
 0xa5e   :  { %v5823_v49 = vadd.f32 %v5777_v23, %v5725_v28  ;;  %v5724_v33 = vmul.f32 %v12513_v12, %v5104_v18  ;;  %v5779_v5 = vpop.permute.xlu1 %5778 }
 0xa60   :  { %v5921_v37 = vadd.f32 %v5875_v44, %v5823_v49  ;;  %v5822_v34 = vadd.f32 %v5775_v35, %v5724_v33  ;;  %v5879_v35 = vpop.permute.xlu0 %5878 }
 0xa61   :  { %v10169_v63 = vpop.f32.mrf.mxu0  ;;  %v12521_v20 = vpop.f32.mrf.mxu1 }
 0xa62   :  { %13784 = vst [vmem:[#allocation30_spill] sm:$0xff] %v12521_v20  ;;  %v5920_v29 = vadd.f32 %v5873_v48, %v5822_v34  ;;  %v5727_v31 = vmul.f32 %v10169_v63, %v12513_v12  ;;  %v12525_v9 = vadd.f32 %v12519_v22, %v5921_v37  ;;  %v5877_v37 = vpop.permute.xlu1 %5876 }
 0xa63   :  { %v5191_v47 = vpop.f32.mrf.mxu0  ;;  %v12527_v61 = vpop.f32.mrf.mxu1 }
 0xa64   :  { %13785 = vst [vmem:[#allocation31_spill] sm:$0xff] %v12527_v61  ;;  %v5825_v23 = vadd.f32 %v5781_v52, %v5727_v31  ;;  %v5726_v28 = vmul.f32 %v12513_v12, %v5191_v47  ;;  %v5957_v44 = vsel %vm184_vm0, %v12525_v9, -inf  ;;  %v12535_v34 = vadd.f32 %v12519_v22, %v5920_v29 }
 0xa65   :  { %v12532_v33 = vpop.f32.mrf.mxu1  ;;  %5958 = vmax.xlane.f32.xlu0 %v5957_v44 }
 0xa66   :  { %13786 = vst [vmem:[#allocation32_spill] sm:$0xff] %v12532_v33  ;;  %v5923_v63 = vadd.f32 %v5879_v35, %v5825_v23  ;;  %v5824_v48 = vadd.f32 %v5779_v5, %v5726_v28  ;;  %v5954_v31 = vsel %vm184_vm0, %v12535_v34, -inf }
 0xa67   :  { %v12537_v18 = vpop.f32.mrf.mxu1  ;;  %5955 = vmax.xlane.f32.xlu1 %v5954_v31 }
 0xa68   :  { %13787 = vst [vmem:[#allocation33_spill] sm:$0xff] %v12537_v18  ;;  %v5922_v49 = vadd.f32 %v5877_v37, %v5824_v48  ;;  %v10176_v52 = vpop.f32.mrf.mxu0  ;;  %v12542_v47 = vadd.f32 %v12519_v22, %v5923_v63 }
 0xa69   :  { %v5729_v33 = vmul.f32 %v10176_v52, %v12513_v12  ;;  %v12545_v44 = vpop.f32.mrf.mxu1 }
 0xa6a   :  { %13788 = vst [vmem:[#allocation34_spill] sm:$0xff] %v12545_v44  ;;  %v5278_v29 = vpop.f32.mrf.mxu0  ;;  %v12548_v23 = vadd.f32 %v12519_v22, %v5922_v49  ;;  %v5963_v48 = vsel %vm184_vm0, %v12542_v47, -inf }
 0xa6b   :  { %v5827_v5 = vadd.f32 %v5785_v24, %v5729_v33  ;;  %v5728_v28 = vmul.f32 %v12513_v12, %v5278_v29  ;;  %v12551_v35 = vpop.f32.mrf.mxu1  ;;  %5964 = vmax.xlane.f32.xlu1 %v5963_v48 }
 0xa6c   :  { %13789 = vst [vmem:[#allocation35_spill] sm:$0xff] %v12551_v35  ;;  %v5960_v63 = vsel %vm184_vm0, %v12548_v23, -inf }
 0xa6d   :  { %v5925_v37 = vadd.f32 %v12485_v58, %v5827_v5  ;;  %v5826_v31 = vadd.f32 %v12487_v10, %v5728_v28  ;;  %5961 = vmax.xlane.f32.xlu0 %v5960_v63  ;;  %v12559_v52 = vpop.f32.mrf.mxu1 }
 0xa6e   :  { %13790 = vst [vmem:[#allocation36_spill] sm:$0xff] %v12559_v52 }
 0xa6f   :  { %v5924_v24 = vadd.f32 %v12493_v16, %v5826_v31  ;;  %v12562_v33 = vpop.f32.mrf.mxu1  ;;  %v12565_v49 = vadd.f32 %v12519_v22, %v5925_v37  ;;  %v10190_v29 = vpop.f32.mrf.mxu0 }
 0xa70   :  { %13791 = vst [vmem:[#allocation37_spill] sm:$0xff] %v12562_v33  ;;  %v5733_v35 = vmul.f32 %v10190_v29, %v12513_v12 }
 0xa71   :  { %v12568_v44 = vpop.f32.mrf.mxu1  ;;  %v5969_v58 = vsel %vm184_vm0, %v12565_v49, -inf  ;;  %v12573_v10 = vadd.f32 %v12519_v22, %v5924_v24  ;;  %v5452_v5 = vpop.f32.mrf.mxu0 }
 0xa72   :  { %13792 = vst [vmem:[#allocation38_spill] sm:$0xff] %v12568_v44  ;;  %5970 = vmax.xlane.f32.xlu1 %v5969_v58  ;;  %v5831_v16 = vadd.f32 %v12491_v17, %v5733_v35  ;;  %v5732_v28 = vmul.f32 %v12513_v12, %v5452_v5 }
 0xa73   :  { %v12577_v48 = vpop.f32.mrf.mxu1  ;;  %v5966_v63 = vsel %vm184_vm0, %v12573_v10, -inf }
 0xa74   :  { %13793 = vst [vmem:[#allocation39_spill] sm:$0xff] %v12577_v48  ;;  %5967 = vmax.xlane.f32.xlu0 %v5966_v63  ;;  %v5929_v37 = vadd.f32 %v12497_v27, %v5831_v16  ;;  %v5830_v31 = vadd.f32 %v12499_v3, %v5732_v28 }
 0xa75   :  { %v10149_v29 = vpop.f32.mrf.mxu1 }
 0xa76   :  { %v12584_v24 = vadd.f32 %v10149_v29, %v12495_v0  ;;  %v10204_v44 = vpop.f32.mrf.mxu0  ;;  %v5928_v58 = vadd.f32 %v12503_v54, %v5830_v31  ;;  %v12589_v5 = vadd.f32 %v12519_v22, %v5929_v37 }
 0xa77   :  { %v4596_v17 = vpop.f32.mrf.mxu1  ;;  %v5737_v35 = vmul.f32 %v10204_v44, %v12513_v12 }
 0xa78   :  { %13794 = vst [vmem:[#allocation40_spill] sm:$0xff] %v12584_v24  ;;  %v12592_v48 = vadd.f32 %v4596_v17, %v12489_v51  ;;  %v5626_v63 = vpop.f32.mrf.mxu0  ;;  %v5981_v16 = vsel %vm184_vm0, %v12589_v5, -inf  ;;  %v5946_v54 = vadd.f32 %v12519_v22, %v5928_v58 }
 0xa79   :  { %v5835_v27 = vadd.f32 %v12505_v11, %v5737_v35  ;;  %v12595_v3 = vpop.f32.mrf.mxu1  ;;  %v5736_v0 = vmul.f32 %v12513_v12, %v5626_v63  ;;  %5982 = vmax.xlane.f32.xlu1 %v5981_v16  ;;  %v12616_v63 = vpop.permute.xlu1 %5786 }
 0xa7a   :  { %13795 = vst [vmem:[#allocation41_spill] sm:$0xff] %v12592_v48  ;;  %13796 = vst [vmem:[#allocation42_spill] sm:$0xff] %v12595_v3  ;;  %v5978_v51 = vsel %vm184_vm0, %v5946_v54, -inf }
 0xa7b   :  { %v5933_v44 = vadd.f32 %v12511_v4, %v5835_v27  ;;  %v5834_v28 = vadd.f32 %v12509_v1, %v5736_v0  ;;  %v12603_v37 = vpop.f32.mrf.mxu1  ;;  %5979 = vmax.xlane.f32.xlu0 %v5978_v51  ;;  %v12614_v4 = vpop.permute.xlu0 %5788 }
 0xa7c   :  { %13797 = vst [vmem:[#allocation43_spill] sm:$0xff] %v12603_v37 }
 0xa7d   :  { %v5932_v11 = vadd.f32 %v12515_v25, %v5834_v28  ;;  %v10155_v31 = vpop.f32.mrf.mxu1  ;;  %v5951_v29 = vadd.f32 %v12519_v22, %v5933_v44  ;;  %v12620_v25 = vpop.permute.xlu1 %5884 }
 0xa7e   :  { %v12609_v17 = vadd.f32 %v10155_v31, %v12507_v8 }
 0xa7f   :  { %v5993_v58 = vsel %vm184_vm0, %v5951_v29, -inf  ;;  %v5950_v35 = vadd.f32 %v12519_v22, %v5932_v11  ;;  %v12618_v27 = vpop.permute.xlu0 %5886 }
 0xa80   :  { %13798 = vst [vmem:[#allocation44_spill] sm:$0xff] %v12609_v17  ;;  %5994 = vmax.xlane.f32.xlu1 %v5993_v58 }
 0xa81   :  { %v5990_v1 = vsel %vm184_vm0, %v5950_v35, -inf  ;;  %v12624_v8 = vpop.permute.xlu1 %5794 }
 0xa82   :  { %5991 = vmax.xlane.f32.xlu0 %v5990_v1 }
 0xa83   :  { %v12622_v0 = vpop.permute.xlu0 %5796 }
 0xa85   :  { %v12628_v44 = vpop.permute.xlu1 %5892 }
 0xa87   :  { %v12626_v16 = vpop.permute.xlu0 %5894 }
 0xa89   :  { %v12632_v51 = vpop.permute.xlu1 %5802 }
 0xa8b   :  { %v12630_v28 = vpop.permute.xlu0 %5804 }
 0xa8d   :  { %v12636_v31 = vpop.permute.xlu1 %5900 }
 0xa8f   :  { %v12634_v11 = vpop.permute.xlu0 %5902 }
 0xaee   :  { %v5959_v58 = vpop.xlane.xlu0 %5958 }
 0xaef   :  { %v6003_v1 = vsub.f32 %v12525_v9, %v5959_v58 }
 0xaf0   :  { %v5956_v37 = vpop.xlane.xlu1 %5955 }
 0xaf1   :  { %v6020_v17 = vmul.f32 1.442695, %v6003_v1  ;;  %v6002_v48 = vsub.f32 %v12535_v34, %v5956_v37 }
 0xaf3   :  { %10643 = vpow2.f32 %v6020_v17  ;;  %v6018_v3 = vmul.f32 1.442695, %v6002_v48 }
 0xaf4   :  { %v12640_v24 = vpop.xlane.xlu1 %5964 }
 0xaf5   :  { %10645 = vpow2.f32 %v6018_v3 }
 0xaf6   :  { %v5962_v33 = vpop.xlane.xlu0 %5961 }
 0xafb   :  { %v5971_v52 = vpop.xlane.xlu1 %5970 }
 0xafc   :  { %v6007_v18 = vsub.f32 %v12565_v49, %v5971_v52 }
 0xafd   :  { %v5968_v56 = vpop.xlane.xlu0 %5967 }
 0xafe   :  { %v6028_v61 = vmul.f32 1.442695, %v6007_v18  ;;  %v6006_v57 = vsub.f32 %v12573_v10, %v5968_v56  ;;  %v12653_v18 = vpop.f32.mrf.mxu1 }
 0xaff   :  { %13799 = vst [vmem:[#allocation45_spill] sm:$0xff] %v12653_v18 }
 0xb00   :  { %v12644_v20 = vpop.eup %10643  ;;  %10647 = vpow2.f32 %v6028_v61  ;;  %v6026_v9 = vmul.f32 1.442695, %v6006_v57  ;;  %v10183_v57 = vpop.f32.mrf.mxu1 }
 0xb01   :  { %v6053_v34 = vsel %vm184_vm0, %v12644_v20, 0.0 }
 0xb02   :  { %10649 = vpow2.f32 %v6026_v9  ;;  %6054 = vadd.xlane.f32.xlu1 %v6053_v34  ;;  %v12648_v48 = vpop.eup %10645  ;;  %v5983_v3 = vpop.xlane.xlu1 %5982 }
 0xb03   :  { %v6011_v37 = vsub.f32 %v12589_v5, %v5983_v3  ;;  %v6050_v52 = vsel %vm184_vm0, %v12648_v48, 0.0  ;;  %v5365_v1 = vpop.f32.mrf.mxu1 }
 0xb04   :  { %6051 = vadd.xlane.f32.xlu0 %v6050_v52  ;;  %v5980_v56 = vpop.xlane.xlu0 %5979 }
 0xb05   :  { %v6036_v49 = vmul.f32 1.442695, %v6011_v37  ;;  %v6010_v61 = vsub.f32 %v5946_v54, %v5980_v56  ;;  %v10197_v3 = vpop.f32.mrf.mxu1  ;;  %v5731_v54 = vmul.f32 %v10183_v57, %v12513_v12 }
 0xb07   :  { %10651 = vpow2.f32 %v6036_v49  ;;  %v6034_v10 = vmul.f32 1.442695, %v6010_v61  ;;  %v5539_v56 = vpop.f32.mrf.mxu1  ;;  %v5829_v49 = vadd.f32 %v12614_v4, %v5731_v54 }
 0xb09   :  { %v5995_v17 = vpop.xlane.xlu1 %5994  ;;  %10653 = vpow2.f32 %v6034_v10  ;;  %v10211_v61 = vpop.f32.mrf.mxu1  ;;  %v6004_v10 = vsub.f32 %v12548_v23, %v5962_v33  ;;  %v6005_v23 = vsub.f32 %v12542_v47, %v12640_v24 }
 0xb0a   :  { %v6015_v58 = vsub.f32 %v5951_v29, %v5995_v17 }
 0xb0b   :  { %v5992_v9 = vpop.xlane.xlu0 %5991  ;;  %v6022_v33 = vmul.f32 1.442695, %v6004_v10  ;;  %v6024_v47 = vmul.f32 1.442695, %v6005_v23 }
 0xb0c   :  { %v6044_v34 = vmul.f32 1.442695, %v6015_v58  ;;  %v6014_v55 = vsub.f32 %v5950_v35, %v5992_v9  ;;  %v5730_v35 = vmul.f32 %v12513_v12, %v5365_v1  ;;  %v5927_v1 = vadd.f32 %v12618_v27, %v5829_v49 }
 0xb0d   :  { %v12655_v5 = vpop.eup %10647 }
 0xb0e   :  { %10655 = vpow2.f32 %v6044_v34  ;;  %v6042_v30 = vmul.f32 1.442695, %v6014_v55  ;;  %v6065_v52 = vsel %vm184_vm0, %v12655_v5, 0.0  ;;  %v5735_v55 = vmul.f32 %v10197_v3, %v12513_v12  ;;  %v5713_v34 = vpop.f32.mrf.mxu1 }
 0xb0f   :  { %v12659_v37 = vpop.eup %10649  ;;  %6066 = vadd.xlane.f32.xlu1 %v6065_v52  ;;  %v5828_v57 = vadd.f32 %v12616_v63, %v5730_v35  ;;  %v5739_v3 = vmul.f32 %v10211_v61, %v12513_v12  ;;  %v5738_v27 = vmul.f32 %v12513_v12, %v5713_v34 }
 0xb10   :  { %10657 = vpow2.f32 %v6042_v30  ;;  %v6062_v29 = vsel %vm184_vm0, %v12659_v37, 0.0  ;;  %v5734_v30 = vmul.f32 %v12513_v12, %v5539_v56  ;;  %v5833_v4 = vadd.f32 %v12622_v0, %v5735_v55 }
 0xb11   :  { %6063 = vadd.xlane.f32.xlu0 %v6062_v29  ;;  %v5926_v52 = vadd.f32 %v12620_v25, %v5828_v57  ;;  %v5945_v56 = vadd.f32 %v12519_v22, %v5927_v1  ;;  %v5837_v35 = vadd.f32 %v12630_v28, %v5739_v3  ;;  %10659 = vpow2.f32 %v6022_v33 }
 0xb12   :  { %v5832_v54 = vadd.f32 %v12624_v8, %v5734_v30  ;;  %v5931_v0 = vadd.f32 %v12626_v16, %v5833_v4  ;;  %v5836_v12 = vadd.f32 %v12632_v51, %v5738_v27  ;;  %10661 = vpow2.f32 %v6024_v47 }
 0xb13   :  { %v5944_v16 = vadd.f32 %v12519_v22, %v5926_v52  ;;  %v5935_v28 = vadd.f32 %v12634_v11, %v5837_v35  ;;  %v5975_v55 = vsel %vm184_vm0, %v5945_v56, -inf }
 0xb14   :  { %v12668_v17 = vpop.eup %10651  ;;  %v5930_v25 = vadd.f32 %v12628_v44, %v5832_v54  ;;  %v5949_v61 = vadd.f32 %v12519_v22, %v5931_v0  ;;  %v5934_v10 = vadd.f32 %v12636_v31, %v5836_v12 }
 0xb15   :  { %v6077_v58 = vsel %vm184_vm0, %v12668_v17, 0.0  ;;  %v5972_v44 = vsel %vm184_vm0, %v5944_v16, -inf  ;;  %v12708_v30 = vadd.f32 %v12519_v22, %v5935_v28 }
 0xb16   :  { %v12674_v9 = vpop.eup %10653  ;;  %6078 = vadd.xlane.f32.xlu1 %v6077_v58  ;;  %v5948_v51 = vadd.f32 %v12519_v22, %v5930_v25  ;;  %v5987_v57 = vsel %vm184_vm0, %v5949_v61, -inf  ;;  %v12712_v58 = vadd.f32 %v12519_v22, %v5934_v10 }
 0xb17   :  { %v6074_v63 = vsel %vm184_vm0, %v12674_v9, 0.0  ;;  %v5999_v31 = vsel %vm184_vm0, %v12708_v30, -inf }
 0xb18   :  { %6075 = vadd.xlane.f32.xlu0 %v6074_v63  ;;  %v5984_v11 = vsel %vm184_vm0, %v5948_v51, -inf  ;;  %v5996_v4 = vsel %vm184_vm0, %v12712_v58, -inf }
 0xb1b   :  { %v12686_v29 = vpop.eup %10655 }
 0xb1c   :  { %v6089_v24 = vsel %vm184_vm0, %v12686_v29, 0.0 }
 0xb1d   :  { %v12693_v49 = vpop.eup %10657  ;;  %6090 = vadd.xlane.f32.xlu1 %v6089_v24 }
 0xb1e   :  { %v6086_v8 = vsel %vm184_vm0, %v12693_v49, 0.0  ;;  %v12716_v1 = vpop.eup %10659 }
 0xb1f   :  { %6087 = vadd.xlane.f32.xlu0 %v6086_v8  ;;  %v6056_v34 = vsel %vm184_vm0, %v12716_v1, 0.0  ;;  %v12722_v3 = vpop.eup %10661 }
 0xb20   :  { %v6059_v22 = vsel %vm184_vm0, %v12722_v3, 0.0 }
 0xb21   :  { %5976 = vmax.xlane.f32.xlu1 %v5975_v55 }
 0xb23   :  { %5973 = vmax.xlane.f32.xlu0 %v5972_v44 }
 0xb25   :  { %5988 = vmax.xlane.f32.xlu1 %v5987_v57 }
 0xb27   :  { %5985 = vmax.xlane.f32.xlu0 %v5984_v11 }
 0xb29   :  { %6000 = vmax.xlane.f32.xlu1 %v5999_v31 }
 0xb2b   :  { %5997 = vmax.xlane.f32.xlu0 %v5996_v4 }
 0xb2d   :  { %6057 = vadd.xlane.f32.xlu1 %v6056_v34 }
 0xb31   :  { %6060 = vadd.xlane.f32.xlu1 %v6059_v22 }
 0xb41   :  { %6138 = vrot.lane.b32.xlu0 %v13769_v14, %s10869_s15 }
 0xb42   :  { %6232 = vrot.lane.b32.xlu1 %v11181_v45, %s10869_s15 }
 0xb8b   :  { %v6055_v23 = vpop.xlane.xlu1 %6054 }
 0xb8d   :  { %v6052_v33 = vpop.xlane.xlu0 %6051 }
 0xb8e   :  { %10663 = vrcp.f32 %v6052_v33 }
 0xb8f   :  { %10665 = vrcp.f32 %v6055_v23 }
 0xb98   :  { %v6067_v63 = vpop.xlane.xlu1 %6066 }
 0xb9a   :  { %v6064_v52 = vpop.xlane.xlu0 %6063 }
 0xb9b   :  { %10667 = vrcp.f32 %v6064_v52  ;;  %v10664_v4 = vpop.eup %10663 }
 0xb9c   :  { %v10666_v23 = vpop.eup %10665 }
 0xb9d   :  { %v6115_v33 = vmul.f32 %v10666_v23, %v12644_v20 }
 0xb9f   :  { %v12730_v54 = vpop.xlane.xlu1 %6078 }
 0xba1   :  { %v12732_v27 = vpop.xlane.xlu0 %6075 }
 0xba6   :  { %v12734_v0 = vpop.xlane.xlu1 %6090 }
 0xba8   :  { %v12736_v35 = vpop.xlane.xlu0 %6087 }
 0xbaa   :  { %v5977_v47 = vpop.xlane.xlu1 %5976 }
 0xbab   :  { %v6009_v24 = vsub.f32 %v5945_v56, %v5977_v47  ;;  %v6114_v56 = vmul.f32 %v10664_v4, %v12648_v48 }
 0xbac   :  { %v5974_v25 = vpop.xlane.xlu0 %5973 }
 0xbad   :  { %v6032_v12 = vmul.f32 1.442695, %v6009_v24  ;;  %v6008_v8 = vsub.f32 %v5944_v16, %v5974_v25 }
 0xbae   :  { %v5989_v28 = vpop.xlane.xlu1 %5988 }
 0xbaf   :  { %10669 = vpow2.f32 %v6032_v12  ;;  %v6030_v55 = vmul.f32 1.442695, %v6008_v8  ;;  %v6013_v10 = vsub.f32 %v5949_v61, %v5989_v28 }
 0xbb0   :  { %10671 = vrcp.f32 %v6067_v63  ;;  %v5986_v44 = vpop.xlane.xlu0 %5985  ;;  %v12744_v63 = vpack.c.bf16 %v6115_v33, %v6114_v56 }
 0xbb1   :  { %10673 = vpow2.f32 %v6030_v55  ;;  %v6040_v57 = vmul.f32 1.442695, %v6013_v10  ;;  %v6012_v11 = vsub.f32 %v5948_v51, %v5986_v44  ;;  %v10668_v51 = vpop.eup %10667 }
 0xbb2   :  { %v6001_v31 = vpop.xlane.xlu1 %6000  ;;  %v6118_v25 = vmul.f32 %v10668_v51, %v12659_v37 }
 0xbb3   :  { %10675 = vpow2.f32 %v6040_v57  ;;  %v6038_v34 = vmul.f32 1.442695, %v6012_v11  ;;  %v6017_v4 = vsub.f32 %v12708_v30, %v6001_v31 }
 0xbb4   :  { %v5998_v22 = vpop.xlane.xlu0 %5997 }
 0xbb5   :  { %10677 = vpow2.f32 %v6038_v34  ;;  %v6048_v34 = vmul.f32 1.442695, %v6017_v4 }
 0xbb6   :  { %v12739_v16 = vpop.xlane.xlu1 %6057 }
 0xbb8   :  { %v6139_v52 = vpop.permute.xlu0 %6138 }
 0xbb9   :  { %10213 = vmatpush3.bf16.msra.mxu0 %v6139_v52 }
 0xbba   :  { %v12742_v61 = vpop.xlane.xlu1 %6060  ;;  %10224 = vmatprep.subr.bf16.mxu0 %v13767_v41 }
 0xbbc   :  { %v12747_v47 = vpop.eup %10669  ;;  %10215 = vmatmul.mubr.msk.bf16.vlgmr.msra.gmra.mxu0 %vm184_vm0, %v12744_v63 }
 0xbbd   :  { %v10672_v24 = vpop.eup %10671  ;;  %v6071_v48 = vsel %vm184_vm0, %v12747_v47, 0.0  ;;  %10226 = vmatprep.mubr.msk.bf16.mxu0 %vm10863_vm1, %v13767_v41 }
 0xbbe   :  { %v12755_v20 = vpop.eup %10673  ;;  %6072 = vadd.xlane.f32.xlu1 %v6071_v48  ;;  %v6233_v12 = vpop.permute.xlu1 %6232  ;;  %v6119_v55 = vmul.f32 %v10672_v24, %v12655_v5  ;;  %v6016_v5 = vsub.f32 %v12712_v58, %v5998_v22 }
 0xbbf   :  { %10225 = vmatpush3.bf16.msra.mxu0 %v6233_v12  ;;  %v6068_v8 = vsel %vm184_vm0, %v12755_v20, 0.0 }
 0xbc0   :  { %v12760_v28 = vpop.eup %10675  ;;  %6069 = vadd.xlane.f32.xlu0 %v6068_v8  ;;  %10236 = vmatprep.subr.bf16.mxu0 %v13767_v41  ;;  %v12768_v37 = vpack.c.bf16 %v6119_v55, %v6118_v25  ;;  %v6046_v11 = vmul.f32 1.442695, %v6016_v5 }
 0xbc1   :  { %v6083_v10 = vsel %vm184_vm0, %v12760_v28, 0.0 }
 0xbc2   :  { %v12766_v44 = vpop.eup %10677  ;;  %6084 = vadd.xlane.f32.xlu1 %v6083_v10  ;;  %10679 = vpow2.f32 %v6046_v11 }
 0xbc3   :  { %v6080_v57 = vsel %vm184_vm0, %v12766_v44, 0.0  ;;  %10681 = vpow2.f32 %v6048_v34 }
 0xbc4   :  { %10227 = vmatmul.mubr.msk.bf16.vlgmr.msra.gmra.mxu0 %vm184_vm0, %v12768_v37  ;;  %10683 = vrcp.f32 %v12732_v27 }
 0xbc5   :  { %10238 = vmatprep.mubr.msk.bf16.mxu0 %vm10863_vm1, %v13767_v41  ;;  %10685 = vrcp.f32 %v12730_v54 }
 0xbc6   :  { %6081 = vadd.xlane.f32.xlu1 %v6080_v57  ;;  %10687 = vrcp.f32 %v12736_v35 }
 0xbc7   :  { %10689 = vrcp.f32 %v12734_v0 }
 0xbc8   :  { %10691 = vrcp.f32 %v12742_v61 }
 0xbc9   :  { %10693 = vrcp.f32 %v12739_v16  ;;  %v10774_v16 = vld [vmem:[%s13745_s5] sm:$0xff]  }
 0xbcf   :  { %v12782_v23 = vpop.eup %10679 }
 0xbd0   :  { %v6092_v56 = vsel %vm184_vm0, %v12782_v23, 0.0  ;;  %v12786_v33 = vpop.eup %10681 }
 0xbd1   :  { %v6095_v52 = vsel %vm184_vm0, %v12786_v33, 0.0  ;;  %v10684_v58 = vpop.eup %10683 }
 0xbd2   :  { %v10686_v22 = vpop.eup %10685  ;;  %v6122_v51 = vmul.f32 %v10684_v58, %v12674_v9 }
 0xbd3   :  { %v6123_v48 = vmul.f32 %v10686_v22, %v12668_v17  ;;  %v10688_v0 = vpop.eup %10687 }
 0xbd4   :  { %v10690_v35 = vpop.eup %10689  ;;  %v6126_v9 = vmul.f32 %v10688_v0, %v12693_v49 }
 0xbd5   :  { %v6134_v25 = vpack.c.bf16 %v6123_v48, %v6122_v51  ;;  %v6127_v17 = vmul.f32 %v10690_v35, %v12686_v29  ;;  %v10692_v8 = vpop.eup %10691 }
 0xbd6   :  { %6326 = vrot.lane.b32.xlu0 %v11530_v26, %s10869_s15  ;;  %v10694_v55 = vpop.eup %10693  ;;  %v6117_v49 = vmul.f32 %v10692_v8, %v12722_v3 }
 0xbd7   :  { %6420 = vrot.lane.b32.xlu1 %v11565_v53, %s10869_s15  ;;  %v6136_v12 = vpack.c.bf16 %v6127_v17, %v6126_v9  ;;  %v6116_v29 = vmul.f32 %v10694_v55, %v12716_v1 }
 0xbd9   :  { %v6131_v10 = vpack.c.bf16 %v6117_v49, %v6116_v29  ;;  %v13800_v29 = vld [vmem:[#allocation17_spill] sm:$0xff] }
 0xbf5   :  { %6093 = vadd.xlane.f32.xlu0 %v6092_v56 }
 0xbfb   :  { %6096 = vadd.xlane.f32.xlu1 %v6095_v52 }
 0xc0b   :  { %6926 = vrot.lane.b32.xlu0 %v11037_v32, %s10870_s16 }
 0xc0c   :  { %6928 = vrot.lane.b32.xlu1 %v11047_v39, %s10870_s16 }
 0xc0f   :  { %6185 = vrot.lane.b32.xlu0 %v13770_v38, %s10869_s15 }
 0xc10   :  { %6936 = vrot.lane.b32.xlu1 %v11081_v2, %s10870_s16 }
 0xc13   :  { %6930 = vrot.lane.b32.xlu0 %v11055_v46, %s10870_s16 }
 0xc14   :  { %6942 = vrot.lane.b32.xlu1 %v11101_v21, %s10870_s16 }
 0xc17   :  { %6932 = vrot.lane.b32.xlu0 %v11064_v50, %s10870_s16 }
 0xc1b   :  { %6934 = vrot.lane.b32.xlu0 %v11093_v13, %s10870_s16 }
 0xc1f   :  { %6279 = vrot.lane.b32.xlu0 %v11174_v40, %s10869_s15 }
 0xc23   :  { %6944 = vrot.lane.b32.xlu0 %v11114_v36, %s10870_s16 }
 0xc27   :  { %6950 = vrot.lane.b32.xlu0 %v11137_v62, %s10870_s16 }
 0xc2b   :  { %6952 = vrot.lane.b32.xlu0 %v11157_v19, %s10870_s16 }
 0xc47   :  { %v6073_v30 = vpop.xlane.xlu1 %6072 }
 0xc49   :  { %v6070_v31 = vpop.xlane.xlu0 %6069 }
 0xc4a   :  { %10695 = vrcp.f32 %v6070_v31 }
 0xc4b   :  { %v6085_v24 = vpop.xlane.xlu1 %6084  ;;  %10697 = vrcp.f32 %v6073_v30 }
 0xc4d   :  { %v6327_v27 = vpop.permute.xlu0 %6326 }
 0xc4e   :  { %10237 = vmatpush3.bf16.msra.mxu0 %v6327_v27 }
 0xc4f   :  { %v6082_v54 = vpop.xlane.xlu1 %6081  ;;  %10248 = vmatprep.subr.bf16.mxu0 %v13767_v41 }
 0xc50   :  { %10699 = vrcp.f32 %v6082_v54 }
 0xc51   :  { %10239 = vmatmul.mubr.msk.bf16.vlgmr.msra.gmra.mxu0 %vm184_vm0, %v6134_v25  ;;  %10701 = vrcp.f32 %v6085_v24 }
 0xc52   :  { %10250 = vmatprep.mubr.msk.bf16.mxu0 %vm10863_vm1, %v13767_v41 }
 0xc53   :  { %v6421_v61 = vpop.permute.xlu1 %6420 }
 0xc54   :  { %10249 = vmatpush3.bf16.msra.mxu0 %v6421_v61 }
 0xc55   :  { %10260 = vmatprep.subr.bf16.mxu0 %v10774_v16 }
 0xc57   :  { %v10696_v57 = vpop.eup %10695 }
 0xc58   :  { %v10698_v5 = vpop.eup %10697  ;;  %v6120_v11 = vmul.f32 %v10696_v57, %v12755_v20 }
 0xc59   :  { %10251 = vmatmul.mubr.msk.bf16.vlgmr.msra.gmra.mxu0 %vm184_vm0, %v6136_v12  ;;  %v6121_v4 = vmul.f32 %v10698_v5, %v12747_v47 }
 0xc5a   :  { %10262 = vmatprep.mubr.msk.bf16.mxu0 %vm184_vm0, %v12744_v63  ;;  %10261 = vmatpush3.bf16.msra.mxu0 %v10774_v16 }
 0xc5b   :  { %v6133_v63 = vpack.c.bf16 %v6121_v4, %v6120_v11 }
 0xc5d   :  { %v10700_v34 = vpop.eup %10699 }
 0xc5e   :  { %v10702_v3 = vpop.eup %10701  ;;  %v6124_v1 = vmul.f32 %v10700_v34, %v12766_v44 }
 0xc5f   :  { %v6125_v56 = vmul.f32 %v10702_v3, %v12760_v28 }
 0xc61   :  { %10263 = vmatmul.mubr.msk.bf16.vlgmr.msra.gmra.mxu0 %vm184_vm0, %v6131_v10  ;;  %v12845_v52 = vpack.c.bf16 %v6125_v56, %v6124_v1 }
 0xc62   :  { %10266 = vmatprep.mubr.msk.bf16.mxu0 %vm184_vm0, %v12768_v37 }
 0xc69   :  { %10267 = vmatmul.mubr.msk.bf16.gmra.mxu0 %vm184_vm0, %v6133_v63 }
 0xc6a   :  { %10270 = vmatprep.mubr.msk.bf16.mxu0 %vm184_vm0, %v6134_v25 }
 0xc71   :  { %10271 = vmatmul.mubr.msk.bf16.gmra.mxu0 %vm184_vm0, %v12845_v52 }
 0xc72   :  { %10274 = vmatprep.mubr.msk.bf16.mxu0 %vm184_vm0, %v6136_v12 }
 0xc7c   :  { %v12850_v20 = vpop.f32.mrf.mxu0 }
 0xc7e   :  { %v10216_v47 = vpop.f32.mrf.mxu0  ;;  %v6094_v37 = vpop.xlane.xlu0 %6093 }
 0xc7f   :  { %10703 = vrcp.f32 %v6094_v37 }
 0xc80   :  { %v12852_v30 = vpop.f32.mrf.mxu0 }
 0xc82   :  { %v10217_v58 = vpop.f32.mrf.mxu0  ;;  %v6927_v31 = vpop.permute.xlu0 %6926 }
 0xc83   :  { %6974 = vxpose.xlu1.b32.start [1/2] (short) (narrow) %v6927_v31, 16 }
 0xc84   :  { %v6097_v44 = vpop.xlane.xlu1 %6096  ;;  %v12854_v22 = vpop.f32.mrf.mxu0 }
 0xc85   :  { %10705 = vrcp.f32 %v6097_v44 }
 0xc86   :  { %v10228_v28 = vpop.f32.mrf.mxu0  ;;  %v6186_v51 = vpop.permute.xlu0 %6185 }
 0xc87   :  { %10219 = vmatpush3.bf16.msra.mxu1 %v6186_v51 }
 0xc88   :  { %v6929_v24 = vpop.permute.xlu1 %6928  ;;  %v12856_v48 = vpop.f32.mrf.mxu0  ;;  %10230 = vmatprep.subr.bf16.mxu1 %v13767_v41 }
 0xc89   :  { %6975 = vxpose.xlu1.b32.end [2/2] (short) (narrow) %v6929_v24, 16 }
 0xc8a   :  { %10221 = vmatmul.mubr.msk.bf16.vlgmr.msra.gmra.mxu1 %vm184_vm0, %v6131_v10  ;;  %v10229_v27 = vpop.f32.mrf.mxu0  ;;  %v6931_v54 = vpop.permute.xlu0 %6930 }
 0xc8b   :  { %7006 = vxpose.xlu0.b32.start [1/2] (short) (narrow) %v6931_v54, 16  ;;  %10232 = vmatprep.mubr.msk.bf16.mxu1 %vm10863_vm1, %v13767_v41  ;;  %v9403_v54 = vld [vmem:[%s13746_s6 + $0xb8] sm:$0xff] }
 0xc8c   :  { %v6937_v25 = vpop.permute.xlu1 %6936  ;;  %v10704_v35 = vpop.eup %10703 }
 0xc8d   :  { %v6128_v16 = vmul.f32 %v10704_v35, %v12782_v23 }
 0xc8e   :  { %v6933_v0 = vpop.permute.xlu0 %6932 }
 0xc8f   :  { %7007 = vxpose.xlu0.b32.end [2/2] (short) (narrow) %v6933_v0, 16 }
 0xc90   :  { %v6943_v9 = vpop.permute.xlu1 %6942 }
 0xc91   :  { %7102 = vxpose.xlu1.b32.start [1/2] (short) (narrow) %v6943_v9, 16 }
 0xc92   :  { %v10706_v61 = vpop.eup %10705  ;;  %v6935_v17 = vpop.permute.xlu0 %6934 }
 0xc93   :  { %7038 = vxpose.xlu0.b32.start [1/2] (short) (narrow) %v6935_v17, 16  ;;  %v6129_v12 = vmul.f32 %v10706_v61, %v12786_v33  ;;  %v12958_v17 = vld [vmem:[%s13744_s4] sm:$0xff] }
 0xc95   :  { %v12864_v8 = vpack.c.bf16 %v6129_v12, %v6128_v16 }
 0xc96   :  { %v6280_v55 = vpop.permute.xlu0 %6279 }
 0xc97   :  { %10275 = vmatmul.mubr.msk.bf16.gmra.mxu0 %vm184_vm0, %v12864_v8  ;;  %7039 = vxpose.xlu0.b32.end [2/2] (short) (narrow) %v6937_v25, 16 }
 0xc98   :  { %10231 = vmatpush3.bf16.msra.mxu1 %v6280_v55 }
 0xc99   :  { %10242 = vmatprep.subr.bf16.mxu1 %v13767_v41 }
 0xc9a   :  { %v6945_v49 = vpop.permute.xlu0 %6944 }
 0xc9b   :  { %10233 = vmatmul.mubr.msk.bf16.vlgmr.msra.gmra.mxu1 %vm184_vm0, %v6133_v63  ;;  %7103 = vxpose.xlu1.b32.end [2/2] (short) (narrow) %v6945_v49, 16  ;;  %v9401_v49 = vld [vmem:[%s13746_s6 + $0xa8] sm:$0xff] }
 0xc9c   :  { %10244 = vmatprep.mubr.msk.bf16.mxu1 %vm10863_vm1, %v13767_v41 }
 0xc9e   :  { %v6951_v23 = vpop.permute.xlu0 %6950 }
 0xc9f   :  { %7166 = vxpose.xlu0.b32.start [1/2] (short) (narrow) %v6951_v23, 16 }
 0xca2   :  { %v6953_v33 = vpop.permute.xlu0 %6952 }
 0xca3   :  { %7167 = vxpose.xlu0.b32.end [2/2] (short) (narrow) %v6953_v33, 16  ;;  %v9400_v33 = vld [vmem:[%s13746_s6 + $0xa0] sm:$0xff] }
 0xcb9   :  { %6373 = vrot.lane.b32.xlu1 %v11197_v60, %s10869_s15 }
 0xcbd   :  { %6467 = vrot.lane.b32.xlu1 %v11207_v7, %s10869_s15  ;;  %s9438_s15 = sld [smem:[#allocation8 + $0x3]] }
 0xcc1   :  { %7232 = vrot.lane.b32.xlu1 %v11047_v39, %s10871_s19 }
 0xcc5   :  { %7319 = vrot.lane.b32.xlu1 %v11064_v50, %s10871_s19 }
 0xcc9   :  { %6938 = vrot.lane.b32.xlu1 %v11095_v15, %s10870_s16 }
 0xccc   :  { %7230 = vrot.lane.b32.xlu0 %v11037_v32, %s10871_s19 }
 0xccd   :  { %6940 = vrot.lane.b32.xlu1 %v13768_v42, %s10870_s16 }
 0xcd0   :  { %7317 = vrot.lane.b32.xlu0 %v11055_v46, %s10871_s19 }
 0xcd1   :  { %6946 = vrot.lane.b32.xlu1 %v11133_v59, %s10870_s16 }
 0xcd4   :  { %7406 = vrot.lane.b32.xlu0 %v11081_v2, %s10871_s19 }
 0xcd5   :  { %6948 = vrot.lane.b32.xlu1 %v11179_v43, %s10870_s16 }
 0xcd8   :  { %7404 = vrot.lane.b32.xlu0 %v11093_v13, %s10871_s19 }
 0xcd9   :  { %6954 = vrot.lane.b32.xlu1 %v11205_v6, %s10870_s16 }
 0xcdc   :  { %7580 = vrot.lane.b32.xlu0 %v11114_v36, %s10871_s19 }
 0xcdd   :  { %6956 = vrot.lane.b32.xlu1 %v13800_v29, %s10870_s16 }
 0xce0   :  { %7578 = vrot.lane.b32.xlu0 %v11101_v21, %s10871_s19 }
 0xce1   :  { %7493 = vrot.lane.b32.xlu1 %v13768_v42, %s10871_s19 }
 0xce4   :  { %7754 = vrot.lane.b32.xlu0 %v11157_v19, %s10871_s19 }
 0xce5   :  { %7841 = vrot.lane.b32.xlu1 %v13800_v29, %s10871_s19 }
 0xce8   :  { %7752 = vrot.lane.b32.xlu0 %v11137_v62, %s10871_s19 }
 0xcec   :  { %7491 = vrot.lane.b32.xlu0 %v11095_v15, %s10871_s19 }
 0xcf0   :  { %7667 = vrot.lane.b32.xlu0 %v11179_v43, %s10871_s19 }
 0xcf4   :  { %7665 = vrot.lane.b32.xlu0 %v11133_v59, %s10871_s19 }
 0xcf8   :  { %7839 = vrot.lane.b32.xlu0 %v11205_v6, %s10871_s19 }
 0xd01   :  { %v6990_v10 = vpop.trf.xlu1 }
 0xd02   :  { %10322 = vmatprep.mubr.msk.f32.mxu0 %vm184_vm0, %v6990_v10 }
 0xd05   :  { %v6991_v34 = vpop.trf.xlu1 }
 0xd07   :  { %v12927_v3 = vpop.trf.xlu0 }
 0xd0b   :  { %v12933_v58 = vpop.trf.xlu0 }
 0xd0f   :  { %v12937_v44 = vpop.trf.xlu0 }
 0xd11   :  { %v12921_v57 = vpop.f32.mrf.mxu0 }
 0xd12   :  { %13801 = vst [vmem:[#allocation17_spill] sm:$0xff] %v12921_v57 }
 0xd13   :  { %v10240_v5 = vpop.f32.mrf.mxu0  ;;  %v12931_v37 = vpop.trf.xlu1 }
 0xd14   :  { %v12941_v27 = vpop.trf.xlu0 }
 0xd15   :  { %v12923_v11 = vpop.f32.mrf.mxu0 }
 0xd16   :  { %13802 = vst [vmem:[#allocation46_spill] sm:$0xff] %v12923_v11 }
 0xd17   :  { %v10241_v4 = vpop.f32.mrf.mxu0  ;;  %v12935_v31 = vpop.trf.xlu1 }
 0xd19   :  { %v12925_v63 = vpop.f32.mrf.mxu0 }
 0xd1a   :  { %13803 = vst [vmem:[#allocation47_spill] sm:$0xff] %v12925_v63 }
 0xd1b   :  { %v10252_v1 = vpop.f32.mrf.mxu0  ;;  %v12953_v35 = vpop.trf.xlu0 }
 0xd1c   :  { %v9398_v1 = vld [vmem:[%s13746_s6 + $0x90] sm:$0xff] }
 0xd1d   :  { %v12929_v56 = vpop.f32.mrf.mxu0 }
 0xd1e   :  { %13804 = vst [vmem:[#allocation48_spill] sm:$0xff] %v12929_v56 }
 0xd1f   :  { %v10253_v47 = vpop.f32.mrf.mxu0  ;;  %v12972_v23 = vpop.trf.xlu0 }
 0xd21   :  { %v12939_v28 = vpop.f32.mrf.mxu0 }
 0xd23   :  { %v6548_v51 = vpop.f32.mrf.mxu0 }
 0xd24   :  { %v6611_v16 = vmul.f32 %v12958_v17, %v6548_v51 }
 0xd25   :  { %v12947_v25 = vpop.f32.mrf.mxu0 }
 0xd27   :  { %v6551_v9 = vpop.f32.mrf.mxu0 }
 0xd29   :  { %v12964_v12 = vpop.f32.mrf.mxu0 }
 0xd2b   :  { %v6374_v24 = vpop.permute.xlu1 %6373  ;;  %v6564_v10 = vpop.f32.mrf.mxu0 }
 0xd2c   :  { %10243 = vmatpush3.bf16.msra.mxu1 %v6374_v24  ;;  %v9397_v24 = vld [vmem:[%s13746_s6 + $0x88] sm:$0xff] }
 0xd2d   :  { %10254 = vmatprep.subr.bf16.mxu1 %v13767_v41  ;;  %v12983_v47 = vpop.f32.mrf.mxu0 }
 0xd2f   :  { %10245 = vmatmul.mubr.msk.bf16.vlgmr.msra.gmra.mxu1 %vm184_vm0, %v12845_v52  ;;  %v6468_v0 = vpop.permute.xlu1 %6467  ;;  %v9402_v52 = vld [vmem:[%s13746_s6 + $0xb0] sm:$0xff] }
 0xd30   :  { %10255 = vmatpush3.bf16.msra.mxu1 %v6468_v0  ;;  %10256 = vmatprep.mubr.msk.bf16.mxu1 %vm10863_vm1, %v13767_v41  ;;  %v6567_v0 = vpop.f32.mrf.mxu0 }
 0xd31   :  { %10278 = vmatprep.subr.mxu1 %v9403_v54 }
 0xd33   :  { %v7233_v61 = vpop.permute.xlu1 %7232 }
 0xd34   :  { %10318 = vmatprep.subr.mxu0 %v7233_v61 }
 0xd35   :  { %10319 = vmatpush3.msra.mxu0 %v7233_v61 }
 0xd37   :  { %10257 = vmatmul.mubr.msk.bf16.vlgmr.msra.gmra.mxu1 %vm184_vm0, %v12864_v8  ;;  %v7320_v55 = vpop.permute.xlu1 %7319  ;;  %v9399_v8 = vld [vmem:[%s13746_s6 + $0x98] sm:$0xff] }
 0xd38   :  { %10279 = vmatpush3.msra.mxu1 %v9403_v54  ;;  %10294 = vmatprep.mubr.msk.f32.mxu1 %vm2283_vm2, %v6611_v16  ;;  %v9396_v16 = vld [vmem:[%s13746_s6 + $0x80] sm:$0xff] }
 0xd39   :  { %10280 = vmatprep.subr.mxu1 %v9402_v52 }
 0xd3a   :  { %10281 = vmatpush3.msra.mxu1 %v9402_v52  ;;  %v12997_v52 = vld [vmem:[%s13744_s4 + $0x8] sm:$0xff] }
 0xd3b   :  { %10282 = vmatprep.subr.mxu1 %v9401_v49  ;;  %v6939_v5 = vpop.permute.xlu1 %6938 }
 0xd3c   :  { %10283 = vmatpush3.msra.mxu1 %v9401_v49  ;;  %7070 = vxpose.xlu1.b32.start [1/2] (short) (narrow) %v6939_v5, 16  ;;  %v10272_v5 = vpop.f32.mrf.mxu0 }
 0xd3d   :  { %10284 = vmatprep.subr.mxu1 %v9400_v33 }
 0xd3e   :  { %10285 = vmatpush3.msra.mxu1 %v9400_v33  ;;  %v7231_v4 = vpop.permute.xlu0 %7230  ;;  %v6613_v33 = vmul.f32 %v12958_v17, %v12939_v28 }
 0xd3f   :  { %10286 = vmatprep.subr.mxu1 %v9399_v8  ;;  %v6941_v51 = vpop.permute.xlu1 %6940  ;;  %10320 = vmatprep.subr.mxu0 %v7231_v4 }
 0xd40   :  { %10287 = vmatpush3.msra.mxu1 %v9399_v8  ;;  %7071 = vxpose.xlu1.b32.end [2/2] (short) (narrow) %v6941_v51, 16  ;;  %v6615_v8 = vmul.f32 %v12958_v17, %v6564_v10 }
 0xd41   :  { %10288 = vmatprep.subr.mxu1 %v9398_v1  ;;  %10321 = vmatpush3.msra.mxu0 %v7231_v4  ;;  %v6580_v4 = vpop.f32.mrf.mxu0 }
 0xd42   :  { %10289 = vmatpush3.msra.mxu1 %v9398_v1  ;;  %10323 = vmatmul.mubr.msk.f32.vlgmr.msra.gmra.mxu0 %vm184_vm0, %v6991_v34  ;;  %v7318_v54 = vpop.permute.xlu0 %7317  ;;  %v6612_v34 = vmul.f32 %v12997_v52, %v6551_v9 }
 0xd43   :  { %10325 = vmatprep.subr.mxu0 %v7320_v55  ;;  %10290 = vmatprep.subr.mxu1 %v9397_v24  ;;  %v6947_v61 = vpop.permute.xlu1 %6946  ;;  %v10273_v10 = vpop.f32.mrf.mxu0 }
 0xd44   :  { %10326 = vmatpush3.msra.mxu0 %v7320_v55  ;;  %10329 = vmatprep.mubr.msk.f32.mxu0 %vm184_vm0, %v12927_v3  ;;  %v6614_v3 = vmul.f32 %v12997_v52, %v12947_v25 }
 0xd45   :  { %10291 = vmatpush3.msra.mxu1 %v9397_v24  ;;  %10327 = vmatprep.subr.mxu0 %v7318_v54  ;;  %v6617_v24 = vmul.f32 %v12958_v17, %v12964_v12 }
 0xd46   :  { %10292 = vmatprep.subr.mxu1 %v9396_v16  ;;  %7134 = vxpose.xlu0.b32.start [1/2] (short) (narrow) %v6947_v61, 16  ;;  %v7407_v49 = vpop.permute.xlu0 %7406 }
 0xd47   :  { %10328 = vmatpush3.msra.mxu0 %v7318_v54  ;;  %10293 = vmatpush3.msra.mxu1 %v9396_v16  ;;  %v6949_v55 = vpop.permute.xlu1 %6948  ;;  %v6619_v16 = vmul.f32 %v12958_v17, %v6580_v4 }
 0xd48   :  { %10330 = vmatmul.mubr.msk.f32.vlgmr.msra.gmra.mxu0 %vm184_vm0, %v12933_v58  ;;  %10295 = vmatmul.mubr.msk.f32.vlgmr.msra.gmra.mxu1 %vm2283_vm2, %v6612_v34  ;;  %v6583_v34 = vpop.f32.mrf.mxu0 }
 0xd49   :  { %10336 = vmatprep.mubr.msk.f32.mxu0 %vm184_vm0, %v12937_v44  ;;  %10297 = vmatprep.mubr.msk.f32.mxu1 %vm2283_vm2, %v6613_v33  ;;  %v6616_v44 = vmul.f32 %v12997_v52, %v6567_v0  ;;  %v6618_v0 = vmul.f32 %v12997_v52, %v12983_v47 }
 0xd4a   :  { %10332 = vmatprep.subr.mxu0 %v7407_v49  ;;  %7135 = vxpose.xlu0.b32.end [2/2] (short) (narrow) %v6949_v55, 16  ;;  %v13010_v28 = vpop.f32.mrf.mxu1  ;;  %v7405_v9 = vpop.permute.xlu0 %7404 }
 0xd4b   :  { %10333 = vmatpush3.msra.mxu0 %v7407_v49  ;;  %v6955_v58 = vpop.permute.xlu1 %6954  ;;  %v6621_v49 = vmul.f32 %v12958_v17, %v10272_v5 }
 0xd4c   :  { %10298 = vmatmul.mubr.msk.f32.gmra.mxu1 %vm2283_vm2, %v6614_v3  ;;  %10334 = vmatprep.subr.mxu0 %v7405_v9  ;;  %v10222_v1 = vpop.f32.mrf.mxu1  ;;  %v6622_v3 = vmul.f32 %v12997_v52, %v10273_v10 }
 0xd4d   :  { %10300 = vmatprep.mubr.msk.f32.mxu1 %vm2283_vm2, %v6615_v8  ;;  %7198 = vxpose.xlu1.b32.start [1/2] (short) (narrow) %v6955_v58, 16 }
 0xd4e   :  { %10335 = vmatpush3.msra.mxu0 %v7405_v9  ;;  %v13016_v25 = vpop.f32.mrf.mxu1  ;;  %v7581_v51 = vpop.permute.xlu0 %7580 }
 0xd4f   :  { %10337 = vmatmul.mubr.msk.f32.vlgmr.msra.gmra.mxu0 %vm184_vm0, %v12941_v27  ;;  %v6957_v54 = vpop.permute.xlu1 %6956  ;;  %10346 = vmatprep.subr.mxu0 %v7581_v51 }
 0xd50   :  { %10301 = vmatmul.mubr.msk.f32.gmra.mxu1 %vm2283_vm2, %v6616_v44  ;;  %10350 = vmatprep.mubr.msk.f32.mxu0 %vm184_vm0, %v12931_v37  ;;  %v10223_v61 = vpop.f32.mrf.mxu1  ;;  %v6620_v37 = vmul.f32 %v12997_v52, %v6583_v34 }
 0xd51   :  { %10303 = vmatprep.mubr.msk.f32.mxu1 %vm2283_vm2, %v6617_v24  ;;  %7199 = vxpose.xlu1.b32.end [2/2] (short) (narrow) %v6957_v54, 16  ;;  %v8043_v61 = vstv %s9438_s15 }
 0xd52   :  { %10347 = vmatpush3.msra.mxu0 %v7581_v51  ;;  %v7579_v12 = vpop.permute.xlu0 %7578  ;;  %v8049_v34 = vmul.f32 %v8043_v61, %v11081_v2 }
 0xd53   :  { %v7494_v27 = vpop.permute.xlu1 %7493  ;;  %10348 = vmatprep.subr.mxu0 %v7579_v12 }
 0xd54   :  { %10304 = vmatmul.mubr.msk.f32.gmra.mxu1 %vm2283_vm2, %v6618_v0  ;;  %10339 = vmatprep.subr.mxu1 %v7494_v27 }
 0xd55   :  { %10306 = vmatprep.mubr.msk.f32.mxu1 %vm2283_vm2, %v6619_v16  ;;  %10349 = vmatpush3.msra.mxu0 %v7579_v12  ;;  %v8044_v12 = vmul.f32 %v8043_v61, %v11037_v32  ;;  %v8045_v16 = vmul.f32 %v8043_v61, %v11047_v39 }
 0xd56   :  { %10340 = vmatpush3.msra.mxu1 %v7494_v27  ;;  %10351 = vmatmul.mubr.msk.f32.vlgmr.msra.gmra.mxu0 %vm184_vm0, %v12935_v31  ;;  %v7755_v47 = vpop.permute.xlu0 %7754 }
 0xd57   :  { %10364 = vmatprep.mubr.msk.f32.mxu0 %vm184_vm0, %v12953_v35  ;;  %v10276_v33 = vpop.f32.mrf.mxu0  ;;  %10360 = vmatprep.subr.mxu0 %v7755_v47 }
 0xd58   :  { %10307 = vmatmul.mubr.msk.f32.gmra.mxu1 %vm2283_vm2, %v6620_v37  ;;  %10361 = vmatpush3.msra.mxu0 %v7755_v47  ;;  %v6625_v44 = vmul.f32 %v12958_v17, %v10276_v33  ;;  %v8048_v37 = vmul.f32 %v8043_v61, %v11093_v13 }
 0xd59   :  { %10309 = vmatprep.mubr.msk.f32.mxu1 %vm2283_vm2, %v6621_v49  ;;  %v6596_v55 = vpop.f32.mrf.mxu0  ;;  %v8052_v49 = vmul.f32 %v8043_v61, %v11101_v21 }
 0xd5a   :  { %v6623_v9 = vmul.f32 %v12958_v17, %v6596_v55  ;;  %v7753_v8 = vpop.permute.xlu0 %7752  ;;  %v7945_v17 = vstv %s9437_s14  ;;  %v8056_v55 = vmul.f32 %v8043_v61, %v11137_v62 }
 0xd5b   :  { %v13041_v31 = vpop.f32.mrf.mxu1  ;;  %v10277_v4 = vpop.f32.mrf.mxu0  ;;  %10362 = vmatprep.subr.mxu0 %v7753_v8  ;;  %v7946_v54 = vmul.f32 %v7945_v17, %v11037_v32  ;;  %v7947_v0 = vmul.f32 %v7945_v17, %v11047_v39  ;;  %v7950_v27 = vmul.f32 %v7945_v17, %v11093_v13  ;;  %v7955_v32 = vmul.f32 %v7945_v17, %v11114_v36 }
 0xd5c   :  { %10310 = vmatmul.mubr.msk.f32.gmra.mxu1 %vm2283_vm2, %v6622_v3  ;;  %10363 = vmatpush3.msra.mxu0 %v7753_v8  ;;  %v8053_v39 = vmul.f32 %v8043_v61, %v11114_v36  ;;  %v7954_v47 = vmul.f32 %v7945_v17, %v11101_v21  ;;  %v8057_v13 = vmul.f32 %v8043_v61, %v11157_v19 }
 0xd5d   :  { %v10234_v35 = vpop.f32.mrf.mxu1  ;;  %10312 = vmatprep.mubr.msk.f32.mxu1 %vm2283_vm2, %v6623_v9  ;;  %v6599_v5 = vpop.f32.mrf.mxu0  ;;  %10365 = vmatmul.mubr.msk.f32.vlgmr.msra.gmra.mxu0 %vm184_vm0, %v12972_v23  ;;  %v6626_v23 = vmul.f32 %v12997_v52, %v10277_v4  ;;  %v7958_v33 = vmul.f32 %v7945_v17, %v11137_v62  ;;  %v7949_v36 = vmul.f32 %v7945_v17, %v11064_v50 }
 0xd5e   :  { %v6624_v58 = vmul.f32 %v12997_v52, %v6599_v5  ;;  %v7492_v1 = vpop.permute.xlu0 %7491  ;;  %10374 = vmatprep.subr.bf16.mxu0 %v13767_v41  ;;  %10376 = vmatprep.mubr.msk.bf16.mxu0 %vm10863_vm1, %v13767_v41  ;;  %v7951_v52 = vmul.f32 %v7945_v17, %v11081_v2  ;;  %v7959_v2 = vmul.f32 %v7945_v17, %v11157_v19 }
 0xd5f   :  { %v13052_v51 = vpop.f32.mrf.mxu1  ;;  %10341 = vmatprep.subr.mxu1 %v7492_v1  ;;  %v8047_v21 = vmul.f32 %v8043_v61, %v11064_v50  ;;  %v7948_v3 = vmul.f32 %v7945_v17, %v11055_v46  ;;  %v7953_v19 = vmul.f32 %v7945_v17, %v13768_v42  ;;  %v8046_v9 = vmul.f32 %v8043_v61, %v11055_v46 }
 0xd60   :  { %10313 = vmatmul.mubr.msk.f32.gmra.mxu1 %vm2283_vm2, %v6624_v58  ;;  %v8051_v62 = vmul.f32 %v8043_v61, %v13768_v42  ;;  %v7952_v8 = vmul.f32 %v7945_v17, %v11095_v15  ;;  %v7957_v50 = vmul.f32 %v7945_v17, %v11179_v43  ;;  %v8050_v4 = vmul.f32 %v8043_v61, %v11095_v15 }
 0xd61   :  { %v10235_v24 = vpop.f32.mrf.mxu1  ;;  %10342 = vmatpush3.msra.mxu1 %v7492_v1  ;;  %10315 = vmatprep.mubr.msk.f32.mxu1 %vm2283_vm2, %v6625_v44  ;;  %v8055_v46 = vmul.f32 %v8043_v61, %v11179_v43  ;;  %v7956_v35 = vmul.f32 %v7945_v17, %v11133_v59  ;;  %v7961_v42 = vmul.f32 %v7945_v17, %v13800_v29  ;;  %v7842_v1 = vpop.permute.xlu1 %7841 }
 0xd62   :  { %v13057_v10 = vpop.permute.xlu0 %7667  ;;  %v8054_v5 = vmul.f32 %v8043_v61, %v11133_v59  ;;  %v8059_v15 = vmul.f32 %v8043_v61, %v13800_v29  ;;  %v7960_v58 = vmul.f32 %v7945_v17, %v11205_v6  ;;  %v8058_v43 = vmul.f32 %v8043_v61, %v11205_v6 }
 0xd63   :  { %10353 = vmatprep.subr.mxu1 %v13057_v10 }
 0xd64   :  { %10316 = vmatmul.mubr.msk.f32.gmra.mxu1 %vm2283_vm2, %v6626_v23 }
 0xd66   :  { %v7666_v44 = vpop.permute.xlu0 %7665 }
 0xd6a   :  { %v7840_v23 = vpop.permute.xlu0 %7839 }
 0xd6f   :  { %7978 = vrot.lane.b32.xlu1 %v7946_v54, %s10870_s16 }
 0xd73   :  { %7980 = vrot.lane.b32.xlu0 %v7947_v0, %s10870_s16  ;;  %8076 = vrot.lane.b32.xlu1 %v8044_v12, %s10871_s19 }
 0xd77   :  { %7988 = vrot.lane.b32.xlu0 %v7951_v52, %s10870_s16  ;;  %8078 = vrot.lane.b32.xlu1 %v8045_v16, %s10871_s19 }
 0xd7b   :  { %8086 = vrot.lane.b32.xlu0 %v8049_v34, %s10871_s19  ;;  %7986 = vrot.lane.b32.xlu1 %v7950_v27, %s10870_s16 }
 0xd7f   :  { %7996 = vrot.lane.b32.xlu0 %v7955_v32, %s10870_s16  ;;  %8084 = vrot.lane.b32.xlu1 %v8048_v37, %s10871_s19 }
 0xd83   :  { %8094 = vrot.lane.b32.xlu0 %v8053_v39, %s10871_s19  ;;  %7994 = vrot.lane.b32.xlu1 %v7954_v47, %s10870_s16 }
 0xd87   :  { %8004 = vrot.lane.b32.xlu0 %v7959_v2, %s10870_s16  ;;  %8092 = vrot.lane.b32.xlu1 %v8052_v49, %s10871_s19 }
 0xd8b   :  { %8102 = vrot.lane.b32.xlu0 %v8057_v13, %s10871_s19  ;;  %8002 = vrot.lane.b32.xlu1 %v7958_v33, %s10870_s16 }
 0xd8f   :  { %7984 = vrot.lane.b32.xlu0 %v7949_v36, %s10870_s16  ;;  %8100 = vrot.lane.b32.xlu1 %v8056_v55, %s10871_s19 }
 0xd93   :  { %8082 = vrot.lane.b32.xlu0 %v8047_v21, %s10871_s19  ;;  %7982 = vrot.lane.b32.xlu1 %v7948_v3, %s10870_s16 }
 0xd97   :  { %7992 = vrot.lane.b32.xlu0 %v7953_v19, %s10870_s16  ;;  %8080 = vrot.lane.b32.xlu1 %v8046_v9, %s10871_s19 }
 0xd9b   :  { %8090 = vrot.lane.b32.xlu0 %v8051_v62, %s10871_s19  ;;  %7990 = vrot.lane.b32.xlu1 %v7952_v8, %s10870_s16 }
 0xd9f   :  { %8000 = vrot.lane.b32.xlu0 %v7957_v50, %s10870_s16  ;;  %8088 = vrot.lane.b32.xlu1 %v8050_v4, %s10871_s19 }
 0xda3   :  { %8098 = vrot.lane.b32.xlu0 %v8055_v46, %s10871_s19  ;;  %7998 = vrot.lane.b32.xlu1 %v7956_v35, %s10870_s16 }
 0xda7   :  { %8008 = vrot.lane.b32.xlu0 %v7961_v42, %s10870_s16  ;;  %8096 = vrot.lane.b32.xlu1 %v8054_v5, %s10871_s19 }
 0xdab   :  { %8106 = vrot.lane.b32.xlu0 %v8059_v15, %s10871_s19  ;;  %8006 = vrot.lane.b32.xlu1 %v7960_v58, %s10870_s16  ;;  %s9436_s16 = sld [smem:[#allocation3 + $0x3]]  ;;  %v13169_v58 = vstv %s9439_s17 }
 0xdaf   :  { %8104 = vrot.lane.b32.xlu1 %v8058_v43, %s10871_s19  ;;  %s10873_s19 = smov 4  }
 0xdb1   :  { %v13163_v8 = vstv %s9436_s16 }
 0xdb8   :  { %v7086_v24 = vpop.trf.xlu1 }
 0xdb9   :  { %10343 = vmatprep.mubr.msk.f32.mxu1 %vm184_vm0, %v7086_v24 }
 0xdbc   :  { %v7087_v59 = vpop.trf.xlu1 }
 0xdbd   :  { %10344 = vmatmul.mubr.msk.f32.vlgmr.msra.gmra.mxu1 %vm184_vm0, %v7087_v59 }
 0xdbe   :  { %10354 = vmatpush3.msra.mxu1 %v13057_v10 }
 0xdbf   :  { %10355 = vmatprep.subr.mxu1 %v7666_v44 }
 0xdc0   :  { %10356 = vmatpush3.msra.mxu1 %v7666_v44 }
 0xdc1   :  { %10367 = vmatprep.subr.mxu1 %v7842_v1 }
 0xdc2   :  { %v7150_v29 = vpop.trf.xlu0 }
 0xdc3   :  { %10357 = vmatprep.mubr.msk.f32.mxu1 %vm184_vm0, %v7150_v29 }
 0xdc6   :  { %v7151_v6 = vpop.trf.xlu0 }
 0xdc7   :  { %10358 = vmatmul.mubr.msk.f32.vlgmr.msra.gmra.mxu1 %vm184_vm0, %v7151_v6 }
 0xdc8   :  { %10368 = vmatpush3.msra.mxu1 %v7842_v1 }
 0xdc9   :  { %10369 = vmatprep.subr.mxu1 %v7840_v23  ;;  %v7214_v17 = vpop.trf.xlu1 }
 0xdca   :  { %10370 = vmatpush3.msra.mxu1 %v7840_v23  ;;  %10371 = vmatprep.mubr.msk.f32.mxu1 %vm184_vm0, %v7214_v17 }
 0xdcb   :  { %10380 = vmatprep.subr.bf16.mxu1 %v13767_v41 }
 0xdcd   :  { %v7215_v54 = vpop.trf.xlu1 }
 0xdce   :  { %10372 = vmatmul.mubr.msk.f32.vlgmr.msra.gmra.mxu1 %vm184_vm0, %v7215_v54 }
 0xdcf   :  { %10382 = vmatprep.mubr.msk.bf16.mxu1 %vm10863_vm1, %v13767_v41 }
 0xde1   :  { %v7979_v10 = vpop.permute.xlu1 %7978 }
 0xde5   :  { %v7981_v61 = vpop.permute.xlu0 %7980  ;;  %v8077_v0 = vpop.permute.xlu1 %8076 }
 0xde9   :  { %v7989_v12 = vpop.permute.xlu0 %7988  ;;  %v8079_v52 = vpop.permute.xlu1 %8078 }
 0xded   :  { %v13135_v16 = vpop.permute.xlu0 %8086  ;;  %v13137_v34 = vpop.permute.xlu1 %7986 }
 0xdef   :  { %v13139_v27 = vpop.f32.mrf.mxu1 }
 0xdf1   :  { %v13141_v32 = vpop.permute.xlu0 %7996  ;;  %v13143_v37 = vpop.permute.xlu1 %8084 }
 0xdf2   :  { %v10246_v39 = vpop.f32.mrf.mxu1 }
 0xdf4   :  { %v13145_v47 = vpop.f32.mrf.mxu1 }
 0xdf5   :  { %v13147_v2 = vpop.permute.xlu0 %8094  ;;  %v13149_v49 = vpop.permute.xlu1 %7994 }
 0xdf6   :  { %v10247_v13 = vpop.f32.mrf.mxu1 }
 0xdf8   :  { %v13151_v33 = vpop.f32.mrf.mxu1 }
 0xdf9   :  { %13805 = vst [vmem:[#allocation49_spill] sm:$0xff] %v13151_v33  ;;  %v13153_v36 = vpop.permute.xlu1 %8092  ;;  %v13155_v55 = vpop.permute.xlu0 %8004 }
 0xdfa   :  { %v10258_v21 = vpop.f32.mrf.mxu1 }
 0xdfc   :  { %v13157_v3 = vpop.f32.mrf.mxu1 }
 0xdfd   :  { %v13159_v19 = vpop.permute.xlu1 %8002  ;;  %v13161_v62 = vpop.permute.xlu0 %8102 }
 0xdfe   :  { %v10259_v9 = vpop.f32.mrf.mxu1 }
 0xe01   :  { %v13165_v50 = vpop.permute.xlu1 %8100  ;;  %v7985_v15 = vpop.permute.xlu0 %7984 }
 0xe02   :  { %v10324_v4 = vpop.f32.mrf.mxu0 }
 0xe03   :  { %v7929_v46 = vmul.f32 %v10324_v4, %v13163_v8 }
 0xe04   :  { %v7308_v35 = vpop.f32.mrf.mxu0 }
 0xe05   :  { %v8027_v42 = vadd.f32 %v7981_v61, %v7929_v46  ;;  %v7928_v5 = vmul.f32 %v13163_v8, %v7308_v35  ;;  %v7983_v44 = vpop.permute.xlu1 %7982 }
 0xe07   :  { %v8125_v43 = vadd.f32 %v8079_v52, %v8027_v42  ;;  %v8026_v1 = vadd.f32 %v7979_v10, %v7928_v5  ;;  %v8083_v10 = vpop.permute.xlu0 %8082 }
 0xe08   :  { %v10331_v24 = vpop.f32.mrf.mxu0  ;;  %v13171_v59 = vpop.f32.mrf.mxu1 }
 0xe09   :  { %v8124_v23 = vadd.f32 %v8077_v0, %v8026_v1  ;;  %v7931_v29 = vmul.f32 %v10331_v24, %v13163_v8  ;;  %v13175_v6 = vadd.f32 %v13169_v58, %v8125_v43  ;;  %v8081_v4 = vpop.permute.xlu1 %8080 }
 0xe0a   :  { %v7395_v17 = vpop.f32.mrf.mxu0  ;;  %v13177_v54 = vpop.f32.mrf.mxu1 }
 0xe0b   :  { %v8029_v61 = vadd.f32 %v7985_v15, %v7931_v29  ;;  %v7930_v39 = vmul.f32 %v13163_v8, %v7395_v17  ;;  %v8161_v52 = vsel %vm184_vm0, %v13175_v6, -inf  ;;  %v13185_v0 = vadd.f32 %v13169_v58, %v8124_v23 }
 0xe0c   :  { %v13182_v13 = vpop.f32.mrf.mxu1  ;;  %8162 = vmax.xlane.f32.xlu0 %v8161_v52 }
 0xe0d   :  { %v8127_v21 = vadd.f32 %v8083_v10, %v8029_v61  ;;  %v8028_v9 = vadd.f32 %v7983_v44, %v7930_v39  ;;  %v8158_v35 = vsel %vm184_vm0, %v13185_v0, -inf }
 0xe0e   :  { %v13187_v46 = vpop.f32.mrf.mxu1  ;;  %8159 = vmax.xlane.f32.xlu1 %v8158_v35 }
 0xe0f   :  { %v8126_v42 = vadd.f32 %v8081_v4, %v8028_v9  ;;  %v10338_v5 = vpop.f32.mrf.mxu0  ;;  %v13192_v15 = vadd.f32 %v13169_v58, %v8127_v21 }
 0xe10   :  { %v7933_v43 = vmul.f32 %v10338_v5, %v13163_v8  ;;  %v13195_v1 = vpop.f32.mrf.mxu1 }
 0xe11   :  { %v7482_v24 = vpop.f32.mrf.mxu0  ;;  %v13198_v23 = vadd.f32 %v13169_v58, %v8126_v42  ;;  %v8167_v61 = vsel %vm184_vm0, %v13192_v15, -inf }
 0xe12   :  { %v8031_v44 = vadd.f32 %v7989_v12, %v7933_v43  ;;  %v7932_v29 = vmul.f32 %v13163_v8, %v7482_v24  ;;  %v13201_v17 = vpop.f32.mrf.mxu1  ;;  %8168 = vmax.xlane.f32.xlu1 %v8167_v61 }
 0xe13   :  { %v8164_v39 = vsel %vm184_vm0, %v13198_v23, -inf }
 0xe14   :  { %v8129_v52 = vadd.f32 %v13135_v16, %v8031_v44  ;;  %v8030_v10 = vadd.f32 %v13137_v34, %v7932_v29  ;;  %8165 = vmax.xlane.f32.xlu0 %v8164_v39  ;;  %v13209_v21 = vpop.f32.mrf.mxu1 }
 0xe16   :  { %v8128_v12 = vadd.f32 %v13143_v37, %v8030_v10  ;;  %v13212_v9 = vpop.f32.mrf.mxu1  ;;  %v13215_v4 = vadd.f32 %v13169_v58, %v8129_v52  ;;  %v10352_v35 = vpop.f32.mrf.mxu0 }
 0xe17   :  { %13806 = vst [vmem:[#allocation50_spill] sm:$0xff] %v13212_v9  ;;  %v7937_v42 = vmul.f32 %v10352_v35, %v13163_v8 }
 0xe18   :  { %v13218_v5 = vpop.f32.mrf.mxu1  ;;  %v8173_v16 = vsel %vm184_vm0, %v13215_v4, -inf  ;;  %v13223_v34 = vadd.f32 %v13169_v58, %v8128_v12  ;;  %v7656_v43 = vpop.f32.mrf.mxu0 }
 0xe19   :  { %13807 = vst [vmem:[#allocation51_spill] sm:$0xff] %v13218_v5  ;;  %8174 = vmax.xlane.f32.xlu1 %v8173_v16  ;;  %v8035_v37 = vadd.f32 %v13141_v32, %v7937_v42  ;;  %v7936_v24 = vmul.f32 %v13163_v8, %v7656_v43 }
 0xe1a   :  { %v13227_v44 = vpop.f32.mrf.mxu1  ;;  %v8170_v29 = vsel %vm184_vm0, %v13223_v34, -inf }
 0xe1b   :  { %13808 = vst [vmem:[#allocation52_spill] sm:$0xff] %v13227_v44  ;;  %8171 = vmax.xlane.f32.xlu0 %v8170_v29  ;;  %v8133_v61 = vadd.f32 %v13147_v2, %v8035_v37  ;;  %v8034_v39 = vadd.f32 %v13149_v49, %v7936_v24 }
 0xe1c   :  { %v10311_v52 = vpop.f32.mrf.mxu1 }
 0xe1d   :  { %v13234_v10 = vadd.f32 %v10311_v52, %v13145_v47  ;;  %v10366_v12 = vpop.f32.mrf.mxu0  ;;  %v8132_v35 = vadd.f32 %v13153_v36, %v8034_v39  ;;  %v13239_v16 = vadd.f32 %v13169_v58, %v8133_v61 }
 0xe1e   :  { %v6800_v32 = vpop.f32.mrf.mxu1  ;;  %v7941_v42 = vmul.f32 %v10366_v12, %v13163_v8 }
 0xe1f   :  { %13809 = vst [vmem:[#allocation53_spill] sm:$0xff] %v13234_v10  ;;  %v13242_v43 = vadd.f32 %v6800_v32, %v13139_v27  ;;  %v7830_v29 = vpop.f32.mrf.mxu0  ;;  %v8185_v47 = vsel %vm184_vm0, %v13239_v16, -inf  ;;  %v8150_v36 = vadd.f32 %v13169_v58, %v8132_v35 }
 0xe20   :  { %v8039_v2 = vadd.f32 %v13155_v55, %v7941_v42  ;;  %v7940_v49 = vmul.f32 %v13163_v8, %v7830_v29  ;;  %v13248_v37 = vpop.f32.mrf.mxu1  ;;  %8186 = vmax.xlane.f32.xlu1 %v8185_v47  ;;  %v13266_v29 = vpop.permute.xlu1 %7990 }
 0xe21   :  { %13810 = vst [vmem:[#allocation54_spill] sm:$0xff] %v13242_v43  ;;  %13811 = vst [vmem:[#allocation55_spill] sm:$0xff] %v13248_v37  ;;  %v8182_v27 = vsel %vm184_vm0, %v8150_v36, -inf }
 0xe22   :  { %v8137_v24 = vadd.f32 %v13161_v62, %v8039_v2  ;;  %v8038_v61 = vadd.f32 %v13159_v19, %v7940_v49  ;;  %v13254_v39 = vpop.f32.mrf.mxu1  ;;  %8183 = vmax.xlane.f32.xlu0 %v8182_v27  ;;  %v13264_v62 = vpop.permute.xlu0 %7992 }
 0xe23   :  { %13812 = vst [vmem:[#allocation56_spill] sm:$0xff] %v13254_v39 }
 0xe24   :  { %v8136_v55 = vadd.f32 %v13165_v50, %v8038_v61  ;;  %v10317_v52 = vpop.f32.mrf.mxu1  ;;  %v8155_v12 = vadd.f32 %v13169_v58, %v8137_v24  ;;  %v13270_v50 = vpop.permute.xlu1 %8088 }
 0xe25   :  { %v13259_v32 = vadd.f32 %v10317_v52, %v13157_v3 }
 0xe26   :  { %v8197_v35 = vsel %vm184_vm0, %v8155_v12, -inf  ;;  %v8154_v42 = vadd.f32 %v13169_v58, %v8136_v55  ;;  %v13268_v2 = vpop.permute.xlu0 %8090 }
 0xe27   :  { %13813 = vst [vmem:[#allocation57_spill] sm:$0xff] %v13259_v32  ;;  %8198 = vmax.xlane.f32.xlu1 %v8197_v35 }
 0xe28   :  { %v8194_v19 = vsel %vm184_vm0, %v8154_v42, -inf  ;;  %v13274_v3 = vpop.permute.xlu1 %7998 }
 0xe29   :  { %8195 = vmax.xlane.f32.xlu0 %v8194_v19 }
 0xe2a   :  { %v13272_v49 = vpop.permute.xlu0 %8000 }
 0xe2c   :  { %v13278_v24 = vpop.permute.xlu1 %8096 }
 0xe2e   :  { %v13276_v47 = vpop.permute.xlu0 %8098 }
 0xe30   :  { %v13282_v27 = vpop.permute.xlu1 %8006 }
 0xe32   :  { %v13280_v61 = vpop.permute.xlu0 %8008 }
 0xe34   :  { %v13286_v52 = vpop.permute.xlu1 %8104 }
 0xe36   :  { %v13284_v55 = vpop.permute.xlu0 %8106 }
 0xe95   :  { %v8163_v35 = vpop.xlane.xlu0 %8162 }
 0xe96   :  { %v8207_v19 = vsub.f32 %v13175_v6, %v8163_v35 }
 0xe97   :  { %v8160_v18 = vpop.xlane.xlu1 %8159 }
 0xe98   :  { %v8224_v33 = vmul.f32 1.442695, %v8207_v19  ;;  %v8206_v32 = vsub.f32 %v13185_v0, %v8160_v18 }
 0xe9a   :  { %10707 = vpow2.f32 %v8224_v33  ;;  %v8222_v39 = vmul.f32 1.442695, %v8206_v32 }
 0xe9b   :  { %v13290_v63 = vpop.xlane.xlu1 %8168 }
 0xe9c   :  { %10709 = vpow2.f32 %v8222_v39 }
 0xe9d   :  { %v8166_v43 = vpop.xlane.xlu0 %8165 }
 0xea2   :  { %v8175_v37 = vpop.xlane.xlu1 %8174 }
 0xea3   :  { %v8211_v56 = vsub.f32 %v13215_v4, %v8175_v37 }
 0xea4   :  { %v8172_v10 = vpop.xlane.xlu0 %8171 }
 0xea5   :  { %v8232_v44 = vmul.f32 1.442695, %v8211_v56  ;;  %v8210_v57 = vsub.f32 %v13223_v34, %v8172_v10  ;;  %v13303_v56 = vpop.f32.mrf.mxu1 }
 0xea7   :  { %v13294_v5 = vpop.eup %10707  ;;  %10711 = vpow2.f32 %v8232_v44  ;;  %v8230_v6 = vmul.f32 1.442695, %v8210_v57  ;;  %v10345_v57 = vpop.f32.mrf.mxu1 }
 0xea8   :  { %v8257_v18 = vsel %vm184_vm0, %v13294_v5, 0.0 }
 0xea9   :  { %10713 = vpow2.f32 %v8230_v6  ;;  %8258 = vadd.xlane.f32.xlu1 %v8257_v18  ;;  %v13298_v33 = vpop.eup %10709  ;;  %v8187_v0 = vpop.xlane.xlu1 %8186 }
 0xeaa   :  { %v8215_v39 = vsub.f32 %v13239_v16, %v8187_v0  ;;  %v8254_v4 = vsel %vm184_vm0, %v13298_v33, 0.0  ;;  %v7569_v19 = vpop.f32.mrf.mxu1 }
 0xeab   :  { %8255 = vadd.xlane.f32.xlu0 %v8254_v4  ;;  %v8184_v34 = vpop.xlane.xlu0 %8183 }
 0xeac   :  { %v8240_v10 = vmul.f32 1.442695, %v8215_v39  ;;  %v8214_v44 = vsub.f32 %v8150_v36, %v8184_v34  ;;  %v10359_v0 = vpop.f32.mrf.mxu1  ;;  %v7935_v36 = vmul.f32 %v10345_v57, %v13163_v8 }
 0xeae   :  { %10715 = vpow2.f32 %v8240_v10  ;;  %v8238_v37 = vmul.f32 1.442695, %v8214_v44  ;;  %v7743_v34 = vpop.f32.mrf.mxu1  ;;  %v8033_v10 = vadd.f32 %v13264_v62, %v7935_v36 }
 0xeb0   :  { %v8199_v32 = vpop.xlane.xlu1 %8198  ;;  %10717 = vpow2.f32 %v8238_v37  ;;  %v10373_v44 = vpop.f32.mrf.mxu1  ;;  %v8208_v37 = vsub.f32 %v13198_v23, %v8166_v43  ;;  %v8209_v23 = vsub.f32 %v13192_v15, %v13290_v63 }
 0xeb1   :  { %v8219_v35 = vsub.f32 %v8155_v12, %v8199_v32 }
 0xeb2   :  { %v8196_v6 = vpop.xlane.xlu0 %8195  ;;  %v8226_v43 = vmul.f32 1.442695, %v8208_v37  ;;  %v8228_v63 = vmul.f32 1.442695, %v8209_v23 }
 0xeb3   :  { %v8248_v18 = vmul.f32 1.442695, %v8219_v35  ;;  %v8218_v11 = vsub.f32 %v8154_v42, %v8196_v6  ;;  %v7934_v42 = vmul.f32 %v13163_v8, %v7569_v19  ;;  %v8131_v19 = vadd.f32 %v13268_v2, %v8033_v10 }
 0xeb4   :  { %v13305_v16 = vpop.eup %10711 }
 0xeb5   :  { %10719 = vpow2.f32 %v8248_v18  ;;  %v8246_v9 = vmul.f32 1.442695, %v8218_v11  ;;  %v8269_v4 = vsel %vm184_vm0, %v13305_v16, 0.0  ;;  %v7939_v11 = vmul.f32 %v10359_v0, %v13163_v8  ;;  %v7917_v18 = vpop.f32.mrf.mxu1 }
 0xeb6   :  { %v13309_v39 = vpop.eup %10713  ;;  %8270 = vadd.xlane.f32.xlu1 %v8269_v4  ;;  %v8032_v57 = vadd.f32 %v13266_v29, %v7934_v42  ;;  %v7943_v0 = vmul.f32 %v10373_v44, %v13163_v8  ;;  %v7942_v2 = vmul.f32 %v13163_v8, %v7917_v18 }
 0xeb7   :  { %10721 = vpow2.f32 %v8246_v9  ;;  %v8266_v12 = vsel %vm184_vm0, %v13309_v39, 0.0  ;;  %v7938_v9 = vmul.f32 %v13163_v8, %v7743_v34  ;;  %v8037_v62 = vadd.f32 %v13272_v49, %v7939_v11 }
 0xeb8   :  { %8267 = vadd.xlane.f32.xlu0 %v8266_v12  ;;  %v8130_v4 = vadd.f32 %v13270_v50, %v8032_v57  ;;  %v8149_v34 = vadd.f32 %v13169_v58, %v8131_v19  ;;  %v8041_v42 = vadd.f32 %v13280_v61, %v7943_v0  ;;  %10723 = vpow2.f32 %v8226_v43 }
 0xeb9   :  { %v8036_v36 = vadd.f32 %v13274_v3, %v7938_v9  ;;  %v8135_v49 = vadd.f32 %v13276_v47, %v8037_v62  ;;  %v8040_v8 = vadd.f32 %v13282_v27, %v7942_v2  ;;  %10725 = vpow2.f32 %v8228_v63 }
 0xeba   :  { %v8148_v47 = vadd.f32 %v13169_v58, %v8130_v4  ;;  %v8139_v61 = vadd.f32 %v13284_v55, %v8041_v42  ;;  %v8179_v11 = vsel %vm184_vm0, %v8149_v34, -inf }
 0xebb   :  { %v13318_v32 = vpop.eup %10715  ;;  %v8134_v50 = vadd.f32 %v13278_v24, %v8036_v36  ;;  %v8153_v44 = vadd.f32 %v13169_v58, %v8135_v49  ;;  %v8138_v37 = vadd.f32 %v13286_v52, %v8040_v8 }
 0xebc   :  { %v8281_v35 = vsel %vm184_vm0, %v13318_v32, 0.0  ;;  %v8176_v24 = vsel %vm184_vm0, %v8148_v47, -inf  ;;  %v13358_v9 = vadd.f32 %v13169_v58, %v8139_v61 }
 0xebd   :  { %v13324_v6 = vpop.eup %10717  ;;  %8282 = vadd.xlane.f32.xlu1 %v8281_v35  ;;  %v8152_v27 = vadd.f32 %v13169_v58, %v8134_v50  ;;  %v8191_v57 = vsel %vm184_vm0, %v8153_v44, -inf  ;;  %v13362_v35 = vadd.f32 %v13169_v58, %v8138_v37 }
 0xebe   :  { %v8278_v29 = vsel %vm184_vm0, %v13324_v6, 0.0  ;;  %v8203_v52 = vsel %vm184_vm0, %v13358_v9, -inf }
 0xebf   :  { %8279 = vadd.xlane.f32.xlu0 %v8278_v29  ;;  %v8188_v55 = vsel %vm184_vm0, %v8152_v27, -inf  ;;  %v8200_v62 = vsel %vm184_vm0, %v13362_v35, -inf }
 0xec2   :  { %v13336_v12 = vpop.eup %10719 }
 0xec3   :  { %v8293_v15 = vsel %vm184_vm0, %v13336_v12, 0.0 }
 0xec4   :  { %v13343_v10 = vpop.eup %10721  ;;  %8294 = vadd.xlane.f32.xlu1 %v8293_v15 }
 0xec5   :  { %v8290_v3 = vsel %vm184_vm0, %v13343_v10, 0.0  ;;  %v13366_v19 = vpop.eup %10723 }
 0xec6   :  { %8291 = vadd.xlane.f32.xlu0 %v8290_v3  ;;  %v8260_v18 = vsel %vm184_vm0, %v13366_v19, 0.0  ;;  %v13372_v0 = vpop.eup %10725 }
 0xec7   :  { %v8263_v58 = vsel %vm184_vm0, %v13372_v0, 0.0 }
 0xec8   :  { %8180 = vmax.xlane.f32.xlu1 %v8179_v11 }
 0xeca   :  { %8177 = vmax.xlane.f32.xlu0 %v8176_v24 }
 0xecc   :  { %8192 = vmax.xlane.f32.xlu1 %v8191_v57 }
 0xece   :  { %8189 = vmax.xlane.f32.xlu0 %v8188_v55 }
 0xed0   :  { %8204 = vmax.xlane.f32.xlu1 %v8203_v52 }
 0xed2   :  { %8201 = vmax.xlane.f32.xlu0 %v8200_v62 }
 0xed4   :  { %8261 = vadd.xlane.f32.xlu1 %v8260_v18 }
 0xed8   :  { %8264 = vadd.xlane.f32.xlu1 %v8263_v58 }
 0xee8   :  { %8342 = vrot.lane.b32.xlu0 %v13769_v14, %s10872_s18 }
 0xee9   :  { %8436 = vrot.lane.b32.xlu1 %v11181_v45, %s10872_s18 }
 0xf32   :  { %v8259_v23 = vpop.xlane.xlu1 %8258 }
 0xf34   :  { %v8256_v43 = vpop.xlane.xlu0 %8255 }
 0xf3f   :  { %v8271_v29 = vpop.xlane.xlu1 %8270 }
 0xf41   :  { %v8268_v4 = vpop.xlane.xlu0 %8267 }
 0xf46   :  { %v8283_v36 = vpop.xlane.xlu1 %8282 }
 0xf47   :  { %10727 = vrcp.f32 %v8283_v36 }
 0xf48   :  { %v8280_v2 = vpop.xlane.xlu0 %8279 }
 0xf49   :  { %10729 = vrcp.f32 %v8280_v2 }
 0xf4a   :  { %10731 = vrcp.f32 %v8256_v43 }
 0xf4d   :  { %v8295_v49 = vpop.xlane.xlu1 %8294 }
 0xf4e   :  { %10733 = vrcp.f32 %v8295_v49 }
 0xf4f   :  { %10735 = vrcp.f32 %v8259_v23  ;;  %v8292_v42 = vpop.xlane.xlu0 %8291 }
 0xf50   :  { %10737 = vrcp.f32 %v8292_v42 }
 0xf51   :  { %v8181_v63 = vpop.xlane.xlu1 %8180  ;;  %10739 = vrcp.f32 %v8268_v4 }
 0xf52   :  { %v8213_v15 = vsub.f32 %v8149_v34, %v8181_v63 }
 0xf53   :  { %v8178_v14 = vpop.xlane.xlu0 %8177 }
 0xf54   :  { %v8236_v50 = vmul.f32 1.442695, %v8213_v15  ;;  %v8212_v8 = vsub.f32 %v8148_v47, %v8178_v14  ;;  %v10728_v45 = vpop.eup %10727 }
 0xf55   :  { %v8193_v3 = vpop.xlane.xlu1 %8192  ;;  %v8327_v24 = vmul.f32 %v10728_v45, %v13318_v32 }
 0xf56   :  { %10741 = vpow2.f32 %v8236_v50  ;;  %v8234_v61 = vmul.f32 1.442695, %v8212_v8  ;;  %v8217_v11 = vsub.f32 %v8153_v44, %v8193_v3  ;;  %v10730_v37 = vpop.eup %10729 }
 0xf57   :  { %10743 = vrcp.f32 %v8271_v29  ;;  %v8190_v57 = vpop.xlane.xlu0 %8189  ;;  %v8326_v55 = vmul.f32 %v10730_v37, %v13324_v6  ;;  %v10732_v18 = vpop.eup %10731 }
 0xf58   :  { %10745 = vpow2.f32 %v8234_v61  ;;  %v8244_v52 = vmul.f32 1.442695, %v8217_v11  ;;  %v8216_v62 = vsub.f32 %v8152_v27, %v8190_v57  ;;  %v8318_v29 = vmul.f32 %v10732_v18, %v13298_v33 }
 0xf59   :  { %v8205_v34 = vpop.xlane.xlu1 %8204  ;;  %v13382_v58 = vpack.c.bf16 %v8327_v24, %v8326_v55 }
 0xf5a   :  { %10747 = vpow2.f32 %v8244_v52  ;;  %v8242_v47 = vmul.f32 1.442695, %v8216_v62 }
 0xf5b   :  { %v10734_v23 = vpop.eup %10733  ;;  %v8202_v43 = vpop.xlane.xlu0 %8201 }
 0xf5c   :  { %v10736_v4 = vpop.eup %10735  ;;  %10749 = vpow2.f32 %v8242_v47  ;;  %v8331_v36 = vmul.f32 %v10734_v23, %v13336_v12  ;;  %v8220_v62 = vsub.f32 %v13362_v35, %v8202_v43  ;;  %v8221_v47 = vsub.f32 %v13358_v9, %v8205_v34  ;;  %v13815_v9 = vld [vmem:[#allocation30_spill] sm:$0xff] }
 0xf5d   :  { %v10738_v44 = vpop.eup %10737  ;;  %v8262_v32 = vpop.xlane.xlu1 %8261  ;;  %v8319_v27 = vmul.f32 %v10736_v4, %v13294_v5  ;;  %v6830_v34 = vadd.f32 %v13171_v59, %v12852_v30  ;;  %v6832_v30 = vadd.f32 %v13182_v13, %v13016_v25  ;;  %v13821_v59 = vld [vmem:[#allocation33_spill] sm:$0xff]  ;;  %v6834_v25 = vadd.f32 %v13195_v1, %v12856_v48  ;;  %v13825_v13 = vld [vmem:[#allocation35_spill] sm:$0xff] }
 0xf5e   :  { %v8330_v6 = vmul.f32 %v10738_v44, %v13343_v10  ;;  %10751 = vrcp.f32 %v8262_v32  ;;  %v10740_v15 = vpop.eup %10739  ;;  %v8250_v18 = vmul.f32 1.442695, %v8220_v62  ;;  %v8252_v23 = vmul.f32 1.442695, %v8221_v47  ;;  %v13818_v44 = vld [vmem:[#allocation26_spill] sm:$0xff]  ;;  %v13829_v1 = vld [vmem:[#allocation37_spill] sm:$0xff] }
 0xf5f   :  { %v8343_v2 = vpop.permute.xlu0 %8342  ;;  %v13390_v42 = vpack.c.bf16 %v8319_v27, %v8318_v29  ;;  %v8322_v14 = vmul.f32 %v10740_v15, %v13309_v39  ;;  %v13819_v29 = vld [vmem:[#allocation32_spill] sm:$0xff]  ;;  %v13823_v27 = vld [vmem:[#allocation34_spill] sm:$0xff]  ;;  %v6836_v48 = vadd.f32 %v13209_v21, %v13052_v51  ;;  %v13835_v21 = vld [vmem:[#allocation21_spill] sm:$0xff] }
 0xf60   :  { %v13388_v49 = vpack.c.bf16 %v8331_v36, %v8330_v6  ;;  %10375 = vmatpush3.bf16.msra.mxu0 %v8343_v2  ;;  %v4628_v32 = vadd.f32 %v13819_v29, %v13818_v44  ;;  %v13822_v6 = vld [vmem:[#allocation20_spill] sm:$0xff] }
 0xf61   :  { %v8265_v63 = vpop.xlane.xlu1 %8264  ;;  %10386 = vmatprep.subr.bf16.mxu0 %v13767_v41  ;;  %v4630_v2 = vadd.f32 %v13823_v27, %v13822_v6  ;;  %v13826_v15 = vld [vmem:[#allocation28_spill] sm:$0xff]  ;;  %v13853_v6 = vld [vmem:[#allocation29_spill] sm:$0xff] }
 0xf62   :  { %10753 = vrcp.f32 %v8265_v63  ;;  %v13839_v62 = vld [vmem:[#allocation52_spill] sm:$0xff]  ;;  %v13854_v27 = vld [vmem:[#allocation45_spill] sm:$0xff] }
 0xf63   :  { %v13393_v33 = vpop.eup %10741  ;;  %10377 = vmatmul.mubr.msk.bf16.vlgmr.msra.gmra.mxu0 %vm184_vm0, %v13390_v42  ;;  %10755 = vpow2.f32 %v8250_v18  ;;  %v13841_v47 = vld [vmem:[#allocation24_spill] sm:$0xff] }
 0xf64   :  { %v10744_v12 = vpop.eup %10743  ;;  %v8275_v5 = vsel %vm184_vm0, %v13393_v33, 0.0  ;;  %10388 = vmatprep.mubr.msk.bf16.mxu0 %vm10863_vm1, %v13767_v41  ;;  %10757 = vpow2.f32 %v8252_v23  ;;  %v13842_v23 = vld [vmem:[#allocation42_spill] sm:$0xff]  ;;  %v13849_v29 = vld [vmem:[#allocation44_spill] sm:$0xff] }
 0xf65   :  { %v13401_v10 = vpop.eup %10745  ;;  %8276 = vadd.xlane.f32.xlu1 %v8275_v5  ;;  %v8437_v50 = vpop.permute.xlu1 %8436  ;;  %v8323_v3 = vmul.f32 %v10744_v12, %v13305_v16  ;;  %v13827_v12 = vld [vmem:[#allocation36_spill] sm:$0xff] }
 0xf66   :  { %10387 = vmatpush3.bf16.msra.mxu0 %v8437_v50  ;;  %v8272_v8 = vsel %vm184_vm0, %v13401_v10, 0.0  ;;  %v4632_v5 = vadd.f32 %v13827_v12, %v13826_v15  ;;  %v13830_v50 = vld [vmem:[#allocation22_spill] sm:$0xff] }
 0xf67   :  { %v13406_v45 = vpop.eup %10747  ;;  %8273 = vadd.xlane.f32.xlu0 %v8272_v8  ;;  %10398 = vmatprep.subr.bf16.mxu0 %v13767_v41  ;;  %v13414_v37 = vpack.c.bf16 %v8323_v3, %v8322_v14  ;;  %v13831_v8 = vld [vmem:[#allocation38_spill] sm:$0xff] }
 0xf68   :  { %v8287_v61 = vsel %vm184_vm0, %v13406_v45, 0.0  ;;  %v4634_v3 = vadd.f32 %v13831_v8, %v13830_v50  ;;  %v10777_v15 = vld [vmem:[%s13745_s5] sm:$0xff]  }
 0xf69   :  { %v13412_v11 = vpop.eup %10749  ;;  %8288 = vadd.xlane.f32.xlu1 %v8287_v61  ;;  %v13832_v61 = vld [vmem:[#allocation50_spill] sm:$0xff] }
 0xf6a   :  { %v8284_v39 = vsel %vm184_vm0, %v13412_v11, 0.0 }
 0xf6b   :  { %10389 = vmatmul.mubr.msk.bf16.vlgmr.msra.gmra.mxu0 %vm184_vm0, %v13414_v37  ;;  %v10752_v16 = vpop.eup %10751 }
 0xf6c   :  { %10400 = vmatprep.mubr.msk.bf16.mxu0 %vm10863_vm1, %v13767_v41  ;;  %v8320_v57 = vmul.f32 %v10752_v16, %v13366_v19  ;;  %v13836_v16 = vld [vmem:[#allocation39_spill] sm:$0xff] }
 0xf6d   :  { %8285 = vadd.xlane.f32.xlu1 %v8284_v39  ;;  %v13834_v39 = vld [vmem:[#allocation51_spill] sm:$0xff] }
 0xf6f   :  { %v10754_v24 = vpop.eup %10753 }
 0xf70   :  { %v8321_v55 = vmul.f32 %v10754_v24, %v13372_v0  ;;  %v13432_v4 = vpop.eup %10755  ;;  %v4633_v24 = vadd.f32 %v13836_v16, %v13835_v21 }
 0xf71   :  { %v8296_v19 = vsel %vm184_vm0, %v13432_v4, 0.0  ;;  %v13436_v0 = vpop.eup %10757 }
 0xf72   :  { %v13424_v52 = vpack.c.bf16 %v8321_v55, %v8320_v57  ;;  %v13837_v57 = vld [vmem:[#allocation40_spill] sm:$0xff]  ;;  %v13838_v55 = vld [vmem:[#allocation17_spill] sm:$0xff] }
 0xf73   :  { %v6837_v18 = vadd.f32 %v13839_v62, %v13838_v55 }
 0xf7d   :  { %8530 = vrot.lane.b32.xlu0 %v11530_v26, %s10872_s18  ;;  %v8299_v26 = vsel %vm184_vm0, %v13436_v0, 0.0 }
 0xf7e   :  { %8624 = vrot.lane.b32.xlu1 %v11565_v53, %s10872_s18  ;;  %v13814_v53 = vld [vmem:[#allocation18_spill] sm:$0xff] }
 0xf7f   :  { %v4626_v35 = vadd.f32 %v13815_v9, %v13814_v53  ;;  %v13844_v53 = vld [vmem:[#allocation48_spill] sm:$0xff]  ;;  %v13845_v9 = vld [vmem:[#allocation55_spill] sm:$0xff] }
 0xf9c   :  { %8297 = vadd.xlane.f32.xlu0 %v8296_v19  ;;  %v4638_v19 = vadd.f32 %v13842_v23, %v13841_v47 }
 0xfa2   :  { %8300 = vadd.xlane.f32.xlu1 %v8299_v26  ;;  %v13843_v26 = vld [vmem:[#allocation41_spill] sm:$0xff] }
 0xfb2   :  { %8389 = vrot.lane.b32.xlu0 %v13770_v38, %s10872_s18  ;;  %v13816_v38 = vld [vmem:[#allocation16_spill] sm:$0xff] }
 0xfb3   :  { %8483 = vrot.lane.b32.xlu1 %v11174_v40, %s10872_s18  ;;  %v13817_v40 = vld [vmem:[#allocation31_spill] sm:$0xff] }
 0xfb4   :  { %v4625_v43 = vadd.f32 %v13817_v40, %v13816_v38  ;;  %v13847_v38 = vld [vmem:[#allocation23_spill] sm:$0xff] }
 0xfb5   :  { %v13848_v40 = vld [vmem:[#allocation43_spill] sm:$0xff] }
 0xfb6   :  { %8577 = vrot.lane.b32.xlu0 %v11197_v60, %s10872_s18  ;;  %v6829_v60 = vadd.f32 %v13177_v54, %v12850_v20  ;;  %v6831_v20 = vadd.f32 %v13187_v46, %v13010_v28  ;;  %v13824_v54 = vld [vmem:[#allocation19_spill] sm:$0xff]  ;;  %v6833_v28 = vadd.f32 %v13201_v17, %v12854_v22  ;;  %v6835_v22 = vadd.f32 %v13832_v61, %v13041_v31  ;;  %v13833_v17 = vld [vmem:[#allocation46_spill] sm:$0xff]  ;;  %v13840_v31 = vld [vmem:[#allocation53_spill] sm:$0xff] }
 0xfb7   :  { %4659 = vrot.lane.b32.xlu1 %v4626_v35, %s10873_s19  ;;  %v4629_v63 = vadd.f32 %v13825_v13, %v13824_v54  ;;  %v13828_v46 = vld [vmem:[#allocation27_spill] sm:$0xff]  ;;  %v6838_v51 = vadd.f32 %v13834_v39, %v13833_v17  ;;  %v6842_v35 = vadd.f32 %v13845_v9, %v13844_v53  ;;  %v13855_v54 = vld [vmem:[#allocation49_spill] sm:$0xff]  ;;  %v9462_v53 = vld [vmem:[%s13746_s6 + $0xf0] sm:$0xff] }
 0xfb8   :  { %v4631_v14 = vadd.f32 %v13829_v1, %v13828_v46  ;;  %v6843_v13 = vadd.f32 %v13303_v56, %v13855_v54  ;;  %v9461_v9 = vld [vmem:[%s13746_s6 + $0xe8] sm:$0xff] }
 0xfba   :  { %8671 = vrot.lane.b32.xlu0 %v11207_v7, %s10872_s18  ;;  %v13820_v7 = vld [vmem:[#allocation25_spill] sm:$0xff] }
 0xfbb   :  { %6863 = vrot.lane.b32.xlu1 %v6830_v34, %s10874_s10  ;;  %v4627_v36 = vadd.f32 %v13821_v59, %v13820_v7  ;;  %v13846_v34 = vld [vmem:[#allocation54_spill] sm:$0xff] }
 0xfbe   :  { %4657 = vrot.lane.b32.xlu0 %v4625_v43, %s10873_s19  ;;  %v4637_v43 = vadd.f32 %v13848_v40, %v13847_v38  ;;  %v9459_v40 = vld [vmem:[%s13746_s6 + $0xd8] sm:$0xff] }
 0xfbf   :  { %4663 = vrot.lane.b32.xlu1 %v4628_v32, %s10873_s19  ;;  %v13850_v32 = vld [vmem:[#allocation47_spill] sm:$0xff] }
 0xfc2   :  { %6861 = vrot.lane.b32.xlu0 %v6829_v60, %s10874_s10  ;;  %v13851_v60 = vld [vmem:[#allocation56_spill] sm:$0xff] }
 0xfc3   :  { %6867 = vrot.lane.b32.xlu1 %v6832_v30, %s10874_s10  ;;  %v6841_v30 = vadd.f32 %v13851_v60, %v13850_v32  ;;  %v9457_v32 = vld [vmem:[%s13746_s6 + $0xc8] sm:$0xff] }
 0xfc6   :  { %4661 = vrot.lane.b32.xlu0 %v4627_v36, %s10873_s19  ;;  %v13852_v36 = vld [vmem:[#allocation57_spill] sm:$0xff] }
 0xfc7   :  { %4667 = vrot.lane.b32.xlu1 %v4630_v2, %s10873_s19  ;;  %v4639_v2 = vadd.f32 %v13854_v27, %v13853_v6 }
 0xfca   :  { %6865 = vrot.lane.b32.xlu0 %v6831_v20, %s10874_s10 }
 0xfcb   :  { %6871 = vrot.lane.b32.xlu1 %v6834_v25, %s10874_s10 }
 0xfce   :  { %4665 = vrot.lane.b32.xlu0 %v4629_v63, %s10873_s19 }
 0xfcf   :  { %4671 = vrot.lane.b32.xlu1 %v4632_v5, %s10873_s19 }
 0xfd2   :  { %6869 = vrot.lane.b32.xlu0 %v6833_v28, %s10874_s10 }
 0xfd3   :  { %6875 = vrot.lane.b32.xlu1 %v6836_v48, %s10874_s10 }
 0xfd6   :  { %4669 = vrot.lane.b32.xlu0 %v4631_v14, %s10873_s19 }
 0xfd7   :  { %4675 = vrot.lane.b32.xlu1 %v4634_v3, %s10873_s19 }
 0xfda   :  { %6873 = vrot.lane.b32.xlu0 %v6835_v22, %s10874_s10 }
 0xfdb   :  { %6879 = vrot.lane.b32.xlu1 %v6838_v51, %s10874_s10 }
 0xfde   :  { %4673 = vrot.lane.b32.xlu0 %v4633_v24, %s10873_s19 }
 0xfdf   :  { %4679 = vrot.lane.b32.xlu1 %v13837_v57, %s10873_s19 }
 0xfe2   :  { %6877 = vrot.lane.b32.xlu0 %v6837_v18, %s10874_s10 }
 0xfe3   :  { %6883 = vrot.lane.b32.xlu1 %v13840_v31, %s10874_s10 }
 0xfe6   :  { %4677 = vrot.lane.b32.xlu0 %v13843_v26, %s10873_s19 }
 0xfe7   :  { %4683 = vrot.lane.b32.xlu1 %v4638_v19, %s10873_s19 }
 0xfea   :  { %6881 = vrot.lane.b32.xlu0 %v13846_v34, %s10874_s10  ;;  %v9460_v34 = vld [vmem:[%s13746_s6 + $0xe0] sm:$0xff] }
 0xfeb   :  { %6887 = vrot.lane.b32.xlu1 %v6842_v35, %s10874_s10 }
 0xfee   :  { %v8277_v44 = vpop.xlane.xlu1 %8276  ;;  %4681 = vrot.lane.b32.xlu0 %v4637_v43, %s10873_s19 }
 0xfef   :  { %4687 = vrot.lane.b32.xlu1 %v13849_v29, %s10873_s19 }
 0xff0   :  { %v8274_v7 = vpop.xlane.xlu0 %8273 }
 0xff1   :  { %10759 = vrcp.f32 %v8274_v7 }
 0xff2   :  { %v8289_v59 = vpop.xlane.xlu1 %8288  ;;  %6885 = vrot.lane.b32.xlu0 %v6841_v30, %s10874_s10  ;;  %10761 = vrcp.f32 %v8277_v44  ;;  %v9458_v44 = vld [vmem:[%s13746_s6 + $0xd0] sm:$0xff]  ;;  %v9456_v30 = vld [vmem:[%s13746_s6 + $0xc0] sm:$0xff] }
 0xff3   :  { %6891 = vrot.lane.b32.xlu1 %v13852_v36, %s10874_s10 }
 0xff4   :  { %v8531_v20 = vpop.permute.xlu0 %8530 }
 0xff5   :  { %10399 = vmatpush3.bf16.msra.mxu0 %v8531_v20 }
 0xff6   :  { %v8286_v25 = vpop.xlane.xlu1 %8285  ;;  %4685 = vrot.lane.b32.xlu0 %v4639_v2, %s10873_s19  ;;  %10410 = vmatprep.subr.bf16.mxu0 %v13767_v41 }
 0xff7   :  { %10763 = vrcp.f32 %v8286_v25 }
 0xff8   :  { %10401 = vmatmul.mubr.msk.bf16.vlgmr.msra.gmra.mxu0 %vm184_vm0, %v13382_v58  ;;  %10765 = vrcp.f32 %v8289_v59 }
 0xff9   :  { %10412 = vmatprep.mubr.msk.bf16.mxu0 %vm10863_vm1, %v13767_v41 }
 0xffa   :  { %v8625_v63 = vpop.permute.xlu1 %8624  ;;  %6889 = vrot.lane.b32.xlu0 %v6843_v13, %s10874_s10 }
 0xffb   :  { %10411 = vmatpush3.bf16.msra.mxu0 %v8625_v63 }
 0xffc   :  { %10422 = vmatprep.subr.bf16.mxu0 %v10777_v15 }
 0xffe   :  { %v10760_v56 = vpop.eup %10759 }
 0xfff   :  { %v10762_v12 = vpop.eup %10761  ;;  %v8324_v5 = vmul.f32 %v10760_v56, %v13401_v10 }
0x1000   :  { %10413 = vmatmul.mubr.msk.bf16.vlgmr.msra.gmra.mxu0 %vm184_vm0, %v13388_v49  ;;  %v8325_v28 = vmul.f32 %v10762_v12, %v13393_v33 }
0x1001   :  { %10424 = vmatprep.mubr.msk.bf16.mxu0 %vm184_vm0, %v13390_v42  ;;  %10423 = vmatpush3.bf16.msra.mxu0 %v10777_v15 }
0x1002   :  { %v8337_v48 = vpack.c.bf16 %v8325_v28, %v8324_v5 }
0x1004   :  { %v10764_v46 = vpop.eup %10763 }
0x1005   :  { %v10766_v42 = vpop.eup %10765  ;;  %v8328_v1 = vmul.f32 %v10764_v46, %v13412_v11 }
0x1006   :  { %v8329_v14 = vmul.f32 %v10766_v42, %v13406_v45 }
0x1008   :  { %10425 = vmatmul.mubr.msk.bf16.vlgmr.msra.gmra.mxu0 %vm184_vm0, %v13424_v52  ;;  %v8339_v50 = vpack.c.bf16 %v8329_v14, %v8328_v1 }
0x1009   :  { %10428 = vmatprep.mubr.msk.bf16.mxu0 %vm184_vm0, %v13414_v37 }
0x1010   :  { %10429 = vmatmul.mubr.msk.bf16.gmra.mxu0 %vm184_vm0, %v8337_v48 }
0x1011   :  { %10432 = vmatprep.mubr.msk.bf16.mxu0 %vm184_vm0, %v13382_v58 }
0x1018   :  { %10433 = vmatmul.mubr.msk.bf16.gmra.mxu0 %vm184_vm0, %v8339_v50 }
0x1019   :  { %10436 = vmatprep.mubr.msk.bf16.mxu0 %vm184_vm0, %v13388_v49 }
0x1023   :  { %v13564_v10 = vpop.f32.mrf.mxu0 }
0x1025   :  { %v10378_v33 = vpop.f32.mrf.mxu0  ;;  %v8298_v37 = vpop.xlane.xlu0 %8297 }
0x1026   :  { %10767 = vrcp.f32 %v8298_v37 }
0x1027   :  { %v13566_v8 = vpop.f32.mrf.mxu0 }
0x1029   :  { %v10379_v3 = vpop.f32.mrf.mxu0  ;;  %v8390_v61 = vpop.permute.xlu0 %8389 }
0x102a   :  { %10381 = vmatpush3.bf16.msra.mxu1 %v8390_v61 }
0x102b   :  { %v8301_v58 = vpop.xlane.xlu1 %8300  ;;  %v13568_v11 = vpop.f32.mrf.mxu0  ;;  %10392 = vmatprep.subr.bf16.mxu1 %v13767_v41 }
0x102c   :  { %10769 = vrcp.f32 %v8301_v58 }
0x102d   :  { %10383 = vmatmul.mubr.msk.bf16.vlgmr.msra.gmra.mxu1 %vm184_vm0, %v13424_v52  ;;  %v10390_v49 = vpop.f32.mrf.mxu0  ;;  %v8578_v45 = vpop.permute.xlu0 %8577 }
0x102e   :  { %10394 = vmatprep.mubr.msk.bf16.mxu1 %vm10863_vm1, %v13767_v41  ;;  %v10778_v49 = vld [vmem:[%s13744_s4] sm:$0xff] }
0x102f   :  { %v8484_v22 = vpop.permute.xlu1 %8483  ;;  %v13575_v17 = vpop.f32.mrf.mxu0 }
0x1030   :  { %10393 = vmatpush3.bf16.msra.mxu1 %v8484_v22 }
0x1031   :  { %v10391_v39 = vpop.f32.mrf.mxu0  ;;  %v8672_v51 = vpop.permute.xlu0 %8671  ;;  %10404 = vmatprep.subr.bf16.mxu1 %v13767_v41 }
0x1033   :  { %v4660_v21 = vpop.permute.xlu1 %4659  ;;  %v10768_v16 = vpop.eup %10767 }
0x1034   :  { %4707 = vst.msk [vmem:[#allocation2 + $0x8] sm:$0xff] %vm4705_vm4, %v4660_v21  ;;  %v8332_v62 = vmul.f32 %v10768_v16, %v13432_v4  ;;  %v9463_v4 = vld [vmem:[%s13746_s6 + $0xf8] sm:$0xff] }
0x1035   :  { %10395 = vmatmul.mubr.msk.bf16.vlgmr.msra.gmra.mxu1 %vm184_vm0, %v8337_v48  ;;  %v4658_v52 = vpop.permute.xlu0 %4657 }
0x1036   :  { %10405 = vmatpush3.bf16.msra.mxu1 %v8578_v45  ;;  %4706 = vst.msk [vmem:[#allocation2] sm:$0xff] %vm4705_vm4, %v4658_v52  ;;  %10406 = vmatprep.mubr.msk.bf16.mxu1 %vm10863_vm1, %v13767_v41 }
0x1037   :  { %v6864_v24 = vpop.permute.xlu1 %6863  ;;  %10416 = vmatprep.subr.bf16.mxu1 %v13767_v41 }
0x1038   :  { %6911 = vst.msk [vmem:[#allocation2 + $0x8] sm:$0xff] %vm6909_vm5, %v6864_v24 }
0x1039   :  { %v10770_v57 = vpop.eup %10769  ;;  %v6862_v55 = vpop.permute.xlu0 %6861 }
0x103a   :  { %6910 = vst.msk [vmem:[#allocation2] sm:$0xff] %vm6909_vm5, %v6862_v55  ;;  %v8333_v18 = vmul.f32 %v10770_v57, %v13436_v0 }
0x103b   :  { %v4664_v31 = vpop.permute.xlu1 %4663 }
0x103c   :  { %4709 = vst.msk [vmem:[#allocation2 + $0x18] sm:$0xff] %vm4705_vm4, %v4664_v31  ;;  %v8341_v47 = vpack.c.bf16 %v8333_v18, %v8332_v62 }
0x103d   :  { %10407 = vmatmul.mubr.msk.bf16.vlgmr.msra.gmra.mxu1 %vm184_vm0, %v8339_v50  ;;  %v4662_v23 = vpop.permute.xlu0 %4661 }
0x103e   :  { %10417 = vmatpush3.bf16.msra.mxu1 %v8672_v51  ;;  %4708 = vst.msk [vmem:[#allocation2 + $0x10] sm:$0xff] %vm4705_vm4, %v4662_v23  ;;  %10437 = vmatmul.mubr.msk.bf16.gmra.mxu0 %vm184_vm0, %v8341_v47  ;;  %v10779_v51 = vld [vmem:[%s13744_s4 + $0x8] sm:$0xff]  ;;  %s10875_s4 = smov 12  }
0x103f   :  { %v6868_v19 = vpop.permute.xlu1 %6867  ;;  %10418 = vmatprep.mubr.msk.bf16.mxu1 %vm10863_vm1, %v13767_v41  ;;  %10440 = vmatprep.subr.mxu1 %v9463_v4 }
0x1040   :  { %6913 = vst.msk [vmem:[#allocation2 + $0x18] sm:$0xff] %vm6909_vm5, %v6868_v19 }
0x1041   :  { %v6866_v0 = vpop.permute.xlu0 %6865 }
0x1042   :  { %6912 = vst.msk [vmem:[#allocation2 + $0x10] sm:$0xff] %vm6909_vm5, %v6866_v0 }
0x1043   :  { %v4668_v26 = vpop.permute.xlu1 %4667 }
0x1044   :  { %4711 = vst.msk [vmem:[#allocation2 + $0x28] sm:$0xff] %vm4705_vm4, %v4668_v26 }
0x1045   :  { %10419 = vmatmul.mubr.msk.bf16.vlgmr.msra.gmra.mxu1 %vm184_vm0, %v8341_v47  ;;  %v4666_v41 = vpop.permute.xlu0 %4665 }
0x1046   :  { %4710 = vst.msk [vmem:[#allocation2 + $0x20] sm:$0xff] %vm4705_vm4, %v4666_v41  ;;  %10441 = vmatpush3.msra.mxu1 %v9463_v4 }
0x1047   :  { %v6872_v35 = vpop.permute.xlu1 %6871  ;;  %10442 = vmatprep.subr.mxu1 %v9462_v53 }
0x1048   :  { %6915 = vst.msk [vmem:[#allocation2 + $0x28] sm:$0xff] %vm6909_vm5, %v6872_v35  ;;  %10443 = vmatpush3.msra.mxu1 %v9462_v53 }
0x1049   :  { %v6870_v38 = vpop.permute.xlu0 %6869  ;;  %10444 = vmatprep.subr.mxu1 %v9461_v9 }
0x104a   :  { %6914 = vst.msk [vmem:[#allocation2 + $0x20] sm:$0xff] %vm6909_vm5, %v6870_v38  ;;  %10445 = vmatpush3.msra.mxu1 %v9461_v9 }
0x104b   :  { %v4672_v43 = vpop.permute.xlu1 %4671  ;;  %10446 = vmatprep.subr.mxu1 %v9460_v34 }
0x104c   :  { %4713 = vst.msk [vmem:[#allocation2 + $0x38] sm:$0xff] %vm4705_vm4, %v4672_v43  ;;  %10447 = vmatpush3.msra.mxu1 %v9460_v34 }
0x104d   :  { %v4670_v29 = vpop.permute.xlu0 %4669  ;;  %10448 = vmatprep.subr.mxu1 %v9459_v40 }
0x104e   :  { %4712 = vst.msk [vmem:[#allocation2 + $0x30] sm:$0xff] %vm4705_vm4, %v4670_v29  ;;  %10449 = vmatpush3.msra.mxu1 %v9459_v40 }
0x104f   :  { %v6876_v60 = vpop.permute.xlu1 %6875  ;;  %10450 = vmatprep.subr.mxu1 %v9458_v44 }
0x1050   :  { %6917 = vst.msk [vmem:[#allocation2 + $0x38] sm:$0xff] %vm6909_vm5, %v6876_v60  ;;  %10451 = vmatpush3.msra.mxu1 %v9458_v44 }
0x1051   :  { %v6874_v7 = vpop.permute.xlu0 %6873  ;;  %10452 = vmatprep.subr.mxu1 %v9457_v32 }
0x1052   :  { %6916 = vst.msk [vmem:[#allocation2 + $0x30] sm:$0xff] %vm6909_vm5, %v6874_v7  ;;  %10453 = vmatpush3.msra.mxu1 %v9457_v32 }
0x1053   :  { %v4676_v59 = vpop.permute.xlu1 %4675  ;;  %10454 = vmatprep.subr.mxu1 %v9456_v30 }
0x1054   :  { %4715 = vst.msk [vmem:[#allocation2 + $0x48] sm:$0xff] %vm4705_vm4, %v4676_v59  ;;  %10455 = vmatpush3.msra.mxu1 %v9456_v30 }
0x1055   :  { %v4674_v36 = vpop.permute.xlu0 %4673 }
0x1056   :  { %4714 = vst.msk [vmem:[#allocation2 + $0x40] sm:$0xff] %vm4705_vm4, %v4674_v36 }
0x1057   :  { %v6880_v6 = vpop.permute.xlu1 %6879 }
0x1058   :  { %6919 = vst.msk [vmem:[#allocation2 + $0x48] sm:$0xff] %vm6909_vm5, %v6880_v6 }
0x1059   :  { %v6878_v27 = vpop.permute.xlu0 %6877 }
0x105a   :  { %6918 = vst.msk [vmem:[#allocation2 + $0x40] sm:$0xff] %vm6909_vm5, %v6878_v27 }
0x105b   :  { %v4680_v2 = vpop.permute.xlu1 %4679 }
0x105c   :  { %4717 = vst.msk [vmem:[#allocation2 + $0x58] sm:$0xff] %vm4705_vm4, %v4680_v2 }
0x105d   :  { %v4678_v20 = vpop.permute.xlu0 %4677 }
0x105e   :  { %4716 = vst.msk [vmem:[#allocation2 + $0x50] sm:$0xff] %vm4705_vm4, %v4678_v20 }
0x105f   :  { %v6884_v25 = vpop.permute.xlu1 %6883 }
0x1060   :  { %6921 = vst.msk [vmem:[#allocation2 + $0x58] sm:$0xff] %vm6909_vm5, %v6884_v25 }
0x1061   :  { %v6882_v54 = vpop.permute.xlu0 %6881 }
0x1062   :  { %6920 = vst.msk [vmem:[#allocation2 + $0x50] sm:$0xff] %vm6909_vm5, %v6882_v54 }
0x1063   :  { %v4684_v13 = vpop.permute.xlu1 %4683 }
0x1064   :  { %4719 = vst.msk [vmem:[#allocation2 + $0x68] sm:$0xff] %vm4705_vm4, %v4684_v13 }
0x1065   :  { %v4682_v63 = vpop.permute.xlu0 %4681 }
0x1066   :  { %4718 = vst.msk [vmem:[#allocation2 + $0x60] sm:$0xff] %vm4705_vm4, %v4682_v63 }
0x1067   :  { %v6888_v15 = vpop.permute.xlu1 %6887 }
0x1068   :  { %6923 = vst.msk [vmem:[#allocation2 + $0x68] sm:$0xff] %vm6909_vm5, %v6888_v15 }
0x1069   :  { %v6886_v56 = vpop.permute.xlu0 %6885 }
0x106a   :  { %6922 = vst.msk [vmem:[#allocation2 + $0x60] sm:$0xff] %vm6909_vm5, %v6886_v56 }
0x106b   :  { %v4688_v12 = vpop.permute.xlu1 %4687 }
0x106c   :  { %4721 = vst.msk [vmem:[#allocation2 + $0x78] sm:$0xff] %vm4705_vm4, %v4688_v12 }
0x106d   :  { %v4686_v5 = vpop.permute.xlu0 %4685 }
0x106e   :  { %4720 = vst.msk [vmem:[#allocation2 + $0x70] sm:$0xff] %vm4705_vm4, %v4686_v5 }
0x106f   :  { %v6892_v28 = vpop.permute.xlu1 %6891 }
0x1070   :  { %6925 = vst.msk [vmem:[#allocation2 + $0x78] sm:$0xff] %vm6909_vm5, %v6892_v28 }
0x1071   :  { %v6890_v48 = vpop.permute.xlu0 %6889 }
0x1072   :  { %6924 = vst.msk [vmem:[#allocation2 + $0x70] sm:$0xff] %vm6909_vm5, %v6890_v48 }
0x10b8   :  { %v13645_v46 = vpop.f32.mrf.mxu0 }
0x10ba   :  { %v10402_v42 = vpop.f32.mrf.mxu0 }
0x10bc   :  { %v13647_v1 = vpop.f32.mrf.mxu0 }
0x10be   :  { %v10403_v14 = vpop.f32.mrf.mxu0 }
0x10c0   :  { %v13649_v50 = vpop.f32.mrf.mxu0 }
0x10c2   :  { %v10414_v33 = vpop.f32.mrf.mxu0 }
0x10c4   :  { %v13651_v37 = vpop.f32.mrf.mxu0 }
0x10c6   :  { %v10415_v3 = vpop.f32.mrf.mxu0 }
0x10c8   :  { %v10426_v61 = vpop.f32.mrf.mxu0 }
0x10c9   :  { %v8817_v52 = vmul.f32 %v10778_v49, %v10426_v61 }
0x10ca   :  { %v8752_v58 = vpop.f32.mrf.mxu0 }
0x10cb   :  { %v8815_v45 = vmul.f32 %v10778_v49, %v8752_v58 }
0x10cc   :  { %v10427_v22 = vpop.f32.mrf.mxu0 }
0x10cd   :  { %10456 = vmatprep.mubr.msk.f32.mxu1 %vm2283_vm2, %v8815_v45  ;;  %v8818_v57 = vmul.f32 %v10779_v51, %v10427_v22 }
0x10ce   :  { %v8755_v39 = vpop.f32.mrf.mxu0 }
0x10cf   :  { %v8816_v21 = vmul.f32 %v10779_v51, %v8755_v39 }
0x10d0   :  { %v10430_v16 = vpop.f32.mrf.mxu0 }
0x10d1   :  { %10457 = vmatmul.mubr.msk.f32.vlgmr.msra.gmra.mxu1 %vm2283_vm2, %v8816_v21  ;;  %v8821_v47 = vmul.f32 %v10778_v49, %v10430_v16 }
0x10d2   :  { %v8768_v24 = vpop.f32.mrf.mxu0  ;;  %10459 = vmatprep.mubr.msk.f32.mxu1 %vm2283_vm2, %v8817_v52 }
0x10d3   :  { %v8819_v55 = vmul.f32 %v10778_v49, %v8768_v24 }
0x10d4   :  { %v10431_v62 = vpop.f32.mrf.mxu0 }
0x10d5   :  { %10460 = vmatmul.mubr.msk.f32.gmra.mxu1 %vm2283_vm2, %v8818_v57  ;;  %v8822_v4 = vmul.f32 %v10779_v51, %v10431_v62 }
0x10d6   :  { %v8771_v18 = vpop.f32.mrf.mxu0  ;;  %10462 = vmatprep.mubr.msk.f32.mxu1 %vm2283_vm2, %v8819_v55 }
0x10d7   :  { %v8820_v31 = vmul.f32 %v10779_v51, %v8771_v18 }
0x10d8   :  { %v10434_v23 = vpop.f32.mrf.mxu0 }
0x10d9   :  { %10463 = vmatmul.mubr.msk.f32.gmra.mxu1 %vm2283_vm2, %v8820_v31  ;;  %v8825_v9 = vmul.f32 %v10778_v49, %v10434_v23 }
0x10da   :  { %v8784_v19 = vpop.f32.mrf.mxu0  ;;  %10465 = vmatprep.mubr.msk.f32.mxu1 %vm2283_vm2, %v8821_v47 }
0x10db   :  { %v8823_v0 = vmul.f32 %v10778_v49, %v8784_v19 }
0x10dc   :  { %v10435_v26 = vpop.f32.mrf.mxu0 }
0x10dd   :  { %10466 = vmatmul.mubr.msk.f32.gmra.mxu1 %vm2283_vm2, %v8822_v4  ;;  %v8826_v35 = vmul.f32 %v10779_v51, %v10435_v26 }
0x10de   :  { %v8787_v53 = vpop.f32.mrf.mxu0  ;;  %10468 = vmatprep.mubr.msk.f32.mxu1 %vm2283_vm2, %v8823_v0 }
0x10df   :  { %v8824_v41 = vmul.f32 %v10779_v51, %v8787_v53 }
0x10e1   :  { %10469 = vmatmul.mubr.msk.f32.gmra.mxu1 %vm2283_vm2, %v8824_v41 }
0x10e2   :  { %10471 = vmatprep.mubr.msk.f32.mxu1 %vm2283_vm2, %v8825_v9 }
0x10e5   :  { %10472 = vmatmul.mubr.msk.f32.gmra.mxu1 %vm2283_vm2, %v8826_v35  ;;  %v13707_v35 = vld [vmem:[%s13747_s7] ss:$0 sm:$0xff]  ;;  %s10876_s7 = smov [#allocation11]  }
0x10e6   :  { %s9208_s17 = sshll.u32 %s10876_s7, 4  ;;  %s9209_s17 = int_to_ptr.vmem [resolvable:$true] %s9208_s17 }
0x10e7   :  { %s10828_s18 = scalar_lea.vmem %s9209_s17, 256  ;;  %p10833_p7 = scmp.lt.s32.totalorder %s9209_s17, %s9209_s17 }
0x10e8   :  { %p10829_p6 = scmp.ne.s32.totalorder %s9209_s17, %s10828_s18  ;;  %p10834_p8 = scmp.lt.s32.totalorder %s10828_s18, %s10828_s18 }
0x10ea   :  { %p10835_p9 = por %p10834_p8, %p10833_p7 }
0x10ec   :  { %p10836_p10 = pnand %p10835_p9, %p10829_p6 }
0x10ed   :  { %v8429_v34 = vpop.f32.mrf.mxu1 }
0x10ef   :  { %v10384_v38 = vpop.f32.mrf.mxu1 }
0x10f1   :  { %v8432_v40 = vpop.f32.mrf.mxu1 }
0x10f3   :  { %v10385_v43 = vpop.f32.mrf.mxu1 }
0x10f5   :  { %v8523_v44 = vpop.f32.mrf.mxu1 }
0x10f7   :  { %v10396_v29 = vpop.f32.mrf.mxu1 }
0x10f9   :  { %v8526_v32 = vpop.f32.mrf.mxu1 }
0x10fb   :  { %v10397_v60 = vpop.f32.mrf.mxu1 }
0x10fd   :  { %v8617_v30 = vpop.f32.mrf.mxu1 }
0x10fe   :  { %v10438_v7 = vpop.f32.mrf.mxu0 }
0x10ff   :  { %v10408_v59 = vpop.f32.mrf.mxu1  ;;  %v8829_v63 = vmul.f32 %v10778_v49, %v10438_v7 }
0x1100   :  { %v8800_v36 = vpop.f32.mrf.mxu0 }
0x1101   :  { %v8827_v6 = vmul.f32 %v10778_v49, %v8800_v36  ;;  %v8620_v27 = vpop.f32.mrf.mxu1 }
0x1102   :  { %v10439_v2 = vpop.f32.mrf.mxu0 }
0x1103   :  { %v10409_v20 = vpop.f32.mrf.mxu1  ;;  %10474 = vmatprep.mubr.msk.f32.mxu1 %vm2283_vm2, %v8827_v6  ;;  %v8830_v56 = vmul.f32 %v10779_v51, %v10439_v2 }
0x1104   :  { %v8803_v25 = vpop.f32.mrf.mxu0 }
0x1105   :  { %v8828_v54 = vmul.f32 %v10779_v51, %v8803_v25  ;;  %v8711_v13 = vpop.f32.mrf.mxu1 }
0x1107   :  { %v10420_v15 = vpop.f32.mrf.mxu1  ;;  %10475 = vmatmul.mubr.msk.f32.gmra.mxu1 %vm2283_vm2, %v8828_v54 }
0x1108   :  { %10477 = vmatprep.mubr.msk.f32.mxu1 %vm2283_vm2, %v8829_v63 }
0x1109   :  { %v8714_v12 = vpop.f32.mrf.mxu1 }
0x110b   :  { %v10421_v5 = vpop.f32.mrf.mxu1  ;;  %10478 = vmatmul.mubr.msk.f32.gmra.mxu1 %vm2283_vm2, %v8830_v56 }
0x1191   :  { %v10458_v28 = vpop.f32.mrf.mxu1 }
0x1192   :  { %v9034_v48 = vadd.f32 %v10458_v28, %v13566_v8 }
0x1193   :  { %v8954_v42 = vpop.f32.mrf.mxu1 }
0x1194   :  { %v9033_v14 = vadd.f32 %v8954_v42, %v13564_v10  ;;  %9067 = vrot.lane.b32.xlu1 %v9034_v48, %s10875_s4 }
0x1195   :  { %v10461_v33 = vpop.f32.mrf.mxu1 }
0x1196   :  { %v9036_v3 = vadd.f32 %v10461_v33, %v8432_v40  ;;  %9065 = vrot.lane.b32.xlu0 %v9033_v14, %s10875_s4 }
0x1197   :  { %v8964_v61 = vpop.f32.mrf.mxu1 }
0x1198   :  { %v9035_v58 = vadd.f32 %v8964_v61, %v8429_v34  ;;  %9071 = vrot.lane.b32.xlu1 %v9036_v3, %s10875_s4 }
0x1199   :  { %v10464_v49 = vpop.f32.mrf.mxu1 }
0x119a   :  { %v9038_v45 = vadd.f32 %v10464_v49, %v13575_v17  ;;  %9069 = vrot.lane.b32.xlu0 %v9035_v58, %s10875_s4 }
0x119b   :  { %v8974_v8 = vpop.f32.mrf.mxu1 }
0x119c   :  { %v9037_v22 = vadd.f32 %v8974_v8, %v13568_v11  ;;  %9075 = vrot.lane.b32.xlu1 %v9038_v45, %s10875_s4 }
0x119d   :  { %v10467_v10 = vpop.f32.mrf.mxu1 }
0x119e   :  { %v9040_v39 = vadd.f32 %v10467_v10, %v8526_v32  ;;  %9073 = vrot.lane.b32.xlu0 %v9037_v22, %s10875_s4 }
0x119f   :  { %v8984_v51 = vpop.f32.mrf.mxu1 }
0x11a0   :  { %v9039_v21 = vadd.f32 %v8984_v51, %v8523_v44  ;;  %9079 = vrot.lane.b32.xlu1 %v9040_v39, %s10875_s4 }
0x11a1   :  { %v10470_v52 = vpop.f32.mrf.mxu1 }
0x11a2   :  { %v9042_v16 = vadd.f32 %v10470_v52, %v13647_v1  ;;  %9077 = vrot.lane.b32.xlu0 %v9039_v21, %s10875_s4 }
0x11a3   :  { %v8994_v17 = vpop.f32.mrf.mxu1 }
0x11a4   :  { %v9041_v24 = vadd.f32 %v8994_v17, %v13645_v46  ;;  %9083 = vrot.lane.b32.xlu1 %v9042_v16, %s10875_s4 }
0x11a5   :  { %v10473_v11 = vpop.f32.mrf.mxu1 }
0x11a6   :  { %v9044_v57 = vadd.f32 %v10473_v11, %v8620_v27  ;;  %9081 = vrot.lane.b32.xlu0 %v9041_v24, %s10875_s4 }
0x11a7   :  { %v9004_v55 = vpop.f32.mrf.mxu1 }
0x11a8   :  { %v9043_v62 = vadd.f32 %v9004_v55, %v8617_v30  ;;  %9087 = vrot.lane.b32.xlu1 %v9044_v57, %s10875_s4 }
0x11aa   :  { %9085 = vrot.lane.b32.xlu0 %v9043_v62, %s10875_s4 }
0x11c7   :  { %v10476_v18 = vpop.f32.mrf.mxu1 }
0x11c8   :  { %v9046_v1 = vadd.f32 %v10476_v18, %v13651_v37 }
0x11c9   :  { %v9014_v31 = vpop.f32.mrf.mxu1 }
0x11ca   :  { %v9045_v47 = vadd.f32 %v9014_v31, %v13649_v50  ;;  %9091 = vrot.lane.b32.xlu1 %v9046_v1, %s10875_s4 }
0x11cb   :  { %v10479_v46 = vpop.f32.mrf.mxu1 }
0x11cc   :  { %9089 = vrot.lane.b32.xlu0 %v9045_v47, %s10875_s4  ;;  %v9048_v4 = vadd.f32 %v10479_v46, %v8714_v12 }
0x11cd   :  { %v9024_v23 = vpop.f32.mrf.mxu1 }
0x11ce   :  { %v9047_v19 = vadd.f32 %v9024_v23, %v8711_v13 }
0x11d0   :  { %9093 = vrot.lane.b32.xlu0 %v9047_v19, %s10875_s4 }
0x11d4   :  { %9095 = vrot.lane.b32.xlu0 %v9048_v4, %s10875_s4 }
0x1206   :  { %v9068_v0 = vpop.permute.xlu1 %9067 }
0x1207   :  { %9115 = vst.msk [vmem:[#allocation2 + $0x8] sm:$0xff] %vm9113_vm6, %v9068_v0 }
0x1208   :  { %v9066_v37 = vpop.permute.xlu0 %9065 }
0x1209   :  { %9114 = vst.msk [vmem:[#allocation2] sm:$0xff] %vm9113_vm6, %v9066_v37 }
0x120a   :  { %v9072_v50 = vpop.permute.xlu1 %9071 }
0x120b   :  { %9117 = vst.msk [vmem:[#allocation2 + $0x18] sm:$0xff] %vm9113_vm6, %v9072_v50 }
0x120c   :  { %v9070_v26 = vpop.permute.xlu0 %9069 }
0x120d   :  { %9116 = vst.msk [vmem:[#allocation2 + $0x10] sm:$0xff] %vm9113_vm6, %v9070_v26 }
0x120e   :  { %v9076_v53 = vpop.permute.xlu1 %9075  ;;  %v9131_v40 = vld [vmem:[#allocation2 + $0x8] sm:$0xff] }
0x120f   :  { %9119 = vst.msk [vmem:[#allocation2 + $0x28] sm:$0xff] %vm9113_vm6, %v9076_v53  ;;  %v9154_v44 = vadd.f32 %v13707_v35, %v9131_v40 }
0x1210   :  { %v9074_v41 = vpop.permute.xlu0 %9073  ;;  %v9130_v9 = vld [vmem:[#allocation2] sm:$0xff] }
0x1211   :  { %9118 = vst.msk [vmem:[#allocation2 + $0x20] sm:$0xff] %vm9113_vm6, %v9074_v41  ;;  %v9153_v34 = vadd.f32 %v13707_v35, %v9130_v9 }
0x1212   :  { %v9080_v38 = vpop.permute.xlu1 %9079  ;;  %v9133_v59 = vld [vmem:[#allocation2 + $0x18] sm:$0xff] }
0x1213   :  { %9121 = vst.msk [vmem:[#allocation2 + $0x38] sm:$0xff] %vm9113_vm6, %v9080_v38  ;;  %9169 = vxpose.xlu1.b32.start [1/16] (narrow) %v9153_v34, 16  ;;  %v9156_v6 = vadd.f32 %v13707_v35, %v9133_v59 }
0x1214   :  { %v9078_v43 = vpop.permute.xlu0 %9077  ;;  %v9132_v32 = vld [vmem:[#allocation2 + $0x10] sm:$0xff] }
0x1215   :  { %9120 = vst.msk [vmem:[#allocation2 + $0x30] sm:$0xff] %vm9113_vm6, %v9078_v43  ;;  %v9155_v30 = vadd.f32 %v13707_v35, %v9132_v32 }
0x1216   :  { %v9084_v29 = vpop.permute.xlu1 %9083  ;;  %v9135_v20 = vld [vmem:[#allocation2 + $0x28] sm:$0xff] }
0x1217   :  { %9123 = vst.msk [vmem:[#allocation2 + $0x48] sm:$0xff] %vm9113_vm6, %v9084_v29  ;;  %9170 = vxpose.xlu1.b32.cont [2/16] (narrow) %v9154_v44, 16  ;;  %v9158_v25 = vadd.f32 %v13707_v35, %v9135_v20 }
0x1218   :  { %v9082_v60 = vpop.permute.xlu0 %9081  ;;  %v9134_v27 = vld [vmem:[#allocation2 + $0x20] sm:$0xff] }
0x1219   :  { %9122 = vst.msk [vmem:[#allocation2 + $0x40] sm:$0xff] %vm9113_vm6, %v9082_v60  ;;  %v9157_v2 = vadd.f32 %v13707_v35, %v9134_v27 }
0x121a   :  { %v9088_v7 = vpop.permute.xlu1 %9087  ;;  %v9137_v63 = vld [vmem:[#allocation2 + $0x38] sm:$0xff] }
0x121b   :  { %9125 = vst.msk [vmem:[#allocation2 + $0x58] sm:$0xff] %vm9113_vm6, %v9088_v7  ;;  %9171 = vxpose.xlu1.b32.cont [3/16] (narrow) %v9155_v30, 16  ;;  %v9160_v15 = vadd.f32 %v13707_v35, %v9137_v63 }
0x121c   :  { %v9086_v36 = vpop.permute.xlu0 %9085  ;;  %v9136_v54 = vld [vmem:[#allocation2 + $0x30] sm:$0xff] }
0x121d   :  { %9124 = vst.msk [vmem:[#allocation2 + $0x50] sm:$0xff] %vm9113_vm6, %v9086_v36  ;;  %v9159_v13 = vadd.f32 %v13707_v35, %v9136_v54 }
0x121e   :  { %v9139_v5 = vld [vmem:[#allocation2 + $0x48] sm:$0xff] }
0x121f   :  { %9172 = vxpose.xlu1.b32.cont [4/16] (narrow) %v9156_v6, 16  ;;  %v9162_v28 = vadd.f32 %v13707_v35, %v9139_v5 }
0x1220   :  { %v9138_v56 = vld [vmem:[#allocation2 + $0x40] sm:$0xff] }
0x1221   :  { %v9161_v12 = vadd.f32 %v13707_v35, %v9138_v56 }
0x1222   :  { %v9141_v14 = vld [vmem:[#allocation2 + $0x58] sm:$0xff] }
0x1223   :  { %9173 = vxpose.xlu1.b32.cont [5/16] (narrow) %v9157_v2, 16  ;;  %v9164_v3 = vadd.f32 %v13707_v35, %v9141_v14 }
0x1224   :  { %v9140_v48 = vld [vmem:[#allocation2 + $0x50] sm:$0xff] }
0x1225   :  { %v9163_v42 = vadd.f32 %v13707_v35, %v9140_v48 }
0x1227   :  { %9174 = vxpose.xlu1.b32.cont [6/16] (narrow) %v9158_v25, 16 }
0x122b   :  { %9175 = vxpose.xlu1.b32.cont [7/16] (narrow) %v9159_v13, 16 }
0x122f   :  { %9176 = vxpose.xlu1.b32.cont [8/16] (narrow) %v9160_v15, 16 }
0x1233   :  { %9177 = vxpose.xlu1.b32.cont [9/16] (narrow) %v9161_v12, 16 }
0x1237   :  { %9178 = vxpose.xlu1.b32.cont [10/16] (narrow) %v9162_v28, 16 }
0x123b   :  { %9179 = vxpose.xlu1.b32.cont [11/16] (narrow) %v9163_v42, 16 }
0x123c   :  { %v9092_v33 = vpop.permute.xlu1 %9091 }
0x123d   :  { %9127 = vst.msk [vmem:[#allocation2 + $0x68] sm:$0xff] %vm9113_vm6, %v9092_v33 }
0x123e   :  { %v9090_v61 = vpop.permute.xlu0 %9089 }
0x123f   :  { %9126 = vst.msk [vmem:[#allocation2 + $0x60] sm:$0xff] %vm9113_vm6, %v9090_v61  ;;  %9180 = vxpose.xlu1.b32.cont [12/16] (narrow) %v9164_v3, 16 }
0x1242   :  { %v9094_v58 = vpop.permute.xlu0 %9093 }
0x1243   :  { %9128 = vst.msk [vmem:[#allocation2 + $0x70] sm:$0xff] %vm9113_vm6, %v9094_v58 }
0x1244   :  { %v9143_v22 = vld [vmem:[#allocation2 + $0x68] sm:$0xff] }
0x1245   :  { %v9166_v10 = vadd.f32 %v13707_v35, %v9143_v22 }
0x1246   :  { %v9096_v49 = vpop.permute.xlu0 %9095  ;;  %v9142_v45 = vld [vmem:[#allocation2 + $0x60] sm:$0xff] }
0x1247   :  { %9129 = vst.msk [vmem:[#allocation2 + $0x78] sm:$0xff] %vm9113_vm6, %v9096_v49  ;;  %v9165_v8 = vadd.f32 %v13707_v35, %v9142_v45 }
0x1249   :  { %9181 = vxpose.xlu1.b32.cont [13/16] (narrow) %v9165_v8, 16 }
0x124a   :  { %v9144_v39 = vld [vmem:[#allocation2 + $0x70] sm:$0xff] }
0x124b   :  { %v9167_v51 = vadd.f32 %v13707_v35, %v9144_v39 }
0x124d   :  { %9182 = vxpose.xlu1.b32.cont [14/16] (narrow) %v9166_v10, 16 }
0x124e   :  { %v9145_v21 = vld [vmem:[#allocation2 + $0x78] sm:$0xff] }
0x124f   :  { %v9168_v52 = vadd.f32 %v13707_v35, %v9145_v21 }
0x1251   :  { %9183 = vxpose.xlu1.b32.cont [15/16] (narrow) %v9167_v51, 16 }
0x1255   :  { %9184 = vxpose.xlu1.b32.end [16/16] (narrow) %v9168_v52, 16 }
0x1295   :  { %v9185_v16 = vpop.trf.xlu1 }
0x1296   :  { %9201 = vst [vmem:[#allocation11] sm:$0xff] %v9185_v16 }
0x1299   :  { %v9186_v17 = vpop.trf.xlu1 }
0x129a   :  { %9202 = vst [vmem:[#allocation11 + $0x8] sm:$0xff] %v9186_v17 }
0x129b   :  { %10839 = shalt.err (!%p10836_p10)
}
0x129c   :  { %s10877_s19 = smov 128  }
0x129d   :  { %9214 = dma.vmem_to_hbm [thread:$0]  %s9209_s17, 256, %s13752_s12, [#allocation4], %s10877_s19, %s10877_s19, %s10874_s10  }
0x129e   :  { %10854 = dma.done.wait [#allocation4], 256  }
0x129f   :  { %10855 = vsyncadd [#allocation4], 4294967040 }
0x12a0   :  { %9218 = vsyncpa [#allocation4], 1 }
0x12a1   :  { %9219 = vsyncpa [#allocation5], 1 }
0x12a2   :  { %9220 = vsyncpa [#allocation7], 1 }
0x12a3   :  { %9221 = vsyncpa [#allocation10], 1 }

</bundles_post_ra>
